<compile_context>
chip_gen: v7x
topology: tpu7x:2x2x1
jax: 0.10.0
libtpu: 0.0.40
codegen_flags: <defaults>
</compile_context>

<pallas_src>
import functools
import math

import jax
import jax.numpy as jnp
from jax.experimental import pallas as pl
from jax.experimental.pallas import tpu as pltpu


# ---------------------------------------------------------------------------
# Parameter layout
# ---------------------------------------------------------------------------
_FF_TAGS = ("fin", "str", "a0", "a1", "a2")


def _param_specs(hidden_size):
    """Returns (weight_specs, vector_specs).

    weight_specs: ordered (name, (fan_in, fan_out), init_fan_in) for every
      matmul weight, stored bf16 with layout (in, out) so the kernel does x @ W.
    vector_specs: ordered (name, width, kind, init_fan_in) for every bias /
      LayerNorm gamma / beta ("b" / "g" / "be"), stored f32 as (width,).
    """
    H = hidden_size
    wspecs, vspecs = [], []

    def lin(pre, fi, fo):
        wspecs.append((pre + "_w", (fi, fo), fi))
        vspecs.append((pre + "_b", fo, "b", fi))

    def ln(pre, n):
        vspecs.append((pre + "_g", n, "g", None))
        vspecs.append((pre + "_be", n, "be", None))

    def residual_block(pre, n):   # Linear(n,2n) LN GELU Dropout Linear(2n,n), + skip
        lin(pre + "_l1", n, 2 * n); ln(pre + "_ln", 2 * n); lin(pre + "_l2", 2 * n, n)

    def attn_block(pre, n):       # seq-len-1 MHA: only V and out projections matter
        lin(pre + "_v", n, n); lin(pre + "_o", n, n); ln(pre + "_ln", n)

    # financial_analyzer
    lin("fa_l1", H, 4 * H); ln("fa_ln1", 4 * H); lin("fa_l2", 4 * H, 2 * H)
    residual_block("fa_rb", 2 * H); lin("fa_l3", 2 * H, H)
    # structure_analyzer
    lin("sa_l1", H, 2 * H); ln("sa_ln1", 2 * H)
    residual_block("sa_rb", 2 * H); attn_block("sa_at", 2 * H); lin("sa_l2", 2 * H, H)
    # attention_scales (3 MHA modules, all applied to a length-1 sequence)
    for i in range(3):
        lin(f"as{i}_v", H, H); lin(f"as{i}_o", H, H)
    # feature_fusion
    # TODO(synk): spec declares Linear(3H,6H) but the forward concatenates 5H
    # of features; the fusion input is sized to the real 5H concat (5 chunks).
    for tag in _FF_TAGS:
        wspecs.append((f"ff_l1_{tag}_w", (H, 6 * H), 5 * H))
    vspecs.append(("ff_l1_b", 6 * H, "b", 5 * H))
    ln("ff_ln1", 6 * H)
    residual_block("ff_rb", 6 * H); attn_block("ff_at", 6 * H)
    lin("ff_l2", 6 * H, 3 * H); ln("ff_ln2", 3 * H); lin("ff_l3", 3 * H, H)
    # confidence_booster
    lin("cb_l1", H, 2 * H); ln("cb_ln", 2 * H); lin("cb_l2", 2 * H, H)
    return wspecs, vspecs


def init_params(key, hidden_size):
    wspecs, vspecs = _param_specs(hidden_size)
    keys = jax.random.split(key, len(wspecs) + len(vspecs))
    params, ki = {}, 0
    for name, shape, fan_in in wspecs:
        bound = 1.0 / math.sqrt(fan_in)
        w = jax.random.uniform(keys[ki], shape, jnp.float32, -bound, bound)
        params[name] = w.astype(jnp.bfloat16)   # bf16 storage: MXU-native, half the VMEM/HBM
        ki += 1
    for name, width, kind, fan_in in vspecs:
        if kind == "b":
            bound = 1.0 / math.sqrt(fan_in)
            params[name] = jax.random.uniform(keys[ki], (width,), jnp.float32, -bound, bound)
        elif kind == "g":
            params[name] = jnp.ones((width,), jnp.float32)
        else:
            params[name] = jnp.zeros((width,), jnp.float32)
        ki += 1
    return params


# ---------------------------------------------------------------------------
# Forward math shared by the kernel body and the host-side reference.
#   mm(h, weight_name) -> h @ W (f32 accumulation), vec(name) -> (1, width) f32
# ---------------------------------------------------------------------------
def _forward_math(x, mm, vec):
    def linear(h, pre):
        return mm(h, pre + "_w") + vec(pre + "_b")

    def layernorm(h, pre, eps=1e-5):
        # E[x^2] - mean^2 form: the two lane reductions are independent.  The
        # max(.,0) clamp guards cancellation; switch to the two-pass
        # (x - mean)^2 form if accuracy drift is ever observed at large H.
        m = jnp.mean(h, axis=-1, keepdims=True)
        ms = jnp.mean(h * h, axis=-1, keepdims=True)
        var = jnp.maximum(ms - m * m, 0.0)
        return (h - m) * jax.lax.rsqrt(var + eps) * vec(pre + "_g") + vec(pre + "_be")

    def gelu(z):
        # Exact erf-based GELU (nn.GELU() default); erf runs on the EUP.
        return 0.5 * z * (1.0 + jax.lax.erf(z * 0.7071067811865476))

    def residual_block(h, pre):
        z = gelu(layernorm(linear(h, pre + "_l1"), pre + "_ln"))
        # Dropout(0.1): identity in eval mode.
        return h + linear(z, pre + "_l2")

    def attn_block(h, pre):
        # SelfAttentionBlock on a length-1 sequence: softmax over one key is 1,
        # so MHA(x,x,x) == out_proj(v_proj(x)) for any head count.
        a = linear(linear(h, pre + "_v"), pre + "_o")
        # Dropout(0.1): identity in eval mode.
        return layernorm(h + a, pre + "_ln")

    # --- financial_analyzer ---
    h = gelu(layernorm(linear(x, "fa_l1"), "fa_ln1"))
    h = linear(h, "fa_l2")
    h = residual_block(h, "fa_rb")
    fin = linear(h, "fa_l3")

    # --- structure_analyzer ---
    h = gelu(layernorm(linear(x, "sa_l1"), "sa_ln1"))
    h = residual_block(h, "sa_rb")
    h = attn_block(h, "sa_at")
    stru = linear(h, "sa_l2")

    # --- attention_scales (length-1 sequence -> out_proj(v_proj(x))) ---
    attn_feats = [linear(linear(x, f"as{i}_v"), f"as{i}_o") for i in range(3)]

    # --- feature_fusion ---
    # concat([fin, stru, a0, a1, a2]) @ W  ==  sum of 5 per-feature matmuls
    # (no in-kernel concat / lane relayout).
    h = vec("ff_l1_b")
    for feat, tag in zip([fin, stru] + attn_feats, _FF_TAGS):
        h = h + mm(feat, f"ff_l1_{tag}_w")
    h = gelu(layernorm(h, "ff_ln1"))
    h = residual_block(h, "ff_rb")
    h = attn_block(h, "ff_at")
    h = linear(h, "ff_l2")
    h = gelu(layernorm(h, "ff_ln2"))
    h = linear(h, "ff_l3")

    # --- confidence_booster ---
    z = gelu(layernorm(linear(h, "cb_l1"), "cb_ln"))
    return linear(z, "cb_l2")


# ---------------------------------------------------------------------------
# HBM weight streaming (manual, double-buffered, N-column tiled)
# ---------------------------------------------------------------------------
def _stream_matmul(x_bf16, w_hbm, wbuf, sem, out_ref, fo, tn):
    """y = x @ W with W streamed from HBM in N-column tiles.

    x_bf16 : (tb, fi) bf16 value (VMEM resident)
    w_hbm  : (fi, fo) bf16 ref in HBM (memory_space=pl.ANY)
    wbuf   : (2, fi, tn) bf16 VMEM scratch (double buffer)
    sem    : (2,) DMA semaphores
    out_ref: (tb, >= fo) f32 VMEM scratch receiving the chunk results
    fo // tn is host-static, so the loop is statically unrolled and every
    slice below is static.
    """
    nt = fo // tn

    def chunk_copy(ni, slot):
        return pltpu.make_async_copy(
            w_hbm.at[:, ni * tn:(ni + 1) * tn], wbuf.at[slot], sem.at[slot])

    chunk_copy(0, 0).start()
    for ni in range(nt):
        slot = ni % 2
        chunk_copy(ni, slot).wait()
        if ni + 1 < nt:                       # prefetch next chunk into the other slot
            chunk_copy(ni + 1, 1 - slot).start()
        out_ref[:, ni * tn:(ni + 1) * tn] = jnp.dot(
            x_bf16, wbuf[slot], preferred_element_type=jnp.float32)
    return out_ref[:, :fo]


# ---------------------------------------------------------------------------
# Device / feature helpers
# ---------------------------------------------------------------------------
def _vmem_budget_bytes():
    """Scoped-VMEM budget clamped to real device capacity minus headroom.

    v5e/v6e have 128 MiB per TensorCore, v7x only 64 MiB; requesting more than
    the device has either fails or is silently clamped and skews every
    downstream tiling decision.
    """
    headroom = 8 * 1024 * 1024
    try:                                        # narrow: capability query only
        cap = int(pltpu.get_tpu_info().vmem_capacity_bytes)
    except Exception:
        cap = 0
    if cap <= 0:
        cap = 64 * 1024 * 1024                  # conservative default (v7x per-TC VMEM)
    return max(16 * 1024 * 1024, cap - headroom)


@functools.lru_cache(maxsize=None)
def _single_buffered_mode():
    """pl.Buffered(1) pipeline mode if this Pallas supports it, else None.

    Explicit one-off feature probe on a tiny kernel: the real kernel is never
    wrapped in a broad try/except fallback (which would mask VMEM OOM / real
    lowering errors and retry with a *more* VMEM-hungry config).
    """
    if not hasattr(pl, "Buffered"):
        return None
    try:
        try:
            mode = pl.Buffered(buffer_count=1)
        except TypeError:
            mode = pl.Buffered(1)

        def probe(x_ref, o_ref):
            o_ref[...] = x_ref[...] + 1.0

        fn = pl.pallas_call(
            probe,
            out_shape=jax.ShapeDtypeStruct((8, 128), jnp.float32),
            grid=(2,),
            in_specs=[pl.BlockSpec((8, 128), lambda i: (0, 0), pipeline_mode=mode)],
            out_specs=pl.BlockSpec((8, 128), lambda i: (0, 0)))
        jax.block_until_ready(fn(jnp.zeros((8, 128), jnp.float32)))
        return mode
    except Exception:
        return None


def _pick_batch_tile(B):
    """Largest batch tile that divides B, capped at 256 rows.

    The grid is a serial loop on single-TensorCore chips (v5e/v6e), so small
    batches are NOT split into tiny grid steps (that only shrinks the MXU
    M-dim and adds ~0.35 us/step).  For large B prefer an even step count so
    both v7x TensorCores get work under dimension_semantics=("parallel",).
    """
    if B <= 256:
        return B
    cands = [t for t in (256, 128, 64, 32, 16, 8) if B % t == 0]
    if not cands:
        return B
    if B >= 512:
        for t in cands:
            if (B // t) % 2 == 0:
                return t
    return cands[0]


# feature_fusion giants (~470 of ~670 H^2 weight bytes): streamed first whenever
# the resident footprint would not fit the VMEM budget.
_HEAVY_WEIGHTS = frozenset(
    {"ff_rb_l1_w", "ff_rb_l2_w", "ff_at_v_w", "ff_at_o_w", "ff_l2_w"}
    | {f"ff_l1_{t}_w" for t in _FF_TAGS})


def _pick_lane_tile(fo):
    for t in (512, 256, 128):
        if fo % t == 0:
            return t
    return 128


# ---------------------------------------------------------------------------
# Pallas call
# ---------------------------------------------------------------------------
def _pallas_forward(x2d, params, *, batch_tile, force_stream):
    B, H = x2d.shape
    tb = batch_tile
    grid = (B // tb,)
    wspecs, vspecs = _param_specs(H)
    w_names = [s[0] for s in wspecs]
    w_shape = {s[0]: s[1] for s in wspecs}

    # ---- bias / LayerNorm vectors: one stacked (count, width) array per width
    # (a lone (1,N) block is sublane-padded to 8 rows and costs its own DMA
    # descriptor; packing reclaims both).
    widths, vec_rows, vec_index = [], {}, {}
    for name, width, _, _ in vspecs:
        if width not in vec_rows:
            vec_rows[width] = []
            widths.append(width)
        vec_index[name] = (width, len(vec_rows[width]))
        vec_rows[width].append(name)
    vec_stacks = {w: jnp.stack([params[n] for n in vec_rows[w]], axis=0) for w in widths}

    def nbytes(a):
        return int(a.size) * a.dtype.itemsize

    weight_bytes = {n: nbytes(params[n]) for n in w_names}
    vec_bytes = sum(nbytes(v) for v in vec_stacks.values())
    act_bytes = 64 * tb * H * 4                     # rough f32 activation working set
    budget = _vmem_budget_bytes()
    buffered_mode = _single_buffered_mode()
    buf_factor = 1 if buffered_mode is not None else 2

    # ---- decide which weights stay VMEM-resident and which are streamed.
    def streamable(name):
        fi, fo = w_shape[name]
        return fo % 128 == 0 and fi % 8 == 0

    def vmem_estimate(streamed_set):
        res_w = sum(weight_bytes[n] for n in w_names if n not in streamed_set)
        bufs, max_fo = {}, 0
        for n in streamed_set:
            fi, fo = w_shape[n]
            bufs[(fi, _pick_lane_tile(fo))] = 2 * fi * _pick_lane_tile(fo) * 2
            max_fo = max(max_fo, fo)
        stream_b = sum(bufs.values()) + (tb * max_fo * 4 if streamed_set else 0)
        return buf_factor * (res_w + vec_bytes) + stream_b + act_bytes

    streamed = []
    if force_stream:
        streamed = [n for n in w_names if n in _HEAVY_WEIGHTS and streamable(n)]
    elif vmem_estimate(frozenset()) > budget:
        cand = sorted((n for n in w_names if streamable(n)),
                      key=lambda n: (n not in _HEAVY_WEIGHTS, -weight_bytes[n]))
        for n in cand:
            streamed.append(n)
            if vmem_estimate(frozenset(streamed)) <= budget:
                break
        # TODO(synk): if still over budget (H >~ 768 on v7x's 64 MiB) the
        # streamed matmuls also need K-tiling and a smaller batch tile.
    str_set = frozenset(streamed)
    res_names = [n for n in w_names if n not in str_set]
    w_tn = {n: _pick_lane_tile(w_shape[n][1]) for n in streamed}
    wbuf_keys = []
    for n in streamed:
        key = (w_shape[n][0], w_tn[n])
        if key not in wbuf_keys:
            wbuf_keys.append(key)
    max_fo = max((w_shape[n][1] for n in streamed), default=0)

    # ---- BlockSpecs
    def const_spec(shape):
        # Grid-invariant block: single VMEM buffer when supported (the block
        # never changes across grid steps).
        if buffered_mode is not None:
            return pl.BlockSpec(shape, lambda i: (0, 0), pipeline_mode=buffered_mode)
        return pl.BlockSpec(shape, lambda i: (0, 0))

    in_specs = [pl.BlockSpec((tb, H), lambda i: (i, 0))]
    in_specs += [const_spec(w_shape[n]) for n in res_names]
    in_specs += [pl.BlockSpec(memory_space=pl.ANY) for _ in streamed]
    in_specs += [const_spec(vec_stacks[w].shape) for w in widths]

    inputs = [x2d]
    inputs += [params[n] for n in res_names]
    inputs += [params[n] for n in streamed]
    inputs += [vec_stacks[w] for w in widths]

    scratch_shapes = []
    if streamed:
        scratch_shapes += [pltpu.VMEM((2, fi, tn), jnp.bfloat16) for fi, tn in wbuf_keys]
        scratch_shapes += [pltpu.SemaphoreType.DMA((2,)),
                           pltpu.VMEM((tb, max_fo), jnp.float32)]

    n_res, n_str, n_vec, n_buf = len(res_names), len(streamed), len(widths), len(wbuf_keys)

    def kernel(*refs):
        x_ref = refs[0]
        res_refs = dict(zip(res_names, refs[1:1 + n_res]))
        str_refs = dict(zip(streamed, refs[1 + n_res:1 + n_res + n_str]))
        vec_refs = dict(zip(widths, refs[1 + n_res + n_str:1 + n_res + n_str + n_vec]))
        out_ref = refs[1 + n_res + n_str + n_vec]
        wbufs = dma_sem = mm_out = None
        if streamed:
            sbase = 2 + n_res + n_str + n_vec
            wbufs = dict(zip(wbuf_keys, refs[sbase:sbase + n_buf]))
            dma_sem = refs[sbase + n_buf]
            mm_out = refs[sbase + n_buf + 1]

        def vec(name):
            width, row = vec_index[name]
            return vec_refs[width][row:row + 1, :]

        def mm(h, name):
            hb = h.astype(jnp.bfloat16)           # bf16 x bf16 -> f32 on the MXU
            if name in str_set:
                fi, fo = w_shape[name]
                return _stream_matmul(hb, str_refs[name], wbufs[(fi, w_tn[name])],
                                      dma_sem, mm_out, fo, w_tn[name])
            # Resident weight loaded at the point of use, so Mosaic can place
            # the load next to its consuming matmul (no long live ranges).
            return jnp.dot(hb, res_refs[name][...], preferred_element_type=jnp.float32)

        out_ref[...] = _forward_math(x_ref[...], mm, vec).astype(out_ref.dtype)

    streamed_bytes = sum(weight_bytes[n] for n in streamed)
    resident_w_bytes = sum(weight_bytes[n] for n in res_names)
    matmul_macs = sum(fi * fo for fi, fo in w_shape.values())
    cost = pl.CostEstimate(
        flops=int(2 * B * matmul_macs),
        transcendentals=int(B * 37 * H),                        # erf lanes per row
        bytes_accessed=int(resident_w_bytes + vec_bytes
                           + streamed_bytes * (B // tb)         # streamed weights re-read per batch tile
                           + 2 * B * H * 4))

    return pl.pallas_call(
        kernel,
        out_shape=jax.ShapeDtypeStruct((B, H), jnp.float32),
        grid=grid,
        in_specs=in_specs,
        out_specs=pl.BlockSpec((tb, H), lambda i: (i, 0)),
        scratch_shapes=scratch_shapes,
        compiler_params=pltpu.CompilerParams(
            # NOTE: on v7x both TensorCores independently re-stream the HBM
            # weight tiles under "parallel"; small batches collapse to a single
            # grid step (one core) via _pick_batch_tile anyway.
            dimension_semantics=("parallel",),
            vmem_limit_bytes=int(budget)),
        cost_estimate=cost,
    )(*inputs)


def document_analyzer(x, params, *, batch_tile=None, force_stream=False):
    """DocumentAnalyzer forward.  x: (B, S, H) / (B, H) / (H,).  Returns (B, H) f32.

    force_stream=True forces the heavy feature_fusion weights onto the
    HBM-streaming path even when they would fit in VMEM (used by the self-test).
    """
    # TODO(synk): production shapes should pick H as a multiple of 128 (lane
    # width).  Naive zero-padding of H is not done here because every LayerNorm
    # width derives from H and padding would change mean/var unless the padded
    # lanes were masked out of the reductions.
    if x.ndim == 3:
        x = jnp.mean(x, axis=1)          # sequence mean-pool, as in the PyTorch forward
    elif x.ndim == 1:
        x = x[None, :]
    x = x.astype(jnp.float32)
    B, _ = x.shape
    tb = _pick_batch_tile(B) if batch_tile is None else batch_tile
    assert B % tb == 0, "batch must be divisible by batch_tile"
    return _pallas_forward(x, params, batch_tile=tb, force_stream=force_stream)


def reference_forward(x, params):
    """Pure-JAX reference (same math helpers, no Pallas)."""
    if x.ndim == 3:
        x = jnp.mean(x, axis=1)
    elif x.ndim == 1:
        x = x[None, :]
    x = x.astype(jnp.float32)

    def mm(h, name):
        return jnp.dot(h.astype(jnp.bfloat16), params[name].astype(jnp.bfloat16),
                       preferred_element_type=jnp.float32)

    def vec(name):
        return params[name][None, :]

    return _forward_math(x, mm, vec)


if __name__ == "__main__":
    key = jax.random.PRNGKey(0)
    k_x1, k_p1, k_x2, k_p2 = jax.random.split(key, 4)

    # Test 1: small demo shape, fully VMEM-resident weights.
    B, S, H = 16, 8, 32
    x = jax.random.normal(k_x1, (B, S, H), jnp.float32)
    params = init_params(k_p1, H)
    out = jax.block_until_ready(document_analyzer(x, params))
    ref = reference_forward(x, params)
    assert out.shape == (B, H)
    assert jnp.allclose(out, ref, atol=2e-2, rtol=2e-2), "resident-path mismatch vs reference"

    # Test 2: lane-aligned H with the HBM-streaming path forced on, so the
    # streamed feature_fusion matmuls (manual double-buffered DMA) are
    # exercised and checked too.
    B2, S2, H2 = 8, 4, 128
    x2 = jax.random.normal(k_x2, (B2, S2, H2), jnp.float32)
    params2 = init_params(k_p2, H2)
    out2 = jax.block_until_ready(document_analyzer(x2, params2, force_stream=True))
    ref2 = reference_forward(x2, params2)
    assert out2.shape == (B2, H2)
    assert jnp.allclose(out2, ref2, atol=2e-2, rtol=2e-2), "streamed-path mismatch vs reference"

    print("KERNEL_OK")
</pallas_src>

<mosaic_0001>
module attributes {stable_mosaic.version = 11 : i64} {
  func.func @probe(%arg0: i32, %arg1: memref<8x128xf32, #tpu.memory_space<vmem>>, %arg2: memref<8x128xf32, #tpu.memory_space<vmem>>) attributes {dimension_semantics = [#tpu.dimension_semantics<arbitrary>], iteration_bounds = array<i64: 2>, scalar_prefetch = 0 : i64, scratch_operands = 0 : i64, tpu.core_type = #tpu.core_type<tc>, window_params = [{pipeline_mode = #tpu.pipeline_mode<synchronous>, transform_indices = @transform_0, window_bounds = array<i64: 8, 128>}, {pipeline_mode = #tpu.pipeline_mode<synchronous>, transform_indices = @transform_1, window_bounds = array<i64: 8, 128>}]} {
    %c0 = arith.constant 0 : index
    %c0_0 = arith.constant 0 : index
    %0 = vector.load %arg1[%c0, %c0_0] : memref<8x128xf32, #tpu.memory_space<vmem>>, vector<8x128xf32>
    %cst = arith.constant 1.000000e+00 : f32
    %1 = vector.broadcast %cst : f32 to vector<8x128xf32>
    %2 = arith.addf %0, %1 : vector<8x128xf32>
    %c0_1 = arith.constant 0 : index
    %c0_2 = arith.constant 0 : index
    %3 = vector.load %arg2[%c0_1, %c0_2] : memref<8x128xf32, #tpu.memory_space<vmem>>, vector<8x128xf32>
    tpu.vector_store %arg2[%c0_1, %c0_2], %2 {strides = array<i32>} : memref<8x128xf32, #tpu.memory_space<vmem>>, vector<8x128xf32>,
    return
  }
  func.func @transform_0(%arg0: i32) -> (i32, i32) {
    %c0_i32 = arith.constant 0 : i32
    %c0_i32_0 = arith.constant 0 : i32
    %c0_i32_1 = arith.constant 0 : i32
    return %c0_i32, %c0_i32_0 : i32, i32
  }
  func.func @transform_1(%arg0: i32) -> (i32, i32) {
    %c0_i32 = arith.constant 0 : i32
    %c0_i32_0 = arith.constant 0 : i32
    %c0_i32_1 = arith.constant 0 : i32
    return %c0_i32, %c0_i32_0 : i32, i32
  }
}

module attributes {stable_mosaic.version = 11 : i64} {
  func.func @kernel(%arg0: i32, %arg1: memref<16x32xf32, #tpu.memory_space<vmem>>, %arg2: memref<32x128xbf16, #tpu.memory_space<vmem>>, %arg3: memref<128x64xbf16, #tpu.memory_space<vmem>>, %arg4: memref<64x128xbf16, #tpu.memory_space<vmem>>, %arg5: memref<128x64xbf16, #tpu.memory_space<vmem>>, %arg6: memref<64x32xbf16, #tpu.memory_space<vmem>>, %arg7: memref<32x64xbf16, #tpu.memory_space<vmem>>, %arg8: memref<64x128xbf16, #tpu.memory_space<vmem>>, %arg9: memref<128x64xbf16, #tpu.memory_space<vmem>>, %arg10: memref<64x64xbf16, #tpu.memory_space<vmem>>, %arg11: memref<64x64xbf16, #tpu.memory_space<vmem>>, %arg12: memref<64x32xbf16, #tpu.memory_space<vmem>>, %arg13: memref<32x32xbf16, #tpu.memory_space<vmem>>, %arg14: memref<32x32xbf16, #tpu.memory_space<vmem>>, %arg15: memref<32x32xbf16, #tpu.memory_space<vmem>>, %arg16: memref<32x32xbf16, #tpu.memory_space<vmem>>, %arg17: memref<32x32xbf16, #tpu.memory_space<vmem>>, %arg18: memref<32x32xbf16, #tpu.memory_space<vmem>>, %arg19: memref<32x192xbf16, #tpu.memory_space<vmem>>, %arg20: memref<32x192xbf16, #tpu.memory_space<vmem>>, %arg21: memref<32x192xbf16, #tpu.memory_space<vmem>>, %arg22: memref<32x192xbf16, #tpu.memory_space<vmem>>, %arg23: memref<32x192xbf16, #tpu.memory_space<vmem>>, %arg24: memref<192x384xbf16, #tpu.memory_space<vmem>>, %arg25: memref<384x192xbf16, #tpu.memory_space<vmem>>, %arg26: memref<192x192xbf16, #tpu.memory_space<vmem>>, %arg27: memref<192x192xbf16, #tpu.memory_space<vmem>>, %arg28: memref<192x96xbf16, #tpu.memory_space<vmem>>, %arg29: memref<96x32xbf16, #tpu.memory_space<vmem>>, %arg30: memref<32x64xbf16, #tpu.memory_space<vmem>>, %arg31: memref<64x32xbf16, #tpu.memory_space<vmem>>, %arg32: memref<9x128xf32, #tpu.memory_space<vmem>>, %arg33: memref<13x64xf32, #tpu.memory_space<vmem>>, %arg34: memref<10x32xf32, #tpu.memory_space<vmem>>, %arg35: memref<8x192xf32, #tpu.memory_space<vmem>>, %arg36: memref<3x384xf32, #tpu.memory_space<vmem>>, %arg37: memref<3x96xf32, #tpu.memory_space<vmem>>, %arg38: memref<16x32xf32, #tpu.memory_space<vmem>>) attributes {dimension_semantics = [#tpu.dimension_semantics<parallel>], iteration_bounds = array<i64: 1>, scalar_prefetch = 0 : i64, scratch_operands = 0 : i64, tpu.core_type = #tpu.core_type<tc>, window_params = [{transform_indices = @transform_0, window_bounds = array<i64: 16, 32>}, {pipeline_mode = #tpu.pipeline_mode<synchronous>, transform_indices = @transform_1, window_bounds = array<i64: 32, 128>}, {pipeline_mode = #tpu.pipeline_mode<synchronous>, transform_indices = @transform_2, window_bounds = array<i64: 128, 64>}, {pipeline_mode = #tpu.pipeline_mode<synchronous>, transform_indices = @transform_3, window_bounds = array<i64: 64, 128>}, {pipeline_mode = #tpu.pipeline_mode<synchronous>, transform_indices = @transform_4, window_bounds = array<i64: 128, 64>}, {pipeline_mode = #tpu.pipeline_mode<synchronous>, transform_indices = @transform_5, window_bounds = array<i64: 64, 32>}, {pipeline_mode = #tpu.pipeline_mode<synchronous>, transform_indices = @transform_6, window_bounds = array<i64: 32, 64>}, {pipeline_mode = #tpu.pipeline_mode<synchronous>, transform_indices = @transform_7, window_bounds = array<i64: 64, 128>}, {pipeline_mode = #tpu.pipeline_mode<synchronous>, transform_indices = @transform_8, window_bounds = array<i64: 128, 64>}, {pipeline_mode = #tpu.pipeline_mode<synchronous>, transform_indices = @transform_9, window_bounds = array<i64: 64, 64>}, {pipeline_mode = #tpu.pipeline_mode<synchronous>, transform_indices = @transform_10, window_bounds = array<i64: 64, 64>}, {pipeline_mode = #tpu.pipeline_mode<synchronous>, transform_indices = @transform_11, window_bounds = array<i64: 64, 32>}, {pipeline_mode = #tpu.pipeline_mode<synchronous>, transform_indices = @transform_12, window_bounds = array<i64: 32, 32>}, {pipeline_mode = #tpu.pipeline_mode<synchronous>, transform_indices = @transform_13, window_bounds = array<i64: 32, 32>}, {pipeline_mode = #tpu.pipeline_mode<synchronous>, transform_indices = @transform_14, window_bounds = array<i64: 32, 32>}, {pipeline_mode = #tpu.pipeline_mode<synchronous>, transform_indices = @transform_15, window_bounds = array<i64: 32, 32>}, {pipeline_mode = #tpu.pipeline_mode<synchronous>, transform_indices = @transform_16, window_bounds = array<i64: 32, 32>}, {pipeline_mode = #tpu.pipeline_mode<synchronous>, transform_indices = @transform_17, window_bounds = array<i64: 32, 32>}, {pipeline_mode = #tpu.pipeline_mode<synchronous>, transform_indices = @transform_18, window_bounds = array<i64: 32, 192>}, {pipeline_mode = #tpu.pipeline_mode<synchronous>, transform_indices = @transform_19, window_bounds = array<i64: 32, 192>}, {pipeline_mode = #tpu.pipeline_mode<synchronous>, transform_indices = @transform_20, window_bounds = array<i64: 32, 192>}, {pipeline_mode = #tpu.pipeline_mode<synchronous>, transform_indices = @transform_21, window_bounds = array<i64: 32, 192>}, {pipeline_mode = #tpu.pipeline_mode<synchronous>, transform_indices = @transform_22, window_bounds = array<i64: 32, 192>}, {pipeline_mode = #tpu.pipeline_mode<synchronous>, transform_indices = @transform_23, window_bounds = array<i64: 192, 384>}, {pipeline_mode = #tpu.pipeline_mode<synchronous>, transform_indices = @transform_24, window_bounds = array<i64: 384, 192>}, {pipeline_mode = #tpu.pipeline_mode<synchronous>, transform_indices = @transform_25, window_bounds = array<i64: 192, 192>}, {pipeline_mode = #tpu.pipeline_mode<synchronous>, transform_indices = @transform_26, window_bounds = array<i64: 192, 192>}, {pipeline_mode = #tpu.pipeline_mode<synchronous>, transform_indices = @transform_27, window_bounds = array<i64: 192, 96>}, {pipeline_mode = #tpu.pipeline_mode<synchronous>, transform_indices = @transform_28, window_bounds = array<i64: 96, 32>}, {pipeline_mode = #tpu.pipeline_mode<synchronous>, transform_indices = @transform_29, window_bounds = array<i64: 32, 64>}, {pipeline_mode = #tpu.pipeline_mode<synchronous>, transform_indices = @transform_30, window_bounds = array<i64: 64, 32>}, {pipeline_mode = #tpu.pipeline_mode<synchronous>, transform_indices = @transform_31, window_bounds = array<i64: 9, 128>}, {pipeline_mode = #tpu.pipeline_mode<synchronous>, transform_indices = @transform_32, window_bounds = array<i64: 13, 64>}, {pipeline_mode = #tpu.pipeline_mode<synchronous>, transform_indices = @transform_33, window_bounds = array<i64: 10, 32>}, {pipeline_mode = #tpu.pipeline_mode<synchronous>, transform_indices = @transform_34, window_bounds = array<i64: 8, 192>}, {pipeline_mode = #tpu.pipeline_mode<synchronous>, transform_indices = @transform_35, window_bounds = array<i64: 3, 384>}, {pipeline_mode = #tpu.pipeline_mode<synchronous>, transform_indices = @transform_36, window_bounds = array<i64: 3, 96>}, {transform_indices = @transform_37, window_bounds = array<i64: 16, 32>}]} {
    %c0 = arith.constant 0 : index
    %c0_0 = arith.constant 0 : index
    %0 = vector.load %arg1[%c0, %c0_0] : memref<16x32xf32, #tpu.memory_space<vmem>>, vector<16x32xf32>
    %1 = arith.truncf %0 : vector<16x32xf32> to vector<16x32xbf16>
    %c0_1 = arith.constant 0 : index
    %c0_2 = arith.constant 0 : index
    %2 = vector.load %arg2[%c0_1, %c0_2] : memref<32x128xbf16, #tpu.memory_space<vmem>>, vector<32x128xbf16>
    %cst = arith.constant dense<0.000000e+00> : vector<16x128xf32>
    %3 = tpu.matmul %1, %2, %cst {dimension_numbers = #tpu.dot_dimension_numbers<[1], [0], [0], [1], [0, 0, 1, 1], [], []>} : vector<16x32xbf16>, vector<32x128xbf16>, vector<16x128xf32> -> vector<16x128xf32>
    %c0_3 = arith.constant 0 : index
    %c0_4 = arith.constant 0 : index
    %4 = vector.load %arg32[%c0_3, %c0_4] : memref<9x128xf32, #tpu.memory_space<vmem>>, vector<1x128xf32>
    %5 = vector.broadcast %4 : vector<1x128xf32> to vector<16x128xf32>
    %6 = arith.addf %3, %5 : vector<16x128xf32>
    %cst_5 = arith.constant dense<0.000000e+00> : vector<16xf32>
    %7 = vector.multi_reduction <add>, %6, %cst_5 [1] : vector<16x128xf32> to vector<16xf32>
    %8 = vector.shape_cast %7 : vector<16xf32> to vector<16x1xf32>
    %cst_6 = arith.constant 1.280000e+02 : f32
    %9 = vector.broadcast %cst_6 : f32 to vector<16x1xf32>
    %10 = arith.divf %8, %9 : vector<16x1xf32>
    %11 = arith.mulf %6, %6 : vector<16x128xf32>
    %cst_7 = arith.constant dense<0.000000e+00> : vector<16xf32>
    %12 = vector.multi_reduction <add>, %11, %cst_7 [1] : vector<16x128xf32> to vector<16xf32>
    %13 = vector.shape_cast %12 : vector<16xf32> to vector<16x1xf32>
    %cst_8 = arith.constant 1.280000e+02 : f32
    %14 = vector.broadcast %cst_8 : f32 to vector<16x1xf32>
    %15 = arith.divf %13, %14 : vector<16x1xf32>
    %16 = arith.mulf %10, %10 : vector<16x1xf32>
    %17 = arith.subf %15, %16 : vector<16x1xf32>
    %cst_9 = arith.constant 0.000000e+00 : f32
    %18 = vector.broadcast %cst_9 : f32 to vector<16x1xf32>
    %19 = arith.maximumf %17, %18 : vector<16x1xf32>
    %20 = vector.broadcast %10 : vector<16x1xf32> to vector<16x128xf32>
    %21 = arith.subf %6, %20 : vector<16x128xf32>
    %cst_10 = arith.constant 9.99999974E-6 : f32
    %22 = vector.broadcast %cst_10 : f32 to vector<16x1xf32>
    %23 = arith.addf %19, %22 : vector<16x1xf32>
    %24 = math.rsqrt %23 : vector<16x1xf32>
    %25 = vector.broadcast %24 : vector<16x1xf32> to vector<16x128xf32>
    %26 = arith.mulf %21, %25 : vector<16x128xf32>
    %c1 = arith.constant 1 : index
    %c0_11 = arith.constant 0 : index
    %27 = vector.load %arg32[%c1, %c0_11] : memref<9x128xf32, #tpu.memory_space<vmem>>, vector<1x128xf32>
    %28 = vector.broadcast %27 : vector<1x128xf32> to vector<16x128xf32>
    %29 = arith.mulf %26, %28 : vector<16x128xf32>
    %c2 = arith.constant 2 : index
    %c0_12 = arith.constant 0 : index
    %30 = vector.load %arg32[%c2, %c0_12] : memref<9x128xf32, #tpu.memory_space<vmem>>, vector<1x128xf32>
    %31 = vector.broadcast %30 : vector<1x128xf32> to vector<16x128xf32>
    %32 = arith.addf %29, %31 : vector<16x128xf32>
    %cst_13 = arith.constant 5.000000e-01 : f32
    %33 = vector.broadcast %cst_13 : f32 to vector<16x128xf32>
    %34 = arith.mulf %33, %32 : vector<16x128xf32>
    %cst_14 = arith.constant 0.707106769 : f32
    %35 = vector.broadcast %cst_14 : f32 to vector<16x128xf32>
    %36 = arith.mulf %32, %35 : vector<16x128xf32>
    %37 = math.erf %36 : vector<16x128xf32>
    %cst_15 = arith.constant 1.000000e+00 : f32
    %38 = vector.broadcast %cst_15 : f32 to vector<16x128xf32>
    %39 = arith.addf %38, %37 : vector<16x128xf32>
    %40 = arith.mulf %34, %39 : vector<16x128xf32>
    %41 = arith.truncf %40 : vector<16x128xf32> to vector<16x128xbf16>
    %c0_16 = arith.constant 0 : index
    %c0_17 = arith.constant 0 : index
    %42 = vector.load %arg3[%c0_16, %c0_17] : memref<128x64xbf16, #tpu.memory_space<vmem>>, vector<128x64xbf16>
    %cst_18 = arith.constant dense<0.000000e+00> : vector<16x64xf32>
    %43 = tpu.matmul %41, %42, %cst_18 {dimension_numbers = #tpu.dot_dimension_numbers<[1], [0], [0], [1], [0, 0, 1, 1], [], []>} : vector<16x128xbf16>, vector<128x64xbf16>, vector<16x64xf32> -> vector<16x64xf32>
    %c0_19 = arith.constant 0 : index
    %c0_20 = arith.constant 0 : index
    %44 = vector.load %arg33[%c0_19, %c0_20] : memref<13x64xf32, #tpu.memory_space<vmem>>, vector<1x64xf32>
    %45 = vector.broadcast %44 : vector<1x64xf32> to vector<16x64xf32>
    %46 = arith.addf %43, %45 : vector<16x64xf32>
    %47 = arith.truncf %46 : vector<16x64xf32> to vector<16x64xbf16>
    %c0_21 = arith.constant 0 : index
    %c0_22 = arith.constant 0 : index
    %48 = vector.load %arg4[%c0_21, %c0_22] : memref<64x128xbf16, #tpu.memory_space<vmem>>, vector<64x128xbf16>
    %cst_23 = arith.constant dense<0.000000e+00> : vector<16x128xf32>
    %49 = tpu.matmul %47, %48, %cst_23 {dimension_numbers = #tpu.dot_dimension_numbers<[1], [0], [0], [1], [0, 0, 1, 1], [], []>} : vector<16x64xbf16>, vector<64x128xbf16>, vector<16x128xf32> -> vector<16x128xf32>
    %c3 = arith.constant 3 : index
    %c0_24 = arith.constant 0 : index
    %50 = vector.load %arg32[%c3, %c0_24] : memref<9x128xf32, #tpu.memory_space<vmem>>, vector<1x128xf32>
    %51 = vector.broadcast %50 : vector<1x128xf32> to vector<16x128xf32>
    %52 = arith.addf %49, %51 : vector<16x128xf32>
    %cst_25 = arith.constant dense<0.000000e+00> : vector<16xf32>
    %53 = vector.multi_reduction <add>, %52, %cst_25 [1] : vector<16x128xf32> to vector<16xf32>
    %54 = vector.shape_cast %53 : vector<16xf32> to vector<16x1xf32>
    %cst_26 = arith.constant 1.280000e+02 : f32
    %55 = vector.broadcast %cst_26 : f32 to vector<16x1xf32>
    %56 = arith.divf %54, %55 : vector<16x1xf32>
    %57 = arith.mulf %52, %52 : vector<16x128xf32>
    %cst_27 = arith.constant dense<0.000000e+00> : vector<16xf32>
    %58 = vector.multi_reduction <add>, %57, %cst_27 [1] : vector<16x128xf32> to vector<16xf32>
    %59 = vector.shape_cast %58 : vector<16xf32> to vector<16x1xf32>
    %cst_28 = arith.constant 1.280000e+02 : f32
    %60 = vector.broadcast %cst_28 : f32 to vector<16x1xf32>
    %61 = arith.divf %59, %60 : vector<16x1xf32>
    %62 = arith.mulf %56, %56 : vector<16x1xf32>
    %63 = arith.subf %61, %62 : vector<16x1xf32>
    %cst_29 = arith.constant 0.000000e+00 : f32
    %64 = vector.broadcast %cst_29 : f32 to vector<16x1xf32>
    %65 = arith.maximumf %63, %64 : vector<16x1xf32>
    %66 = vector.broadcast %56 : vector<16x1xf32> to vector<16x128xf32>
    %67 = arith.subf %52, %66 : vector<16x128xf32>
    %cst_30 = arith.constant 9.99999974E-6 : f32
    %68 = vector.broadcast %cst_30 : f32 to vector<16x1xf32>
    %69 = arith.addf %65, %68 : vector<16x1xf32>
    %70 = math.rsqrt %69 : vector<16x1xf32>
    %71 = vector.broadcast %70 : vector<16x1xf32> to vector<16x128xf32>
    %72 = arith.mulf %67, %71 : vector<16x128xf32>
    %c4 = arith.constant 4 : index
    %c0_31 = arith.constant 0 : index
    %73 = vector.load %arg32[%c4, %c0_31] : memref<9x128xf32, #tpu.memory_space<vmem>>, vector<1x128xf32>
    %74 = vector.broadcast %73 : vector<1x128xf32> to vector<16x128xf32>
    %75 = arith.mulf %72, %74 : vector<16x128xf32>
    %c5 = arith.constant 5 : index
    %c0_32 = arith.constant 0 : index
    %76 = vector.load %arg32[%c5, %c0_32] : memref<9x128xf32, #tpu.memory_space<vmem>>, vector<1x128xf32>
    %77 = vector.broadcast %76 : vector<1x128xf32> to vector<16x128xf32>
    %78 = arith.addf %75, %77 : vector<16x128xf32>
    %cst_33 = arith.constant 5.000000e-01 : f32
    %79 = vector.broadcast %cst_33 : f32 to vector<16x128xf32>
    %80 = arith.mulf %79, %78 : vector<16x128xf32>
    %cst_34 = arith.constant 0.707106769 : f32
    %81 = vector.broadcast %cst_34 : f32 to vector<16x128xf32>
    %82 = arith.mulf %78, %81 : vector<16x128xf32>
    %83 = math.erf %82 : vector<16x128xf32>
    %cst_35 = arith.constant 1.000000e+00 : f32
    %84 = vector.broadcast %cst_35 : f32 to vector<16x128xf32>
    %85 = arith.addf %84, %83 : vector<16x128xf32>
    %86 = arith.mulf %80, %85 : vector<16x128xf32>
    %87 = arith.truncf %86 : vector<16x128xf32> to vector<16x128xbf16>
    %c0_36 = arith.constant 0 : index
    %c0_37 = arith.constant 0 : index
    %88 = vector.load %arg5[%c0_36, %c0_37] : memref<128x64xbf16, #tpu.memory_space<vmem>>, vector<128x64xbf16>
    %cst_38 = arith.constant dense<0.000000e+00> : vector<16x64xf32>
    %89 = tpu.matmul %87, %88, %cst_38 {dimension_numbers = #tpu.dot_dimension_numbers<[1], [0], [0], [1], [0, 0, 1, 1], [], []>} : vector<16x128xbf16>, vector<128x64xbf16>, vector<16x64xf32> -> vector<16x64xf32>
    %c1_39 = arith.constant 1 : index
    %c0_40 = arith.constant 0 : index
    %90 = vector.load %arg33[%c1_39, %c0_40] : memref<13x64xf32, #tpu.memory_space<vmem>>, vector<1x64xf32>
    %91 = vector.broadcast %90 : vector<1x64xf32> to vector<16x64xf32>
    %92 = arith.addf %89, %91 : vector<16x64xf32>
    %93 = arith.addf %46, %92 : vector<16x64xf32>
    %94 = arith.truncf %93 : vector<16x64xf32> to vector<16x64xbf16>
    %c0_41 = arith.constant 0 : index
    %c0_42 = arith.constant 0 : index
    %95 = vector.load %arg6[%c0_41, %c0_42] : memref<64x32xbf16, #tpu.memory_space<vmem>>, vector<64x32xbf16>
    %cst_43 = arith.constant dense<0.000000e+00> : vector<16x32xf32>
    %96 = tpu.matmul %94, %95, %cst_43 {dimension_numbers = #tpu.dot_dimension_numbers<[1], [0], [0], [1], [0, 0, 1, 1], [], []>} : vector<16x64xbf16>, vector<64x32xbf16>, vector<16x32xf32> -> vector<16x32xf32>
    %c0_44 = arith.constant 0 : index
    %c0_45 = arith.constant 0 : index
    %97 = vector.load %arg34[%c0_44, %c0_45] : memref<10x32xf32, #tpu.memory_space<vmem>>, vector<1x32xf32>
    %98 = vector.broadcast %97 : vector<1x32xf32> to vector<16x32xf32>
    %99 = arith.addf %96, %98 : vector<16x32xf32>
    %100 = arith.truncf %0 : vector<16x32xf32> to vector<16x32xbf16>
    %c0_46 = arith.constant 0 : index
    %c0_47 = arith.constant 0 : index
    %101 = vector.load %arg7[%c0_46, %c0_47] : memref<32x64xbf16, #tpu.memory_space<vmem>>, vector<32x64xbf16>
    %cst_48 = arith.constant dense<0.000000e+00> : vector<16x64xf32>
    %102 = tpu.matmul %100, %101, %cst_48 {dimension_numbers = #tpu.dot_dimension_numbers<[1], [0], [0], [1], [0, 0, 1, 1], [], []>} : vector<16x32xbf16>, vector<32x64xbf16>, vector<16x64xf32> -> vector<16x64xf32>
    %c2_49 = arith.constant 2 : index
    %c0_50 = arith.constant 0 : index
    %103 = vector.load %arg33[%c2_49, %c0_50] : memref<13x64xf32, #tpu.memory_space<vmem>>, vector<1x64xf32>
    %104 = vector.broadcast %103 : vector<1x64xf32> to vector<16x64xf32>
    %105 = arith.addf %102, %104 : vector<16x64xf32>
    %cst_51 = arith.constant dense<0.000000e+00> : vector<16xf32>
    %106 = vector.multi_reduction <add>, %105, %cst_51 [1] : vector<16x64xf32> to vector<16xf32>
    %107 = vector.shape_cast %106 : vector<16xf32> to vector<16x1xf32>
    %cst_52 = arith.constant 6.400000e+01 : f32
    %108 = vector.broadcast %cst_52 : f32 to vector<16x1xf32>
    %109 = arith.divf %107, %108 : vector<16x1xf32>
    %110 = arith.mulf %105, %105 : vector<16x64xf32>
    %cst_53 = arith.constant dense<0.000000e+00> : vector<16xf32>
    %111 = vector.multi_reduction <add>, %110, %cst_53 [1] : vector<16x64xf32> to vector<16xf32>
    %112 = vector.shape_cast %111 : vector<16xf32> to vector<16x1xf32>
    %cst_54 = arith.constant 6.400000e+01 : f32
    %113 = vector.broadcast %cst_54 : f32 to vector<16x1xf32>
    %114 = arith.divf %112, %113 : vector<16x1xf32>
    %115 = arith.mulf %109, %109 : vector<16x1xf32>
    %116 = arith.subf %114, %115 : vector<16x1xf32>
    %cst_55 = arith.constant 0.000000e+00 : f32
    %117 = vector.broadcast %cst_55 : f32 to vector<16x1xf32>
    %118 = arith.maximumf %116, %117 : vector<16x1xf32>
    %119 = vector.broadcast %109 : vector<16x1xf32> to vector<16x64xf32>
    %120 = arith.subf %105, %119 : vector<16x64xf32>
    %cst_56 = arith.constant 9.99999974E-6 : f32
    %121 = vector.broadcast %cst_56 : f32 to vector<16x1xf32>
    %122 = arith.addf %118, %121 : vector<16x1xf32>
    %123 = math.rsqrt %122 : vector<16x1xf32>
    %124 = vector.broadcast %123 : vector<16x1xf32> to vector<16x64xf32>
    %125 = arith.mulf %120, %124 : vector<16x64xf32>
    %c3_57 = arith.constant 3 : index
    %c0_58 = arith.constant 0 : index
    %126 = vector.load %arg33[%c3_57, %c0_58] : memref<13x64xf32, #tpu.memory_space<vmem>>, vector<1x64xf32>
    %127 = vector.broadcast %126 : vector<1x64xf32> to vector<16x64xf32>
    %128 = arith.mulf %125, %127 : vector<16x64xf32>
    %c4_59 = arith.constant 4 : index
    %c0_60 = arith.constant 0 : index
    %129 = vector.load %arg33[%c4_59, %c0_60] : memref<13x64xf32, #tpu.memory_space<vmem>>, vector<1x64xf32>
    %130 = vector.broadcast %129 : vector<1x64xf32> to vector<16x64xf32>
    %131 = arith.addf %128, %130 : vector<16x64xf32>
    %cst_61 = arith.constant 5.000000e-01 : f32
    %132 = vector.broadcast %cst_61 : f32 to vector<16x64xf32>
    %133 = arith.mulf %132, %131 : vector<16x64xf32>
    %cst_62 = arith.constant 0.707106769 : f32
    %134 = vector.broadcast %cst_62 : f32 to vector<16x64xf32>
    %135 = arith.mulf %131, %134 : vector<16x64xf32>
    %136 = math.erf %135 : vector<16x64xf32>
    %cst_63 = arith.constant 1.000000e+00 : f32
    %137 = vector.broadcast %cst_63 : f32 to vector<16x64xf32>
    %138 = arith.addf %137, %136 : vector<16x64xf32>
    %139 = arith.mulf %133, %138 : vector<16x64xf32>
    %140 = arith.truncf %139 : vector<16x64xf32> to vector<16x64xbf16>
    %c0_64 = arith.constant 0 : index
    %c0_65 = arith.constant 0 : index
    %141 = vector.load %arg8[%c0_64, %c0_65] : memref<64x128xbf16, #tpu.memory_space<vmem>>, vector<64x128xbf16>
    %cst_66 = arith.constant dense<0.000000e+00> : vector<16x128xf32>
    %142 = tpu.matmul %140, %141, %cst_66 {dimension_numbers = #tpu.dot_dimension_numbers<[1], [0], [0], [1], [0, 0, 1, 1], [], []>} : vector<16x64xbf16>, vector<64x128xbf16>, vector<16x128xf32> -> vector<16x128xf32>
    %c6 = arith.constant 6 : index
    %c0_67 = arith.constant 0 : index
    %143 = vector.load %arg32[%c6, %c0_67] : memref<9x128xf32, #tpu.memory_space<vmem>>, vector<1x128xf32>
    %144 = vector.broadcast %143 : vector<1x128xf32> to vector<16x128xf32>
    %145 = arith.addf %142, %144 : vector<16x128xf32>
    %cst_68 = arith.constant dense<0.000000e+00> : vector<16xf32>
    %146 = vector.multi_reduction <add>, %145, %cst_68 [1] : vector<16x128xf32> to vector<16xf32>
    %147 = vector.shape_cast %146 : vector<16xf32> to vector<16x1xf32>
    %cst_69 = arith.constant 1.280000e+02 : f32
    %148 = vector.broadcast %cst_69 : f32 to vector<16x1xf32>
    %149 = arith.divf %147, %148 : vector<16x1xf32>
    %150 = arith.mulf %145, %145 : vector<16x128xf32>
    %cst_70 = arith.constant dense<0.000000e+00> : vector<16xf32>
    %151 = vector.multi_reduction <add>, %150, %cst_70 [1] : vector<16x128xf32> to vector<16xf32>
    %152 = vector.shape_cast %151 : vector<16xf32> to vector<16x1xf32>
    %cst_71 = arith.constant 1.280000e+02 : f32
    %153 = vector.broadcast %cst_71 : f32 to vector<16x1xf32>
    %154 = arith.divf %152, %153 : vector<16x1xf32>
    %155 = arith.mulf %149, %149 : vector<16x1xf32>
    %156 = arith.subf %154, %155 : vector<16x1xf32>
    %cst_72 = arith.constant 0.000000e+00 : f32
    %157 = vector.broadcast %cst_72 : f32 to vector<16x1xf32>
    %158 = arith.maximumf %156, %157 : vector<16x1xf32>
    %159 = vector.broadcast %149 : vector<16x1xf32> to vector<16x128xf32>
    %160 = arith.subf %145, %159 : vector<16x128xf32>
    %cst_73 = arith.constant 9.99999974E-6 : f32
    %161 = vector.broadcast %cst_73 : f32 to vector<16x1xf32>
    %162 = arith.addf %158, %161 : vector<16x1xf32>
    %163 = math.rsqrt %162 : vector<16x1xf32>
    %164 = vector.broadcast %163 : vector<16x1xf32> to vector<16x128xf32>
    %165 = arith.mulf %160, %164 : vector<16x128xf32>
    %c7 = arith.constant 7 : index
    %c0_74 = arith.constant 0 : index
    %166 = vector.load %arg32[%c7, %c0_74] : memref<9x128xf32, #tpu.memory_space<vmem>>, vector<1x128xf32>
    %167 = vector.broadcast %166 : vector<1x128xf32> to vector<16x128xf32>
    %168 = arith.mulf %165, %167 : vector<16x128xf32>
    %c8 = arith.constant 8 : index
    %c0_75 = arith.constant 0 : index
    %169 = vector.load %arg32[%c8, %c0_75] : memref<9x128xf32, #tpu.memory_space<vmem>>, vector<1x128xf32>
    %170 = vector.broadcast %169 : vector<1x128xf32> to vector<16x128xf32>
    %171 = arith.addf %168, %170 : vector<16x128xf32>
    %cst_76 = arith.constant 5.000000e-01 : f32
    %172 = vector.broadcast %cst_76 : f32 to vector<16x128xf32>
    %173 = arith.mulf %172, %171 : vector<16x128xf32>
    %cst_77 = arith.constant 0.707106769 : f32
    %174 = vector.broadcast %cst_77 : f32 to vector<16x128xf32>
    %175 = arith.mulf %171, %174 : vector<16x128xf32>
    %176 = math.erf %175 : vector<16x128xf32>
    %cst_78 = arith.constant 1.000000e+00 : f32
    %177 = vector.broadcast %cst_78 : f32 to vector<16x128xf32>
    %178 = arith.addf %177, %176 : vector<16x128xf32>
    %179 = arith.mulf %173, %178 : vector<16x128xf32>
    %180 = arith.truncf %179 : vector<16x128xf32> to vector<16x128xbf16>
    %c0_79 = arith.constant 0 : index
    %c0_80 = arith.constant 0 : index
    %181 = vector.load %arg9[%c0_79, %c0_80] : memref<128x64xbf16, #tpu.memory_space<vmem>>, vector<128x64xbf16>
    %cst_81 = arith.constant dense<0.000000e+00> : vector<16x64xf32>
    %182 = tpu.matmul %180, %181, %cst_81 {dimension_numbers = #tpu.dot_dimension_numbers<[1], [0], [0], [1], [0, 0, 1, 1], [], []>} : vector<16x128xbf16>, vector<128x64xbf16>, vector<16x64xf32> -> vector<16x64xf32>
    %c5_82 = arith.constant 5 : index
    %c0_83 = arith.constant 0 : index
    %183 = vector.load %arg33[%c5_82, %c0_83] : memref<13x64xf32, #tpu.memory_space<vmem>>, vector<1x64xf32>
    %184 = vector.broadcast %183 : vector<1x64xf32> to vector<16x64xf32>
    %185 = arith.addf %182, %184 : vector<16x64xf32>
    %186 = arith.addf %139, %185 : vector<16x64xf32>
    %187 = arith.truncf %186 : vector<16x64xf32> to vector<16x64xbf16>
    %c0_84 = arith.constant 0 : index
    %c0_85 = arith.constant 0 : index
    %188 = vector.load %arg10[%c0_84, %c0_85] : memref<64x64xbf16, #tpu.memory_space<vmem>>, vector<64x64xbf16>
    %cst_86 = arith.constant dense<0.000000e+00> : vector<16x64xf32>
    %189 = tpu.matmul %187, %188, %cst_86 {dimension_numbers = #tpu.dot_dimension_numbers<[1], [0], [0], [1], [0, 0, 1, 1], [], []>} : vector<16x64xbf16>, vector<64x64xbf16>, vector<16x64xf32> -> vector<16x64xf32>
    %c6_87 = arith.constant 6 : index
    %c0_88 = arith.constant 0 : index
    %190 = vector.load %arg33[%c6_87, %c0_88] : memref<13x64xf32, #tpu.memory_space<vmem>>, vector<1x64xf32>
    %191 = vector.broadcast %190 : vector<1x64xf32> to vector<16x64xf32>
    %192 = arith.addf %189, %191 : vector<16x64xf32>
    %193 = arith.truncf %192 : vector<16x64xf32> to vector<16x64xbf16>
    %c0_89 = arith.constant 0 : index
    %c0_90 = arith.constant 0 : index
    %194 = vector.load %arg11[%c0_89, %c0_90] : memref<64x64xbf16, #tpu.memory_space<vmem>>, vector<64x64xbf16>
    %cst_91 = arith.constant dense<0.000000e+00> : vector<16x64xf32>
    %195 = tpu.matmul %193, %194, %cst_91 {dimension_numbers = #tpu.dot_dimension_numbers<[1], [0], [0], [1], [0, 0, 1, 1], [], []>} : vector<16x64xbf16>, vector<64x64xbf16>, vector<16x64xf32> -> vector<16x64xf32>
    %c7_92 = arith.constant 7 : index
    %c0_93 = arith.constant 0 : index
    %196 = vector.load %arg33[%c7_92, %c0_93] : memref<13x64xf32, #tpu.memory_space<vmem>>, vector<1x64xf32>
    %197 = vector.broadcast %196 : vector<1x64xf32> to vector<16x64xf32>
    %198 = arith.addf %195, %197 : vector<16x64xf32>
    %199 = arith.addf %186, %198 : vector<16x64xf32>
    %cst_94 = arith.constant dense<0.000000e+00> : vector<16xf32>
    %200 = vector.multi_reduction <add>, %199, %cst_94 [1] : vector<16x64xf32> to vector<16xf32>
    %201 = vector.shape_cast %200 : vector<16xf32> to vector<16x1xf32>
    %cst_95 = arith.constant 6.400000e+01 : f32
    %202 = vector.broadcast %cst_95 : f32 to vector<16x1xf32>
    %203 = arith.divf %201, %202 : vector<16x1xf32>
    %204 = arith.mulf %199, %199 : vector<16x64xf32>
    %cst_96 = arith.constant dense<0.000000e+00> : vector<16xf32>
    %205 = vector.multi_reduction <add>, %204, %cst_96 [1] : vector<16x64xf32> to vector<16xf32>
    %206 = vector.shape_cast %205 : vector<16xf32> to vector<16x1xf32>
    %cst_97 = arith.constant 6.400000e+01 : f32
    %207 = vector.broadcast %cst_97 : f32 to vector<16x1xf32>
    %208 = arith.divf %206, %207 : vector<16x1xf32>
    %209 = arith.mulf %203, %203 : vector<16x1xf32>
    %210 = arith.subf %208, %209 : vector<16x1xf32>
    %cst_98 = arith.constant 0.000000e+00 : f32
    %211 = vector.broadcast %cst_98 : f32 to vector<16x1xf32>
    %212 = arith.maximumf %210, %211 : vector<16x1xf32>
    %213 = vector.broadcast %203 : vector<16x1xf32> to vector<16x64xf32>
    %214 = arith.subf %199, %213 : vector<16x64xf32>
    %cst_99 = arith.constant 9.99999974E-6 : f32
    %215 = vector.broadcast %cst_99 : f32 to vector<16x1xf32>
    %216 = arith.addf %212, %215 : vector<16x1xf32>
    %217 = math.rsqrt %216 : vector<16x1xf32>
    %218 = vector.broadcast %217 : vector<16x1xf32> to vector<16x64xf32>
    %219 = arith.mulf %214, %218 : vector<16x64xf32>
    %c8_100 = arith.constant 8 : index
    %c0_101 = arith.constant 0 : index
    %220 = vector.load %arg33[%c8_100, %c0_101] : memref<13x64xf32, #tpu.memory_space<vmem>>, vector<1x64xf32>
    %221 = vector.broadcast %220 : vector<1x64xf32> to vector<16x64xf32>
    %222 = arith.mulf %219, %221 : vector<16x64xf32>
    %c9 = arith.constant 9 : index
    %c0_102 = arith.constant 0 : index
    %223 = vector.load %arg33[%c9, %c0_102] : memref<13x64xf32, #tpu.memory_space<vmem>>, vector<1x64xf32>
    %224 = vector.broadcast %223 : vector<1x64xf32> to vector<16x64xf32>
    %225 = arith.addf %222, %224 : vector<16x64xf32>
    %226 = arith.truncf %225 : vector<16x64xf32> to vector<16x64xbf16>
    %c0_103 = arith.constant 0 : index
    %c0_104 = arith.constant 0 : index
    %227 = vector.load %arg12[%c0_103, %c0_104] : memref<64x32xbf16, #tpu.memory_space<vmem>>, vector<64x32xbf16>
    %cst_105 = arith.constant dense<0.000000e+00> : vector<16x32xf32>
    %228 = tpu.matmul %226, %227, %cst_105 {dimension_numbers = #tpu.dot_dimension_numbers<[1], [0], [0], [1], [0, 0, 1, 1], [], []>} : vector<16x64xbf16>, vector<64x32xbf16>, vector<16x32xf32> -> vector<16x32xf32>
    %c1_106 = arith.constant 1 : index
    %c0_107 = arith.constant 0 : index
    %229 = vector.load %arg34[%c1_106, %c0_107] : memref<10x32xf32, #tpu.memory_space<vmem>>, vector<1x32xf32>
    %230 = vector.broadcast %229 : vector<1x32xf32> to vector<16x32xf32>
    %231 = arith.addf %228, %230 : vector<16x32xf32>
    %232 = arith.truncf %0 : vector<16x32xf32> to vector<16x32xbf16>
    %c0_108 = arith.constant 0 : index
    %c0_109 = arith.constant 0 : index
    %233 = vector.load %arg13[%c0_108, %c0_109] : memref<32x32xbf16, #tpu.memory_space<vmem>>, vector<32x32xbf16>
    %cst_110 = arith.constant dense<0.000000e+00> : vector<16x32xf32>
    %234 = tpu.matmul %232, %233, %cst_110 {dimension_numbers = #tpu.dot_dimension_numbers<[1], [0], [0], [1], [0, 0, 1, 1], [], []>} : vector<16x32xbf16>, vector<32x32xbf16>, vector<16x32xf32> -> vector<16x32xf32>
    %c2_111 = arith.constant 2 : index
    %c0_112 = arith.constant 0 : index
    %235 = vector.load %arg34[%c2_111, %c0_112] : memref<10x32xf32, #tpu.memory_space<vmem>>, vector<1x32xf32>
    %236 = vector.broadcast %235 : vector<1x32xf32> to vector<16x32xf32>
    %237 = arith.addf %234, %236 : vector<16x32xf32>
    %238 = arith.truncf %237 : vector<16x32xf32> to vector<16x32xbf16>
    %c0_113 = arith.constant 0 : index
    %c0_114 = arith.constant 0 : index
    %239 = vector.load %arg14[%c0_113, %c0_114] : memref<32x32xbf16, #tpu.memory_space<vmem>>, vector<32x32xbf16>
    %cst_115 = arith.constant dense<0.000000e+00> : vector<16x32xf32>
    %240 = tpu.matmul %238, %239, %cst_115 {dimension_numbers = #tpu.dot_dimension_numbers<[1], [0], [0], [1], [0, 0, 1, 1], [], []>} : vector<16x32xbf16>, vector<32x32xbf16>, vector<16x32xf32> -> vector<16x32xf32>
    %c3_116 = arith.constant 3 : index
    %c0_117 = arith.constant 0 : index
    %241 = vector.load %arg34[%c3_116, %c0_117] : memref<10x32xf32, #tpu.memory_space<vmem>>, vector<1x32xf32>
    %242 = vector.broadcast %241 : vector<1x32xf32> to vector<16x32xf32>
    %243 = arith.addf %240, %242 : vector<16x32xf32>
    %244 = arith.truncf %0 : vector<16x32xf32> to vector<16x32xbf16>
    %c0_118 = arith.constant 0 : index
    %c0_119 = arith.constant 0 : index
    %245 = vector.load %arg15[%c0_118, %c0_119] : memref<32x32xbf16, #tpu.memory_space<vmem>>, vector<32x32xbf16>
    %cst_120 = arith.constant dense<0.000000e+00> : vector<16x32xf32>
    %246 = tpu.matmul %244, %245, %cst_120 {dimension_numbers = #tpu.dot_dimension_numbers<[1], [0], [0], [1], [0, 0, 1, 1], [], []>} : vector<16x32xbf16>, vector<32x32xbf16>, vector<16x32xf32> -> vector<16x32xf32>
    %c4_121 = arith.constant 4 : index
    %c0_122 = arith.constant 0 : index
    %247 = vector.load %arg34[%c4_121, %c0_122] : memref<10x32xf32, #tpu.memory_space<vmem>>, vector<1x32xf32>
    %248 = vector.broadcast %247 : vector<1x32xf32> to vector<16x32xf32>
    %249 = arith.addf %246, %248 : vector<16x32xf32>
    %250 = arith.truncf %249 : vector<16x32xf32> to vector<16x32xbf16>
    %c0_123 = arith.constant 0 : index
    %c0_124 = arith.constant 0 : index
    %251 = vector.load %arg16[%c0_123, %c0_124] : memref<32x32xbf16, #tpu.memory_space<vmem>>, vector<32x32xbf16>
    %cst_125 = arith.constant dense<0.000000e+00> : vector<16x32xf32>
    %252 = tpu.matmul %250, %251, %cst_125 {dimension_numbers = #tpu.dot_dimension_numbers<[1], [0], [0], [1], [0, 0, 1, 1], [], []>} : vector<16x32xbf16>, vector<32x32xbf16>, vector<16x32xf32> -> vector<16x32xf32>
    %c5_126 = arith.constant 5 : index
    %c0_127 = arith.constant 0 : index
    %253 = vector.load %arg34[%c5_126, %c0_127] : memref<10x32xf32, #tpu.memory_space<vmem>>, vector<1x32xf32>
    %254 = vector.broadcast %253 : vector<1x32xf32> to vector<16x32xf32>
    %255 = arith.addf %252, %254 : vector<16x32xf32>
    %256 = arith.truncf %0 : vector<16x32xf32> to vector<16x32xbf16>
    %c0_128 = arith.constant 0 : index
    %c0_129 = arith.constant 0 : index
    %257 = vector.load %arg17[%c0_128, %c0_129] : memref<32x32xbf16, #tpu.memory_space<vmem>>, vector<32x32xbf16>
    %cst_130 = arith.constant dense<0.000000e+00> : vector<16x32xf32>
    %258 = tpu.matmul %256, %257, %cst_130 {dimension_numbers = #tpu.dot_dimension_numbers<[1], [0], [0], [1], [0, 0, 1, 1], [], []>} : vector<16x32xbf16>, vector<32x32xbf16>, vector<16x32xf32> -> vector<16x32xf32>
    %c6_131 = arith.constant 6 : index
    %c0_132 = arith.constant 0 : index
    %259 = vector.load %arg34[%c6_131, %c0_132] : memref<10x32xf32, #tpu.memory_space<vmem>>, vector<1x32xf32>
    %260 = vector.broadcast %259 : vector<1x32xf32> to vector<16x32xf32>
    %261 = arith.addf %258, %260 : vector<16x32xf32>
    %262 = arith.truncf %261 : vector<16x32xf32> to vector<16x32xbf16>
    %c0_133 = arith.constant 0 : index
    %c0_134 = arith.constant 0 : index
    %263 = vector.load %arg18[%c0_133, %c0_134] : memref<32x32xbf16, #tpu.memory_space<vmem>>, vector<32x32xbf16>
    %cst_135 = arith.constant dense<0.000000e+00> : vector<16x32xf32>
    %264 = tpu.matmul %262, %263, %cst_135 {dimension_numbers = #tpu.dot_dimension_numbers<[1], [0], [0], [1], [0, 0, 1, 1], [], []>} : vector<16x32xbf16>, vector<32x32xbf16>, vector<16x32xf32> -> vector<16x32xf32>
    %c7_136 = arith.constant 7 : index
    %c0_137 = arith.constant 0 : index
    %265 = vector.load %arg34[%c7_136, %c0_137] : memref<10x32xf32, #tpu.memory_space<vmem>>, vector<1x32xf32>
    %266 = vector.broadcast %265 : vector<1x32xf32> to vector<16x32xf32>
    %267 = arith.addf %264, %266 : vector<16x32xf32>
    %c0_138 = arith.constant 0 : index
    %c0_139 = arith.constant 0 : index
    %268 = vector.load %arg35[%c0_138, %c0_139] : memref<8x192xf32, #tpu.memory_space<vmem>>, vector<1x192xf32>
    %269 = arith.truncf %99 : vector<16x32xf32> to vector<16x32xbf16>
    %c0_140 = arith.constant 0 : index
    %c0_141 = arith.constant 0 : index
    %270 = vector.load %arg19[%c0_140, %c0_141] : memref<32x192xbf16, #tpu.memory_space<vmem>>, vector<32x192xbf16>
    %cst_142 = arith.constant dense<0.000000e+00> : vector<16x192xf32>
    %271 = tpu.matmul %269, %270, %cst_142 {dimension_numbers = #tpu.dot_dimension_numbers<[1], [0], [0], [1], [0, 0, 1, 1], [], []>} : vector<16x32xbf16>, vector<32x192xbf16>, vector<16x192xf32> -> vector<16x192xf32>
    %272 = vector.broadcast %268 : vector<1x192xf32> to vector<16x192xf32>
    %273 = arith.addf %272, %271 : vector<16x192xf32>
    %274 = arith.truncf %231 : vector<16x32xf32> to vector<16x32xbf16>
    %c0_143 = arith.constant 0 : index
    %c0_144 = arith.constant 0 : index
    %275 = vector.load %arg20[%c0_143, %c0_144] : memref<32x192xbf16, #tpu.memory_space<vmem>>, vector<32x192xbf16>
    %cst_145 = arith.constant dense<0.000000e+00> : vector<16x192xf32>
    %276 = tpu.matmul %274, %275, %cst_145 {dimension_numbers = #tpu.dot_dimension_numbers<[1], [0], [0], [1], [0, 0, 1, 1], [], []>} : vector<16x32xbf16>, vector<32x192xbf16>, vector<16x192xf32> -> vector<16x192xf32>
    %277 = arith.addf %273, %276 : vector<16x192xf32>
    %278 = arith.truncf %243 : vector<16x32xf32> to vector<16x32xbf16>
    %c0_146 = arith.constant 0 : index
    %c0_147 = arith.constant 0 : index
    %279 = vector.load %arg21[%c0_146, %c0_147] : memref<32x192xbf16, #tpu.memory_space<vmem>>, vector<32x192xbf16>
    %cst_148 = arith.constant dense<0.000000e+00> : vector<16x192xf32>
    %280 = tpu.matmul %278, %279, %cst_148 {dimension_numbers = #tpu.dot_dimension_numbers<[1], [0], [0], [1], [0, 0, 1, 1], [], []>} : vector<16x32xbf16>, vector<32x192xbf16>, vector<16x192xf32> -> vector<16x192xf32>
    %281 = arith.addf %277, %280 : vector<16x192xf32>
    %282 = arith.truncf %255 : vector<16x32xf32> to vector<16x32xbf16>
    %c0_149 = arith.constant 0 : index
    %c0_150 = arith.constant 0 : index
    %283 = vector.load %arg22[%c0_149, %c0_150] : memref<32x192xbf16, #tpu.memory_space<vmem>>, vector<32x192xbf16>
    %cst_151 = arith.constant dense<0.000000e+00> : vector<16x192xf32>
    %284 = tpu.matmul %282, %283, %cst_151 {dimension_numbers = #tpu.dot_dimension_numbers<[1], [0], [0], [1], [0, 0, 1, 1], [], []>} : vector<16x32xbf16>, vector<32x192xbf16>, vector<16x192xf32> -> vector<16x192xf32>
    %285 = arith.addf %281, %284 : vector<16x192xf32>
    %286 = arith.truncf %267 : vector<16x32xf32> to vector<16x32xbf16>
    %c0_152 = arith.constant 0 : index
    %c0_153 = arith.constant 0 : index
    %287 = vector.load %arg23[%c0_152, %c0_153] : memref<32x192xbf16, #tpu.memory_space<vmem>>, vector<32x192xbf16>
    %cst_154 = arith.constant dense<0.000000e+00> : vector<16x192xf32>
    %288 = tpu.matmul %286, %287, %cst_154 {dimension_numbers = #tpu.dot_dimension_numbers<[1], [0], [0], [1], [0, 0, 1, 1], [], []>} : vector<16x32xbf16>, vector<32x192xbf16>, vector<16x192xf32> -> vector<16x192xf32>
    %289 = arith.addf %285, %288 : vector<16x192xf32>
    %cst_155 = arith.constant dense<0.000000e+00> : vector<16xf32>
    %290 = vector.multi_reduction <add>, %289, %cst_155 [1] : vector<16x192xf32> to vector<16xf32>
    %291 = vector.shape_cast %290 : vector<16xf32> to vector<16x1xf32>
    %cst_156 = arith.constant 1.920000e+02 : f32
    %292 = vector.broadcast %cst_156 : f32 to vector<16x1xf32>
    %293 = arith.divf %291, %292 : vector<16x1xf32>
    %294 = arith.mulf %289, %289 : vector<16x192xf32>
    %cst_157 = arith.constant dense<0.000000e+00> : vector<16xf32>
    %295 = vector.multi_reduction <add>, %294, %cst_157 [1] : vector<16x192xf32> to vector<16xf32>
    %296 = vector.shape_cast %295 : vector<16xf32> to vector<16x1xf32>
    %cst_158 = arith.constant 1.920000e+02 : f32
    %297 = vector.broadcast %cst_158 : f32 to vector<16x1xf32>
    %298 = arith.divf %296, %297 : vector<16x1xf32>
    %299 = arith.mulf %293, %293 : vector<16x1xf32>
    %300 = arith.subf %298, %299 : vector<16x1xf32>
    %cst_159 = arith.constant 0.000000e+00 : f32
    %301 = vector.broadcast %cst_159 : f32 to vector<16x1xf32>
    %302 = arith.maximumf %300, %301 : vector<16x1xf32>
    %303 = vector.broadcast %293 : vector<16x1xf32> to vector<16x192xf32>
    %304 = arith.subf %289, %303 : vector<16x192xf32>
    %cst_160 = arith.constant 9.99999974E-6 : f32
    %305 = vector.broadcast %cst_160 : f32 to vector<16x1xf32>
    %306 = arith.addf %302, %305 : vector<16x1xf32>
    %307 = math.rsqrt %306 : vector<16x1xf32>
    %308 = vector.broadcast %307 : vector<16x1xf32> to vector<16x192xf32>
    %309 = arith.mulf %304, %308 : vector<16x192xf32>
    %c1_161 = arith.constant 1 : index
    %c0_162 = arith.constant 0 : index
    %310 = vector.load %arg35[%c1_161, %c0_162] : memref<8x192xf32, #tpu.memory_space<vmem>>, vector<1x192xf32>
    %311 = vector.broadcast %310 : vector<1x192xf32> to vector<16x192xf32>
    %312 = arith.mulf %309, %311 : vector<16x192xf32>
    %c2_163 = arith.constant 2 : index
    %c0_164 = arith.constant 0 : index
    %313 = vector.load %arg35[%c2_163, %c0_164] : memref<8x192xf32, #tpu.memory_space<vmem>>, vector<1x192xf32>
    %314 = vector.broadcast %313 : vector<1x192xf32> to vector<16x192xf32>
    %315 = arith.addf %312, %314 : vector<16x192xf32>
    %cst_165 = arith.constant 5.000000e-01 : f32
    %316 = vector.broadcast %cst_165 : f32 to vector<16x192xf32>
    %317 = arith.mulf %316, %315 : vector<16x192xf32>
    %cst_166 = arith.constant 0.707106769 : f32
    %318 = vector.broadcast %cst_166 : f32 to vector<16x192xf32>
    %319 = arith.mulf %315, %318 : vector<16x192xf32>
    %320 = math.erf %319 : vector<16x192xf32>
    %cst_167 = arith.constant 1.000000e+00 : f32
    %321 = vector.broadcast %cst_167 : f32 to vector<16x192xf32>
    %322 = arith.addf %321, %320 : vector<16x192xf32>
    %323 = arith.mulf %317, %322 : vector<16x192xf32>
    %324 = arith.truncf %323 : vector<16x192xf32> to vector<16x192xbf16>
    %c0_168 = arith.constant 0 : index
    %c0_169 = arith.constant 0 : index
    %325 = vector.load %arg24[%c0_168, %c0_169] : memref<192x384xbf16, #tpu.memory_space<vmem>>, vector<192x384xbf16>
    %cst_170 = arith.constant dense<0.000000e+00> : vector<16x384xf32>
    %326 = tpu.matmul %324, %325, %cst_170 {dimension_numbers = #tpu.dot_dimension_numbers<[1], [0], [0], [1], [0, 0, 1, 1], [], []>} : vector<16x192xbf16>, vector<192x384xbf16>, vector<16x384xf32> -> vector<16x384xf32>
    %c0_171 = arith.constant 0 : index
    %c0_172 = arith.constant 0 : index
    %327 = vector.load %arg36[%c0_171, %c0_172] : memref<3x384xf32, #tpu.memory_space<vmem>>, vector<1x384xf32>
    %328 = vector.broadcast %327 : vector<1x384xf32> to vector<16x384xf32>
    %329 = arith.addf %326, %328 : vector<16x384xf32>
    %cst_173 = arith.constant dense<0.000000e+00> : vector<16xf32>
    %330 = vector.multi_reduction <add>, %329, %cst_173 [1] : vector<16x384xf32> to vector<16xf32>
    %331 = vector.shape_cast %330 : vector<16xf32> to vector<16x1xf32>
    %cst_174 = arith.constant 3.840000e+02 : f32
    %332 = vector.broadcast %cst_174 : f32 to vector<16x1xf32>
    %333 = arith.divf %331, %332 : vector<16x1xf32>
    %334 = arith.mulf %329, %329 : vector<16x384xf32>
    %cst_175 = arith.constant dense<0.000000e+00> : vector<16xf32>
    %335 = vector.multi_reduction <add>, %334, %cst_175 [1] : vector<16x384xf32> to vector<16xf32>
    %336 = vector.shape_cast %335 : vector<16xf32> to vector<16x1xf32>
    %cst_176 = arith.constant 3.840000e+02 : f32
    %337 = vector.broadcast %cst_176 : f32 to vector<16x1xf32>
    %338 = arith.divf %336, %337 : vector<16x1xf32>
    %339 = arith.mulf %333, %333 : vector<16x1xf32>
    %340 = arith.subf %338, %339 : vector<16x1xf32>
    %cst_177 = arith.constant 0.000000e+00 : f32
    %341 = vector.broadcast %cst_177 : f32 to vector<16x1xf32>
    %342 = arith.maximumf %340, %341 : vector<16x1xf32>
    %343 = vector.broadcast %333 : vector<16x1xf32> to vector<16x384xf32>
    %344 = arith.subf %329, %343 : vector<16x384xf32>
    %cst_178 = arith.constant 9.99999974E-6 : f32
    %345 = vector.broadcast %cst_178 : f32 to vector<16x1xf32>
    %346 = arith.addf %342, %345 : vector<16x1xf32>
    %347 = math.rsqrt %346 : vector<16x1xf32>
    %348 = vector.broadcast %347 : vector<16x1xf32> to vector<16x384xf32>
    %349 = arith.mulf %344, %348 : vector<16x384xf32>
    %c1_179 = arith.constant 1 : index
    %c0_180 = arith.constant 0 : index
    %350 = vector.load %arg36[%c1_179, %c0_180] : memref<3x384xf32, #tpu.memory_space<vmem>>, vector<1x384xf32>
    %351 = vector.broadcast %350 : vector<1x384xf32> to vector<16x384xf32>
    %352 = arith.mulf %349, %351 : vector<16x384xf32>
    %c2_181 = arith.constant 2 : index
    %c0_182 = arith.constant 0 : index
    %353 = vector.load %arg36[%c2_181, %c0_182] : memref<3x384xf32, #tpu.memory_space<vmem>>, vector<1x384xf32>
    %354 = vector.broadcast %353 : vector<1x384xf32> to vector<16x384xf32>
    %355 = arith.addf %352, %354 : vector<16x384xf32>
    %cst_183 = arith.constant 5.000000e-01 : f32
    %356 = vector.broadcast %cst_183 : f32 to vector<16x384xf32>
    %357 = arith.mulf %356, %355 : vector<16x384xf32>
    %cst_184 = arith.constant 0.707106769 : f32
    %358 = vector.broadcast %cst_184 : f32 to vector<16x384xf32>
    %359 = arith.mulf %355, %358 : vector<16x384xf32>
    %360 = math.erf %359 : vector<16x384xf32>
    %cst_185 = arith.constant 1.000000e+00 : f32
    %361 = vector.broadcast %cst_185 : f32 to vector<16x384xf32>
    %362 = arith.addf %361, %360 : vector<16x384xf32>
    %363 = arith.mulf %357, %362 : vector<16x384xf32>
    %364 = arith.truncf %363 : vector<16x384xf32> to vector<16x384xbf16>
    %c0_186 = arith.constant 0 : index
    %c0_187 = arith.constant 0 : index
    %365 = vector.load %arg25[%c0_186, %c0_187] : memref<384x192xbf16, #tpu.memory_space<vmem>>, vector<384x192xbf16>
    %cst_188 = arith.constant dense<0.000000e+00> : vector<16x192xf32>
    %366 = tpu.matmul %364, %365, %cst_188 {dimension_numbers = #tpu.dot_dimension_numbers<[1], [0], [0], [1], [0, 0, 1, 1], [], []>} : vector<16x384xbf16>, vector<384x192xbf16>, vector<16x192xf32> -> vector<16x192xf32>
    %c3_189 = arith.constant 3 : index
    %c0_190 = arith.constant 0 : index
    %367 = vector.load %arg35[%c3_189, %c0_190] : memref<8x192xf32, #tpu.memory_space<vmem>>, vector<1x192xf32>
    %368 = vector.broadcast %367 : vector<1x192xf32> to vector<16x192xf32>
    %369 = arith.addf %366, %368 : vector<16x192xf32>
    %370 = arith.addf %323, %369 : vector<16x192xf32>
    %371 = arith.truncf %370 : vector<16x192xf32> to vector<16x192xbf16>
    %c0_191 = arith.constant 0 : index
    %c0_192 = arith.constant 0 : index
    %372 = vector.load %arg26[%c0_191, %c0_192] : memref<192x192xbf16, #tpu.memory_space<vmem>>, vector<192x192xbf16>
    %cst_193 = arith.constant dense<0.000000e+00> : vector<16x192xf32>
    %373 = tpu.matmul %371, %372, %cst_193 {dimension_numbers = #tpu.dot_dimension_numbers<[1], [0], [0], [1], [0, 0, 1, 1], [], []>} : vector<16x192xbf16>, vector<192x192xbf16>, vector<16x192xf32> -> vector<16x192xf32>
    %c4_194 = arith.constant 4 : index
    %c0_195 = arith.constant 0 : index
    %374 = vector.load %arg35[%c4_194, %c0_195] : memref<8x192xf32, #tpu.memory_space<vmem>>, vector<1x192xf32>
    %375 = vector.broadcast %374 : vector<1x192xf32> to vector<16x192xf32>
    %376 = arith.addf %373, %375 : vector<16x192xf32>
    %377 = arith.truncf %376 : vector<16x192xf32> to vector<16x192xbf16>
    %c0_196 = arith.constant 0 : index
    %c0_197 = arith.constant 0 : index
    %378 = vector.load %arg27[%c0_196, %c0_197] : memref<192x192xbf16, #tpu.memory_space<vmem>>, vector<192x192xbf16>
    %cst_198 = arith.constant dense<0.000000e+00> : vector<16x192xf32>
    %379 = tpu.matmul %377, %378, %cst_198 {dimension_numbers = #tpu.dot_dimension_numbers<[1], [0], [0], [1], [0, 0, 1, 1], [], []>} : vector<16x192xbf16>, vector<192x192xbf16>, vector<16x192xf32> -> vector<16x192xf32>
    %c5_199 = arith.constant 5 : index
    %c0_200 = arith.constant 0 : index
    %380 = vector.load %arg35[%c5_199, %c0_200] : memref<8x192xf32, #tpu.memory_space<vmem>>, vector<1x192xf32>
    %381 = vector.broadcast %380 : vector<1x192xf32> to vector<16x192xf32>
    %382 = arith.addf %379, %381 : vector<16x192xf32>
    %383 = arith.addf %370, %382 : vector<16x192xf32>
    %cst_201 = arith.constant dense<0.000000e+00> : vector<16xf32>
    %384 = vector.multi_reduction <add>, %383, %cst_201 [1] : vector<16x192xf32> to vector<16xf32>
    %385 = vector.shape_cast %384 : vector<16xf32> to vector<16x1xf32>
    %cst_202 = arith.constant 1.920000e+02 : f32
    %386 = vector.broadcast %cst_202 : f32 to vector<16x1xf32>
    %387 = arith.divf %385, %386 : vector<16x1xf32>
    %388 = arith.mulf %383, %383 : vector<16x192xf32>
    %cst_203 = arith.constant dense<0.000000e+00> : vector<16xf32>
    %389 = vector.multi_reduction <add>, %388, %cst_203 [1] : vector<16x192xf32> to vector<16xf32>
    %390 = vector.shape_cast %389 : vector<16xf32> to vector<16x1xf32>
    %cst_204 = arith.constant 1.920000e+02 : f32
    %391 = vector.broadcast %cst_204 : f32 to vector<16x1xf32>
    %392 = arith.divf %390, %391 : vector<16x1xf32>
    %393 = arith.mulf %387, %387 : vector<16x1xf32>
    %394 = arith.subf %392, %393 : vector<16x1xf32>
    %cst_205 = arith.constant 0.000000e+00 : f32
    %395 = vector.broadcast %cst_205 : f32 to vector<16x1xf32>
    %396 = arith.maximumf %394, %395 : vector<16x1xf32>
    %397 = vector.broadcast %387 : vector<16x1xf32> to vector<16x192xf32>
    %398 = arith.subf %383, %397 : vector<16x192xf32>
    %cst_206 = arith.constant 9.99999974E-6 : f32
    %399 = vector.broadcast %cst_206 : f32 to vector<16x1xf32>
    %400 = arith.addf %396, %399 : vector<16x1xf32>
    %401 = math.rsqrt %400 : vector<16x1xf32>
    %402 = vector.broadcast %401 : vector<16x1xf32> to vector<16x192xf32>
    %403 = arith.mulf %398, %402 : vector<16x192xf32>
    %c6_207 = arith.constant 6 : index
    %c0_208 = arith.constant 0 : index
    %404 = vector.load %arg35[%c6_207, %c0_208] : memref<8x192xf32, #tpu.memory_space<vmem>>, vector<1x192xf32>
    %405 = vector.broadcast %404 : vector<1x192xf32> to vector<16x192xf32>
    %406 = arith.mulf %403, %405 : vector<16x192xf32>
    %c7_209 = arith.constant 7 : index
    %c0_210 = arith.constant 0 : index
    %407 = vector.load %arg35[%c7_209, %c0_210] : memref<8x192xf32, #tpu.memory_space<vmem>>, vector<1x192xf32>
    %408 = vector.broadcast %407 : vector<1x192xf32> to vector<16x192xf32>
    %409 = arith.addf %406, %408 : vector<16x192xf32>
    %410 = arith.truncf %409 : vector<16x192xf32> to vector<16x192xbf16>
    %c0_211 = arith.constant 0 : index
    %c0_212 = arith.constant 0 : index
    %411 = vector.load %arg28[%c0_211, %c0_212] : memref<192x96xbf16, #tpu.memory_space<vmem>>, vector<192x96xbf16>
    %cst_213 = arith.constant dense<0.000000e+00> : vector<16x96xf32>
    %412 = tpu.matmul %410, %411, %cst_213 {dimension_numbers = #tpu.dot_dimension_numbers<[1], [0], [0], [1], [0, 0, 1, 1], [], []>} : vector<16x192xbf16>, vector<192x96xbf16>, vector<16x96xf32> -> vector<16x96xf32>
    %c0_214 = arith.constant 0 : index
    %c0_215 = arith.constant 0 : index
    %413 = vector.load %arg37[%c0_214, %c0_215] : memref<3x96xf32, #tpu.memory_space<vmem>>, vector<1x96xf32>
    %414 = vector.broadcast %413 : vector<1x96xf32> to vector<16x96xf32>
    %415 = arith.addf %412, %414 : vector<16x96xf32>
    %cst_216 = arith.constant dense<0.000000e+00> : vector<16xf32>
    %416 = vector.multi_reduction <add>, %415, %cst_216 [1] : vector<16x96xf32> to vector<16xf32>
    %417 = vector.shape_cast %416 : vector<16xf32> to vector<16x1xf32>
    %cst_217 = arith.constant 9.600000e+01 : f32
    %418 = vector.broadcast %cst_217 : f32 to vector<16x1xf32>
    %419 = arith.divf %417, %418 : vector<16x1xf32>
    %420 = arith.mulf %415, %415 : vector<16x96xf32>
    %cst_218 = arith.constant dense<0.000000e+00> : vector<16xf32>
    %421 = vector.multi_reduction <add>, %420, %cst_218 [1] : vector<16x96xf32> to vector<16xf32>
    %422 = vector.shape_cast %421 : vector<16xf32> to vector<16x1xf32>
    %cst_219 = arith.constant 9.600000e+01 : f32
    %423 = vector.broadcast %cst_219 : f32 to vector<16x1xf32>
    %424 = arith.divf %422, %423 : vector<16x1xf32>
    %425 = arith.mulf %419, %419 : vector<16x1xf32>
    %426 = arith.subf %424, %425 : vector<16x1xf32>
    %cst_220 = arith.constant 0.000000e+00 : f32
    %427 = vector.broadcast %cst_220 : f32 to vector<16x1xf32>
    %428 = arith.maximumf %426, %427 : vector<16x1xf32>
    %429 = vector.broadcast %419 : vector<16x1xf32> to vector<16x96xf32>
    %430 = arith.subf %415, %429 : vector<16x96xf32>
    %cst_221 = arith.constant 9.99999974E-6 : f32
    %431 = vector.broadcast %cst_221 : f32 to vector<16x1xf32>
    %432 = arith.addf %428, %431 : vector<16x1xf32>
    %433 = math.rsqrt %432 : vector<16x1xf32>
    %434 = vector.broadcast %433 : vector<16x1xf32> to vector<16x96xf32>
    %435 = arith.mulf %430, %434 : vector<16x96xf32>
    %c1_222 = arith.constant 1 : index
    %c0_223 = arith.constant 0 : index
    %436 = vector.load %arg37[%c1_222, %c0_223] : memref<3x96xf32, #tpu.memory_space<vmem>>, vector<1x96xf32>
    %437 = vector.broadcast %436 : vector<1x96xf32> to vector<16x96xf32>
    %438 = arith.mulf %435, %437 : vector<16x96xf32>
    %c2_224 = arith.constant 2 : index
    %c0_225 = arith.constant 0 : index
    %439 = vector.load %arg37[%c2_224, %c0_225] : memref<3x96xf32, #tpu.memory_space<vmem>>, vector<1x96xf32>
    %440 = vector.broadcast %439 : vector<1x96xf32> to vector<16x96xf32>
    %441 = arith.addf %438, %440 : vector<16x96xf32>
    %cst_226 = arith.constant 5.000000e-01 : f32
    %442 = vector.broadcast %cst_226 : f32 to vector<16x96xf32>
    %443 = arith.mulf %442, %441 : vector<16x96xf32>
    %cst_227 = arith.constant 0.707106769 : f32
    %444 = vector.broadcast %cst_227 : f32 to vector<16x96xf32>
    %445 = arith.mulf %441, %444 : vector<16x96xf32>
    %446 = math.erf %445 : vector<16x96xf32>
    %cst_228 = arith.constant 1.000000e+00 : f32
    %447 = vector.broadcast %cst_228 : f32 to vector<16x96xf32>
    %448 = arith.addf %447, %446 : vector<16x96xf32>
    %449 = arith.mulf %443, %448 : vector<16x96xf32>
    %450 = arith.truncf %449 : vector<16x96xf32> to vector<16x96xbf16>
    %c0_229 = arith.constant 0 : index
    %c0_230 = arith.constant 0 : index
    %451 = vector.load %arg29[%c0_229, %c0_230] : memref<96x32xbf16, #tpu.memory_space<vmem>>, vector<96x32xbf16>
    %cst_231 = arith.constant dense<0.000000e+00> : vector<16x32xf32>
    %452 = tpu.matmul %450, %451, %cst_231 {dimension_numbers = #tpu.dot_dimension_numbers<[1], [0], [0], [1], [0, 0, 1, 1], [], []>} : vector<16x96xbf16>, vector<96x32xbf16>, vector<16x32xf32> -> vector<16x32xf32>
    %c8_232 = arith.constant 8 : index
    %c0_233 = arith.constant 0 : index
    %453 = vector.load %arg34[%c8_232, %c0_233] : memref<10x32xf32, #tpu.memory_space<vmem>>, vector<1x32xf32>
    %454 = vector.broadcast %453 : vector<1x32xf32> to vector<16x32xf32>
    %455 = arith.addf %452, %454 : vector<16x32xf32>
    %456 = arith.truncf %455 : vector<16x32xf32> to vector<16x32xbf16>
    %c0_234 = arith.constant 0 : index
    %c0_235 = arith.constant 0 : index
    %457 = vector.load %arg30[%c0_234, %c0_235] : memref<32x64xbf16, #tpu.memory_space<vmem>>, vector<32x64xbf16>
    %cst_236 = arith.constant dense<0.000000e+00> : vector<16x64xf32>
    %458 = tpu.matmul %456, %457, %cst_236 {dimension_numbers = #tpu.dot_dimension_numbers<[1], [0], [0], [1], [0, 0, 1, 1], [], []>} : vector<16x32xbf16>, vector<32x64xbf16>, vector<16x64xf32> -> vector<16x64xf32>
    %c10 = arith.constant 10 : index
    %c0_237 = arith.constant 0 : index
    %459 = vector.load %arg33[%c10, %c0_237] : memref<13x64xf32, #tpu.memory_space<vmem>>, vector<1x64xf32>
    %460 = vector.broadcast %459 : vector<1x64xf32> to vector<16x64xf32>
    %461 = arith.addf %458, %460 : vector<16x64xf32>
    %cst_238 = arith.constant dense<0.000000e+00> : vector<16xf32>
    %462 = vector.multi_reduction <add>, %461, %cst_238 [1] : vector<16x64xf32> to vector<16xf32>
    %463 = vector.shape_cast %462 : vector<16xf32> to vector<16x1xf32>
    %cst_239 = arith.constant 6.400000e+01 : f32
    %464 = vector.broadcast %cst_239 : f32 to vector<16x1xf32>
    %465 = arith.divf %463, %464 : vector<16x1xf32>
    %466 = arith.mulf %461, %461 : vector<16x64xf32>
    %cst_240 = arith.constant dense<0.000000e+00> : vector<16xf32>
    %467 = vector.multi_reduction <add>, %466, %cst_240 [1] : vector<16x64xf32> to vector<16xf32>
    %468 = vector.shape_cast %467 : vector<16xf32> to vector<16x1xf32>
    %cst_241 = arith.constant 6.400000e+01 : f32
    %469 = vector.broadcast %cst_241 : f32 to vector<16x1xf32>
    %470 = arith.divf %468, %469 : vector<16x1xf32>
    %471 = arith.mulf %465, %465 : vector<16x1xf32>
    %472 = arith.subf %470, %471 : vector<16x1xf32>
    %cst_242 = arith.constant 0.000000e+00 : f32
    %473 = vector.broadcast %cst_242 : f32 to vector<16x1xf32>
    %474 = arith.maximumf %472, %473 : vector<16x1xf32>
    %475 = vector.broadcast %465 : vector<16x1xf32> to vector<16x64xf32>
    %476 = arith.subf %461, %475 : vector<16x64xf32>
    %cst_243 = arith.constant 9.99999974E-6 : f32
    %477 = vector.broadcast %cst_243 : f32 to vector<16x1xf32>
    %478 = arith.addf %474, %477 : vector<16x1xf32>
    %479 = math.rsqrt %478 : vector<16x1xf32>
    %480 = vector.broadcast %479 : vector<16x1xf32> to vector<16x64xf32>
    %481 = arith.mulf %476, %480 : vector<16x64xf32>
    %c11 = arith.constant 11 : index
    %c0_244 = arith.constant 0 : index
    %482 = vector.load %arg33[%c11, %c0_244] : memref<13x64xf32, #tpu.memory_space<vmem>>, vector<1x64xf32>
    %483 = vector.broadcast %482 : vector<1x64xf32> to vector<16x64xf32>
    %484 = arith.mulf %481, %483 : vector<16x64xf32>
    %c12 = arith.constant 12 : index
    %c0_245 = arith.constant 0 : index
    %485 = vector.load %arg33[%c12, %c0_245] : memref<13x64xf32, #tpu.memory_space<vmem>>, vector<1x64xf32>
    %486 = vector.broadcast %485 : vector<1x64xf32> to vector<16x64xf32>
    %487 = arith.addf %484, %486 : vector<16x64xf32>
    %cst_246 = arith.constant 5.000000e-01 : f32
    %488 = vector.broadcast %cst_246 : f32 to vector<16x64xf32>
    %489 = arith.mulf %488, %487 : vector<16x64xf32>
    %cst_247 = arith.constant 0.707106769 : f32
    %490 = vector.broadcast %cst_247 : f32 to vector<16x64xf32>
    %491 = arith.mulf %487, %490 : vector<16x64xf32>
    %492 = math.erf %491 : vector<16x64xf32>
    %cst_248 = arith.constant 1.000000e+00 : f32
    %493 = vector.broadcast %cst_248 : f32 to vector<16x64xf32>
    %494 = arith.addf %493, %492 : vector<16x64xf32>
    %495 = arith.mulf %489, %494 : vector<16x64xf32>
    %496 = arith.truncf %495 : vector<16x64xf32> to vector<16x64xbf16>
    %c0_249 = arith.constant 0 : index
    %c0_250 = arith.constant 0 : index
    %497 = vector.load %arg31[%c0_249, %c0_250] : memref<64x32xbf16, #tpu.memory_space<vmem>>, vector<64x32xbf16>
    %cst_251 = arith.constant dense<0.000000e+00> : vector<16x32xf32>
    %498 = tpu.matmul %496, %497, %cst_251 {dimension_numbers = #tpu.dot_dimension_numbers<[1], [0], [0], [1], [0, 0, 1, 1], [], []>} : vector<16x64xbf16>, vector<64x32xbf16>, vector<16x32xf32> -> vector<16x32xf32>
    %c9_252 = arith.constant 9 : index
    %c0_253 = arith.constant 0 : index
    %499 = vector.load %arg34[%c9_252, %c0_253] : memref<10x32xf32, #tpu.memory_space<vmem>>, vector<1x32xf32>
    %500 = vector.broadcast %499 : vector<1x32xf32> to vector<16x32xf32>
    %501 = arith.addf %498, %500 : vector<16x32xf32>
    %c0_254 = arith.constant 0 : index
    %c0_255 = arith.constant 0 : index
    %502 = vector.load %arg38[%c0_254, %c0_255] : memref<16x32xf32, #tpu.memory_space<vmem>>, vector<16x32xf32>
    tpu.vector_store %arg38[%c0_254, %c0_255], %501 {strides = array<i32>} : memref<16x32xf32, #tpu.memory_space<vmem>>, vector<16x32xf32>,
    return
  }
  func.func @transform_0(%arg0: i32) -> (i32, i32) {
    %c0_i32 = arith.constant 0 : i32
    %c0_i32_0 = arith.constant 0 : i32
    return %arg0, %c0_i32 : i32, i32
  }
  func.func @transform_1(%arg0: i32) -> (i32, i32) {
    %c0_i32 = arith.constant 0 : i32
    %c0_i32_0 = arith.constant 0 : i32
    %c0_i32_1 = arith.constant 0 : i32
    return %c0_i32, %c0_i32_0 : i32, i32
  }
  func.func @transform_2(%arg0: i32) -> (i32, i32) {
    %c0_i32 = arith.constant 0 : i32
    %c0_i32_0 = arith.constant 0 : i32
    %c0_i32_1 = arith.constant 0 : i32
    return %c0_i32, %c0_i32_0 : i32, i32
  }
  func.func @transform_3(%arg0: i32) -> (i32, i32) {
    %c0_i32 = arith.constant 0 : i32
    %c0_i32_0 = arith.constant 0 : i32
    %c0_i32_1 = arith.constant 0 : i32
    return %c0_i32, %c0_i32_0 : i32, i32
  }
  func.func @transform_4(%arg0: i32) -> (i32, i32) {
    %c0_i32 = arith.constant 0 : i32
    %c0_i32_0 = arith.constant 0 : i32
    %c0_i32_1 = arith.constant 0 : i32
    return %c0_i32, %c0_i32_0 : i32, i32
  }
  func.func @transform_5(%arg0: i32) -> (i32, i32) {
    %c0_i32 = arith.constant 0 : i32
    %c0_i32_0 = arith.constant 0 : i32
    %c0_i32_1 = arith.constant 0 : i32
    return %c0_i32, %c0_i32_0 : i32, i32
  }
  func.func @transform_6(%arg0: i32) -> (i32, i32) {
    %c0_i32 = arith.constant 0 : i32
    %c0_i32_0 = arith.constant 0 : i32
    %c0_i32_1 = arith.constant 0 : i32
    return %c0_i32, %c0_i32_0 : i32, i32
  }
  func.func @transform_7(%arg0: i32) -> (i32, i32) {
    %c0_i32 = arith.constant 0 : i32
    %c0_i32_0 = arith.constant 0 : i32
    %c0_i32_1 = arith.constant 0 : i32
    return %c0_i32, %c0_i32_0 : i32, i32
  }
  func.func @transform_8(%arg0: i32) -> (i32, i32) {
    %c0_i32 = arith.constant 0 : i32
    %c0_i32_0 = arith.constant 0 : i32
    %c0_i32_1 = arith.constant 0 : i32
    return %c0_i32, %c0_i32_0 : i32, i32
  }
  func.func @transform_9(%arg0: i32) -> (i32, i32) {
    %c0_i32 = arith.constant 0 : i32
    %c0_i32_0 = arith.constant 0 : i32
    %c0_i32_1 = arith.constant 0 : i32
    return %c0_i32, %c0_i32_0 : i32, i32
  }
  func.func @transform_10(%arg0: i32) -> (i32, i32) {
    %c0_i32 = arith.constant 0 : i32
    %c0_i32_0 = arith.constant 0 : i32
    %c0_i32_1 = arith.constant 0 : i32
    return %c0_i32, %c0_i32_0 : i32, i32
  }
  func.func @transform_11(%arg0: i32) -> (i32, i32) {
    %c0_i32 = arith.constant 0 : i32
    %c0_i32_0 = arith.constant 0 : i32
    %c0_i32_1 = arith.constant 0 : i32
    return %c0_i32, %c0_i32_0 : i32, i32
  }
  func.func @transform_12(%arg0: i32) -> (i32, i32) {
    %c0_i32 = arith.constant 0 : i32
    %c0_i32_0 = arith.constant 0 : i32
    %c0_i32_1 = arith.constant 0 : i32
    return %c0_i32, %c0_i32_0 : i32, i32
  }
  func.func @transform_13(%arg0: i32) -> (i32, i32) {
    %c0_i32 = arith.constant 0 : i32
    %c0_i32_0 = arith.constant 0 : i32
    %c0_i32_1 = arith.constant 0 : i32
    return %c0_i32, %c0_i32_0 : i32, i32
  }
  func.func @transform_14(%arg0: i32) -> (i32, i32) {
    %c0_i32 = arith.constant 0 : i32
    %c0_i32_0 = arith.constant 0 : i32
    %c0_i32_1 = arith.constant 0 : i32
    return %c0_i32, %c0_i32_0 : i32, i32
  }
  func.func @transform_15(%arg0: i32) -> (i32, i32) {
    %c0_i32 = arith.constant 0 : i32
    %c0_i32_0 = arith.constant 0 : i32
    %c0_i32_1 = arith.constant 0 : i32
    return %c0_i32, %c0_i32_0 : i32, i32
  }
  func.func @transform_16(%arg0: i32) -> (i32, i32) {
    %c0_i32 = arith.constant 0 : i32
    %c0_i32_0 = arith.constant 0 : i32
    %c0_i32_1 = arith.constant 0 : i32
    return %c0_i32, %c0_i32_0 : i32, i32
  }
  func.func @transform_17(%arg0: i32) -> (i32, i32) {
    %c0_i32 = arith.constant 0 : i32
    %c0_i32_0 = arith.constant 0 : i32
    %c0_i32_1 = arith.constant 0 : i32
    return %c0_i32, %c0_i32_0 : i32, i32
  }
  func.func @transform_18(%arg0: i32) -> (i32, i32) {
    %c0_i32 = arith.constant 0 : i32
    %c0_i32_0 = arith.constant 0 : i32
    %c0_i32_1 = arith.constant 0 : i32
    return %c0_i32, %c0_i32_0 : i32, i32
  }
  func.func @transform_19(%arg0: i32) -> (i32, i32) {
    %c0_i32 = arith.constant 0 : i32
    %c0_i32_0 = arith.constant 0 : i32
    %c0_i32_1 = arith.constant 0 : i32
    return %c0_i32, %c0_i32_0 : i32, i32
  }
  func.func @transform_20(%arg0: i32) -> (i32, i32) {
    %c0_i32 = arith.constant 0 : i32
    %c0_i32_0 = arith.constant 0 : i32
    %c0_i32_1 = arith.constant 0 : i32
    return %c0_i32, %c0_i32_0 : i32, i32
  }
  func.func @transform_21(%arg0: i32) -> (i32, i32) {
    %c0_i32 = arith.constant 0 : i32
    %c0_i32_0 = arith.constant 0 : i32
    %c0_i32_1 = arith.constant 0 : i32
    return %c0_i32, %c0_i32_0 : i32, i32
  }
  func.func @transform_22(%arg0: i32) -> (i32, i32) {
    %c0_i32 = arith.constant 0 : i32
    %c0_i32_0 = arith.constant 0 : i32
    %c0_i32_1 = arith.constant 0 : i32
    return %c0_i32, %c0_i32_0 : i32, i32
  }
  func.func @transform_23(%arg0: i32) -> (i32, i32) {
    %c0_i32 = arith.constant 0 : i32
    %c0_i32_0 = arith.constant 0 : i32
    %c0_i32_1 = arith.constant 0 : i32
    return %c0_i32, %c0_i32_0 : i32, i32
  }
  func.func @transform_24(%arg0: i32) -> (i32, i32) {
    %c0_i32 = arith.constant 0 : i32
    %c0_i32_0 = arith.constant 0 : i32
    %c0_i32_1 = arith.constant 0 : i32
    return %c0_i32, %c0_i32_0 : i32, i32
  }
  func.func @transform_25(%arg0: i32) -> (i32, i32) {
    %c0_i32 = arith.constant 0 : i32
    %c0_i32_0 = arith.constant 0 : i32
    %c0_i32_1 = arith.constant 0 : i32
    return %c0_i32, %c0_i32_0 : i32, i32
  }
  func.func @transform_26(%arg0: i32) -> (i32, i32) {
    %c0_i32 = arith.constant 0 : i32
    %c0_i32_0 = arith.constant 0 : i32
    %c0_i32_1 = arith.constant 0 : i32
    return %c0_i32, %c0_i32_0 : i32, i32
  }
  func.func @transform_27(%arg0: i32) -> (i32, i32) {
    %c0_i32 = arith.constant 0 : i32
    %c0_i32_0 = arith.constant 0 : i32
    %c0_i32_1 = arith.constant 0 : i32
    return %c0_i32, %c0_i32_0 : i32, i32
  }
  func.func @transform_28(%arg0: i32) -> (i32, i32) {
    %c0_i32 = arith.constant 0 : i32
    %c0_i32_0 = arith.constant 0 : i32
    %c0_i32_1 = arith.constant 0 : i32
    return %c0_i32, %c0_i32_0 : i32, i32
  }
  func.func @transform_29(%arg0: i32) -> (i32, i32) {
    %c0_i32 = arith.constant 0 : i32
    %c0_i32_0 = arith.constant 0 : i32
    %c0_i32_1 = arith.constant 0 : i32
    return %c0_i32, %c0_i32_0 : i32, i32
  }
  func.func @transform_30(%arg0: i32) -> (i32, i32) {
    %c0_i32 = arith.constant 0 : i32
    %c0_i32_0 = arith.constant 0 : i32
    %c0_i32_1 = arith.constant 0 : i32
    return %c0_i32, %c0_i32_0 : i32, i32
  }
  func.func @transform_31(%arg0: i32) -> (i32, i32) {
    %c0_i32 = arith.constant 0 : i32
    %c0_i32_0 = arith.constant 0 : i32
    %c0_i32_1 = arith.constant 0 : i32
    return %c0_i32, %c0_i32_0 : i32, i32
  }
  func.func @transform_32(%arg0: i32) -> (i32, i32) {
    %c0_i32 = arith.constant 0 : i32
    %c0_i32_0 = arith.constant 0 : i32
    %c0_i32_1 = arith.constant 0 : i32
    return %c0_i32, %c0_i32_0 : i32, i32
  }
  func.func @transform_33(%arg0: i32) -> (i32, i32) {
    %c0_i32 = arith.constant 0 : i32
    %c0_i32_0 = arith.constant 0 : i32
    %c0_i32_1 = arith.constant 0 : i32
    return %c0_i32, %c0_i32_0 : i32, i32
  }
  func.func @transform_34(%arg0: i32) -> (i32, i32) {
    %c0_i32 = arith.constant 0 : i32
    %c0_i32_0 = arith.constant 0 : i32
    %c0_i32_1 = arith.constant 0 : i32
    return %c0_i32, %c0_i32_0 : i32, i32
  }
  func.func @transform_35(%arg0: i32) -> (i32, i32) {
    %c0_i32 = arith.constant 0 : i32
    %c0_i32_0 = arith.constant 0 : i32
    %c0_i32_1 = arith.constant 0 : i32
    return %c0_i32, %c0_i32_0 : i32, i32
  }
  func.func @transform_36(%arg0: i32) -> (i32, i32) {
    %c0_i32 = arith.constant 0 : i32
    %c0_i32_0 = arith.constant 0 : i32
    %c0_i32_1 = arith.constant 0 : i32
    return %c0_i32, %c0_i32_0 : i32, i32
  }
  func.func @transform_37(%arg0: i32) -> (i32, i32) {
    %c0_i32 = arith.constant 0 : i32
    %c0_i32_0 = arith.constant 0 : i32
    return %arg0, %c0_i32 : i32, i32
  }
}

</mosaic_0001>

<bundles_post_ra>
// kernel: tpu_custom_call.1
= control target key start
LH: loop header
LB: loop body
LE: loop exit
PB: predicated region body
PF: predicated region fallthrough
CT: control target
= control target key end

     0   :  { %6 = vsyncpa [#allocation3], 0  ;;  %s341_s0 = inlined_call_operand.hbm [shape: f32[8,128], index: 0, kind: input, shape index: {}]   ;;  %s342_s1 = inlined_call_operand.hbm [shape: f32[8,128], index: 1, kind: output, shape index: {}]  }
   0x1   :  { %7 = vsyncpa [#allocation4], 0  ;;  %s262_s6 = smov 0  }
   0x2 LB: > { %s145_s7 = sadd.s32 4294967295, %s248_s6   ;;  %p146_p0 = scmp.ge.s32.totalorder %s248_s6, 1  ;;  %s248_s6 = sphi %s262_s6, %s13_s6  }
   0x3   : > { %p60_p1 = scmp.lt.s32.totalorder %s248_s6, 3  ;;  %p276_p3 = scmp.eq.s32.totalorder %s145_s7, 0 }
   0x4   : > { %s250_s10 = smov [#allocation2]   ;;  %s180_s15 = scalar_lea.hbm %s341_s0, 128 }
   0x5   : > { %p270_p2 = pnand %p146_p0, %p60_p1  ;;  %s73_s11 = sshll.u32 %s250_s10, 4  ;;  %s74_s11 = int_to_ptr.vmem [resolvable:$true] %s73_s11 }
   0x6   : > { %s347_s9 = scalar_select %p276_p3, 1, 0 }
   0x7   : > { %s346_s8 = scalar_select %p270_p2, 1, 0 }
   0x8   : > { %p162_p4 = pneg %p270_p2  ;;  %p181_p6 = scmp.ne.s32.totalorder %s341_s0, %s180_s15 }
   0x9   : > { %p187_p10 = scmp.lt.u32.totalorder %s180_s15, %s341_s0 }
   0xa   : > { %p284_p5 = pnand %p276_p3, %p162_p4 }
   0xc   : > { %p182_p7 = pneg %p284_p5 }
   0xe   : > { %p183_p8 = pnand %p182_p7, %p181_p6 }
  0x10   : > { %p184_p9 = pneg %p183_p8 }
  0x12   : > { %p189_p11 = pnand %p187_p10, %p184_p9 }
  0x14   : > { %192 = shalt.err (!%p189_p11)
}
  0x15   : > { %s193_s20 = scalar_lea.vmem %s74_s11, 128  ;;  %p201_p1 = scmp.lt.s32.totalorder %s74_s11, %s74_s11 }
  0x16   : > { %p194_p12 = scmp.ne.s32.totalorder %s74_s11, %s193_s20  ;;  %p202_p4 = scmp.lt.s32.totalorder %s193_s20, %s193_s20 }
  0x18   : > { %p196_p13 = pnand %p194_p12, %p182_p7  ;;  %p203_p3 = por %p202_p4, %p201_p1 }
  0x1a   : > { %p197_p0 = pneg %p196_p13 }
  0x1c   : > { %p204_p2 = pnand %p203_p3, %p197_p0 }
  0x1e   : > { %207 = shalt.err (!%p204_p2)
}
  0x1f   : > { %165 = dma.hbm_to_vmem [thread:$0]  (!%p284_p5), %s341_s0, 128, %s74_s11, [#allocation3]  }
  0x20   : > { %p349_p6 = scmp.ne.s32.totalorder %s346_s8, 0 }
  0x21   : > { %p350_p8 = scmp.ne.s32.totalorder (!%p349_p6), %s347_s9, 0 }
  0x22   : > { %86 = sbr.rel (%p349_p6) target bundleno = 67 (0x43), region = 24 }
  0x29   : > { %239 = dma.done.wait (%p350_p8), [#allocation3], 128  }
  0x2a   : > { %241 = vsyncadd (%p350_p8), [#allocation3], 4294967168  ;;  %s251_s23 = smov [#allocation5]   ;;  %v96_v0 = vld [vmem:[#allocation2] sm:$0xff]  ;;  %p312_p2 = scmp.eq.s32.totalorder %s145_s7, 1 }
  0x2b   : > { %s106_s24 = sshll.u32 %s251_s23, 4  ;;  %v97_v1 = vadd.f32 1.0, %v96_v0  ;;  %s107_s24 = int_to_ptr.vmem [resolvable:$true] %s106_s24 }
  0x2c   : > { %s208_s26 = scalar_lea.vmem %s107_s24, 128  ;;  %p215_p9 = scmp.lt.s32.totalorder %s107_s24, %s107_s24 }
  0x2d   : > { %98 = vst [vmem:[#allocation5] sm:$0xff] %v97_v1  ;;  %p209_p3 = scmp.ne.s32.totalorder %s107_s24, %s208_s26  ;;  %p216_p10 = scmp.lt.s32.totalorder %s208_s26, %s208_s26 }
  0x2f   : > { %p210_p5 = pnand %p209_p3, %p312_p2  ;;  %p217_p11 = por %p216_p10, %p215_p9 }
  0x31   : > { %p211_p7 = pneg %p210_p5 }
  0x33   : > { %p218_p12 = pnand %p217_p11, %p211_p7 }
  0x35   : > { %221 = shalt.err (!%p218_p12)
}
  0x36   : > { %s222_s29 = scalar_lea.hbm %s342_s1, 128 }
  0x37   : > { %p223_p13 = scmp.ne.s32.totalorder %s342_s1, %s222_s29  ;;  %p228_p4 = scmp.lt.u32.totalorder %s222_s29, %s342_s1 }
  0x39   : > { %p224_p0 = pnand %p223_p13, %p312_p2 }
  0x3b   : > { %p225_p1 = pneg %p224_p0 }
  0x3d   : > { %p230_p6 = pnand %p228_p4, %p225_p1 }
  0x3f   : > { %233 = shalt.err (!%p230_p6)
}
  0x40   : > { %159 = dma.vmem_to_hbm [thread:$0]  (%p312_p2), %s107_s24, 128, %s342_s1, [#allocation4]  }
  0x41   : > { %243 = dma.done.wait (%p312_p2), [#allocation4], 128  }
  0x42   : > { %245 = vsyncadd (%p312_p2), [#allocation4], 4294967168 }
  0x43 PF: > { %s13_s6 = sadd.s32 1, %s248_s6  }
  0x44   : > { %p10_p8 = scmp.ge.s32.totalorder %s13_s6, 4  }
  0x46   :  { %12 = sbr.rel (!%p10_p8) target bundleno = 2 (0x2), region = 53 }
  0x4d   :  { %119 = vsyncpa [#allocation3], 1 }
  0x4e   :  { %121 = vsyncpa [#allocation3 + $0x1], 1 }
  0x4f   :  { %122 = vsyncpa [#allocation4], 1 }
  0x50   :  { %124 = vsyncpa [#allocation4 + $0x1], 1 }

// kernel: tpu_custom_call.1
= control target key start
LH: loop header
LB: loop body
LE: loop exit
PB: predicated region body
PF: predicated region fallthrough
CT: control target
= control target key end

     0   :  { %s5855_s6 = smov 1   ;;  %s5856_s10 = smov 2   ;;  %s6961_s0 = inlined_call_operand.smem [shape: u32[38], index: -1, kind: input, shape index: {}] }
   0x1   :  { %s5923_s5 = sld [smem:[%s6961_s0]]   ;;  %s5857_s14 = smov 3  }
   0x2   :  { %s5928_s9 = sld [smem:[%s6961_s0 + %s5855_s6]]   ;;  %s5858_s18 = smov 4  }
   0x3   :  { %s5933_s13 = sld [smem:[%s6961_s0 + %s5856_s10]]   ;;  %s5859_s22 = smov 5  }
   0x4   :  { %s5938_s17 = sld [smem:[%s6961_s0 + %s5857_s14]]   ;;  %s5860_s26 = smov 6  }
   0x5   :  { %s5943_s21 = sld [smem:[%s6961_s0 + %s5858_s18]]   ;;  %s5861_s30 = smov 7  }
   0x6   :  { %s5948_s25 = sld [smem:[%s6961_s0 + %s5859_s22]]   ;;  %s5862_s4 = smov 8  }
   0x7   :  { %s5953_s29 = sld [smem:[%s6961_s0 + %s5860_s26]]   ;;  %s5863_s10 = smov 9  }
   0x8   :  { %s5958_s3 = sld [smem:[%s6961_s0 + %s5861_s30]]   ;;  %s5864_s15 = smov 10  }
   0x9   :  { %6982 = sst [smem:[#allocation36_spill]] %s5933_s13  ;;  %s5865_s20 = smov 11  }
   0xa   :  { %6983 = sst [smem:[#allocation37_spill]] %s5938_s17  ;;  %s5866_s26 = smov 12  }
   0xb   :  { %6984 = sst [smem:[#allocation38_spill]] %s5943_s21  ;;  %s5867_s1 = smov 13  }
   0xc   :  { %6985 = sst [smem:[#allocation39_spill]] %s5948_s25  ;;  %s5868_s7 = smov 14  }
   0xd   :  { %s5963_s8 = sld [smem:[%s6961_s0 + %s5862_s4]]   ;;  %s5870_s22 = smov 16  }
   0xe   :  { %6986 = sst [smem:[#allocation40_spill]] %s5958_s3  ;;  %s5871_s28 = smov 17  }
   0xf   :  { %s5968_s14 = sld [smem:[%s6961_s0 + %s5863_s10]]  }
  0x10   :  { %s5973_s19 = sld [smem:[%s6961_s0 + %s5864_s15]]   ;;  %s5869_s15 = smov 15  }
  0x11   :  { %s5978_s24 = sld [smem:[%s6961_s0 + %s5865_s20]]  }
  0x12   :  { %s5983_s30 = sld [smem:[%s6961_s0 + %s5866_s26]]  }
  0x13   :  { %6987 = sst [smem:[#allocation41_spill]] %s5963_s8 }
  0x14   :  { %s5988_s6 = sld [smem:[%s6961_s0 + %s5867_s1]]  }
  0x15   :  { %6988 = sst [smem:[#allocation42_spill]] %s5968_s14 }
  0x16   :  { %6989 = sst [smem:[#allocation43_spill]] %s5973_s19 }
  0x17   :  { %6990 = sst [smem:[#allocation44_spill]] %s5978_s24 }
  0x18   :  { %s5993_s12 = sld [smem:[%s6961_s0 + %s5868_s7]]   ;;  %s5872_s7 = smov 18  }
  0x19   :  { %s5998_s20 = sld [smem:[%s6961_s0 + %s5869_s15]]   ;;  %s5873_s15 = smov 19  }
  0x1a   :  { %s6003_s27 = sld [smem:[%s6961_s0 + %s5870_s22]]   ;;  %s5874_s22 = smov 20  }
  0x1b   :  { %s6008_s4 = sld [smem:[%s6961_s0 + %s5871_s28]]   ;;  %s5875_s28 = smov 21  }
  0x1c   :  { %s6013_s24 = sld [smem:[%s6961_s0 + %s5872_s7]]   ;;  %s5876_s7 = smov 22  }
  0x1d   :  { %s6018_s19 = sld [smem:[%s6961_s0 + %s5873_s15]]   ;;  %s5877_s15 = smov 23  }
  0x1e   :  { %s6023_s14 = sld [smem:[%s6961_s0 + %s5874_s22]]   ;;  %s5878_s22 = smov 24  }
  0x1f   :  { %s6028_s8 = sld [smem:[%s6961_s0 + %s5875_s28]]   ;;  %s5879_s28 = smov 25  }
  0x20   :  { %s6038_s3 = sld [smem:[%s6961_s0 + %s5877_s15]]   ;;  %s5881_s15 = smov 27  }
  0x21   :  { %s6043_s25 = sld [smem:[%s6961_s0 + %s5878_s22]]   ;;  %s5882_s22 = smov 28  }
  0x22   :  { %6991 = sst [smem:[#allocation45_spill]] %s6013_s24 }
  0x23   :  { %s6033_s24 = sld [smem:[%s6961_s0 + %s5876_s7]]   ;;  %s5880_s7 = smov 26  }
  0x24   :  { %s6048_s21 = sld [smem:[%s6961_s0 + %s5879_s28]]   ;;  %s5883_s28 = smov 29  }
  0x25   :  { %s6053_s17 = sld [smem:[%s6961_s0 + %s5880_s7]]   ;;  %s5884_s7 = smov 30  }
  0x26   :  { %6992 = sst [smem:[#allocation46_spill]] %s6038_s3 }
  0x27   :  { %6993 = sst [smem:[#allocation47_spill]] %s6043_s25 }
  0x28   :  { %s6058_s3 = sld [smem:[%s6961_s0 + %s5881_s15]]   ;;  %s5885_s15 = smov 31  }
  0x29   :  { %s6063_s25 = sld [smem:[%s6961_s0 + %s5882_s22]]   ;;  %s5886_s22 = smov 32  }
  0x2a   :  { %6994 = sst [smem:[#allocation48_spill]] %s6048_s21 }
  0x2b   :  { %6995 = sst [smem:[#allocation49_spill]] %s6053_s17 }
  0x2c   :  { %s6068_s21 = sld [smem:[%s6961_s0 + %s5883_s28]]   ;;  %s5887_s28 = smov 33  }
  0x2d   :  { %s6073_s17 = sld [smem:[%s6961_s0 + %s5884_s7]]   ;;  %s5888_s7 = smov 34  }
  0x2e   :  { %6996 = sst [smem:[#allocation50_spill]] %s6058_s3 }
  0x2f   :  { %6997 = sst [smem:[#allocation51_spill]] %s6063_s25 }
  0x30   :  { %s6078_s3 = sld [smem:[%s6961_s0 + %s5885_s15]]   ;;  %s5889_s15 = smov 35  }
  0x31   :  { %s6083_s25 = sld [smem:[%s6961_s0 + %s5886_s22]]   ;;  %s5890_s22 = smov 36  }
  0x32   :  { %6998 = sst [smem:[#allocation52_spill]] %s6068_s21 }
  0x33   :  { %6999 = sst [smem:[#allocation53_spill]] %s6073_s17 }
  0x34   :  { %s6088_s21 = sld [smem:[%s6961_s0 + %s5887_s28]]   ;;  %s5891_s28 = smov 37  }
  0x35   :  { %s6093_s17 = sld [smem:[%s6961_s0 + %s5888_s7]]  }
  0x36   :  { %7000 = sst [smem:[#allocation54_spill]] %s6078_s3 }
  0x37   :  { %7001 = sst [smem:[#allocation55_spill]] %s6083_s25 }
  0x38   :  { %s6098_s13 = sld [smem:[%s6961_s0 + %s5889_s15]]  }
  0x39   :  { %s6103_s25 = sld [smem:[%s6961_s0 + %s5890_s22]]  }
  0x3a   :  { %s6108_s3 = sld [smem:[%s6961_s0 + %s5891_s28]]  }
  0x3b   :  { %80 = vsyncpa [#allocation3], 0 }
  0x3c   :  { %81 = vsyncpa [#allocation6], 0 }
  0x3d   :  { %82 = vsyncpa [#allocation9], 0 }
  0x3e   :  { %83 = vsyncpa [#allocation12], 0 }
  0x3f   :  { %84 = vsyncpa [#allocation15], 0 }
  0x40   :  { %85 = vsyncpa [#allocation18], 0 }
  0x41   :  { %86 = vsyncpa [#allocation21], 0 }
  0x42   :  { %87 = vsyncpa [#allocation24], 0 }
  0x43   :  { %88 = vsyncpa [#allocation4], 0  ;;  %s5892_s7 = smov [#allocation5]   ;;  %s5893_s11 = smov [#allocation8]  }
  0x44   :  { %s116_s10 = sshll.u32 %s5892_s7, 4  ;;  %s150_s15 = sshll.u32 %s5893_s11, 4  ;;  %s117_s10 = int_to_ptr.vmem [resolvable:$true] %s116_s10  ;;  %s6110_s15 = int_to_ptr.vmem [resolvable:$true] %s150_s15 }
  0x45   :  { %s5485_s0 = scalar_lea.hbm %s5953_s29, 256 }
  0x46   :  { %p5486_p0 = scmp.ne.s32.totalorder %s5953_s29, %s5485_s0  ;;  %p5489_p1 = scmp.lt.u32.totalorder %s5485_s0, %s5953_s29 }
  0x48   :  { %p5491_p2 = pnand %p5489_p1, %p5486_p0 }
  0x4a   :  { %5494 = shalt.err (!%p5491_p2)
}
  0x4b   :  { %s5495_s16 = scalar_lea.vmem %s117_s10, 256  ;;  %p5500_p4 = scmp.lt.s32.totalorder %s117_s10, %s117_s10 }
  0x4c   :  { %p5496_p3 = scmp.ne.s32.totalorder %s117_s10, %s5495_s16  ;;  %p5501_p5 = scmp.lt.s32.totalorder %s5495_s16, %s5495_s16 }
  0x4e   :  { %p5502_p6 = por %p5501_p5, %p5500_p4 }
  0x50   :  { %p5503_p7 = pnand %p5502_p6, %p5496_p3 }
  0x52   :  { %5506 = shalt.err (!%p5503_p7)
}
  0x53   :  { %s5894_s18 = smov 64   ;;  %s5895_s22 = smov 4  }
  0x54   :  { %122 = dma.hbm_to_vmem [thread:$0]  %s5953_s29, 256, %s117_s10, [#allocation6], %s5894_s18, %s5894_s18, %s5895_s22  }
  0x55   :  { %s5507_s23 = scalar_lea.hbm %s5988_s6, 256 }
  0x56   :  { %p5508_p8 = scmp.ne.s32.totalorder %s5988_s6, %s5507_s23  ;;  %p5511_p9 = scmp.lt.u32.totalorder %s5507_s23, %s5988_s6 }
  0x58   :  { %p5513_p10 = pnand %p5511_p9, %p5508_p8 }
  0x5a   :  { %5516 = shalt.err (!%p5513_p10)
}
  0x5b   :  { %s5517_s26 = scalar_lea.vmem %s6110_s15, 256  ;;  %p5522_p12 = scmp.lt.s32.totalorder %s6110_s15, %s6110_s15 }
  0x5c   :  { %p5518_p11 = scmp.ne.s32.totalorder %s6110_s15, %s5517_s26  ;;  %p5523_p13 = scmp.lt.s32.totalorder %s5517_s26, %s5517_s26 }
  0x5e   :  { %p5524_p0 = por %p5523_p13, %p5522_p12 }
  0x60   :  { %p5525_p1 = pnand %p5524_p0, %p5518_p11 }
  0x62   :  { %5528 = shalt.err (!%p5525_p1)
}
  0x63   :  { %156 = dma.hbm_to_vmem [thread:$0]  %s5988_s6, 256, %s6110_s15, [#allocation9], %s5894_s18, %s5894_s18, %s5895_s22  }
  0x64   :  { %s5896_s29 = smov [#allocation11]   ;;  %s5897_s1 = smov [#allocation14]  }
  0x65   :  { %s174_s28 = sshll.u32 %s5896_s29, 4  ;;  %s198_s2 = sshll.u32 %s5897_s1, 4  ;;  %s175_s28 = int_to_ptr.vmem [resolvable:$true] %s174_s28  ;;  %s6131_s2 = int_to_ptr.vmem [resolvable:$true] %s198_s2 }
  0x66   :  { %s5529_s7 = scalar_lea.hbm %s5998_s20, 256 }
  0x67   :  { %p5530_p2 = scmp.ne.s32.totalorder %s5998_s20, %s5529_s7  ;;  %p5533_p3 = scmp.lt.u32.totalorder %s5529_s7, %s5998_s20 }
  0x69   :  { %p5535_p4 = pnand %p5533_p3, %p5530_p2 }
  0x6b   :  { %5538 = shalt.err (!%p5535_p4)
}
  0x6c   :  { %s5539_s10 = scalar_lea.vmem %s175_s28, 256  ;;  %p5544_p6 = scmp.lt.s32.totalorder %s175_s28, %s175_s28 }
  0x6d   :  { %p5540_p5 = scmp.ne.s32.totalorder %s175_s28, %s5539_s10  ;;  %p5545_p7 = scmp.lt.s32.totalorder %s5539_s10, %s5539_s10 }
  0x6f   :  { %p5546_p8 = por %p5545_p7, %p5544_p6 }
  0x71   :  { %p5547_p9 = pnand %p5546_p8, %p5540_p5 }
  0x73   :  { %5550 = shalt.err (!%p5547_p9)
}
  0x74   :  { %180 = dma.hbm_to_vmem [thread:$0]  %s5998_s20, 256, %s175_s28, [#allocation12], %s5894_s18, %s5894_s18, %s5895_s22  }
  0x75   :  { %s5551_s6 = scalar_lea.hbm %s6008_s4, 256 }
  0x76   :  { %p5552_p10 = scmp.ne.s32.totalorder %s6008_s4, %s5551_s6  ;;  %p5555_p11 = scmp.lt.u32.totalorder %s5551_s6, %s6008_s4 }
  0x78   :  { %p5557_p12 = pnand %p5555_p11, %p5552_p10 }
  0x7a   :  { %5560 = shalt.err (!%p5557_p12)
}
  0x7b   :  { %s5561_s11 = scalar_lea.vmem %s6131_s2, 256  ;;  %p5566_p0 = scmp.lt.s32.totalorder %s6131_s2, %s6131_s2 }
  0x7c   :  { %p5562_p13 = scmp.ne.s32.totalorder %s6131_s2, %s5561_s11  ;;  %p5567_p1 = scmp.lt.s32.totalorder %s5561_s11, %s5561_s11 }
  0x7e   :  { %p5568_p2 = por %p5567_p1, %p5566_p0 }
  0x80   :  { %p5569_p3 = pnand %p5568_p2, %p5562_p13 }
  0x82   :  { %5572 = shalt.err (!%p5569_p3)
}
  0x83   :  { %204 = dma.hbm_to_vmem [thread:$0]  %s6008_s4, 256, %s6131_s2, [#allocation15], %s5894_s18, %s5894_s18, %s5895_s22  }
  0x84   :  { %s5898_s20 = smov [#allocation17]   ;;  %s5899_s0 = smov [#allocation20]  }
  0x85   :  { %s224_s15 = sshll.u32 %s5898_s20, 4  ;;  %s248_s16 = sshll.u32 %s5899_s0, 4  ;;  %s225_s15 = int_to_ptr.vmem [resolvable:$true] %s224_s15  ;;  %s6152_s16 = int_to_ptr.vmem [resolvable:$true] %s248_s16 }
  0x86   :  { %s5573_s23 = scalar_lea.hbm %s6023_s14, 512 }
  0x87   :  { %p5574_p4 = scmp.ne.s32.totalorder %s6023_s14, %s5573_s23  ;;  %p5577_p5 = scmp.lt.u32.totalorder %s5573_s23, %s6023_s14 }
  0x89   :  { %p5579_p6 = pnand %p5577_p5, %p5574_p4 }
  0x8b   :  { %5582 = shalt.err (!%p5579_p6)
}
  0x8c   :  { %s5583_s26 = scalar_lea.vmem %s225_s15, 512  ;;  %p5588_p8 = scmp.lt.s32.totalorder %s225_s15, %s225_s15 }
  0x8d   :  { %p5584_p7 = scmp.ne.s32.totalorder %s225_s15, %s5583_s26  ;;  %p5589_p9 = scmp.lt.s32.totalorder %s5583_s26, %s5583_s26 }
  0x8f   :  { %p5590_p10 = por %p5589_p9, %p5588_p8 }
  0x91   :  { %p5591_p11 = pnand %p5590_p10, %p5584_p7 }
  0x93   :  { %5594 = shalt.err (!%p5591_p11)
}
  0x94   :  { %s5900_s4 = smov 128   ;;  %s5901_s29 = smov 8  }
  0x95   :  { %230 = dma.hbm_to_vmem [thread:$0]  %s6023_s14, 512, %s225_s15, [#allocation18], %s5900_s4, %s5900_s4, %s5901_s29  }
  0x96   :  { %s5595_s28 = scalar_lea.hbm %s6033_s24, 512 }
  0x97   :  { %p5596_p12 = scmp.ne.s32.totalorder %s6033_s24, %s5595_s28  ;;  %p5599_p13 = scmp.lt.u32.totalorder %s5595_s28, %s6033_s24 }
  0x99   :  { %p5601_p0 = pnand %p5599_p13, %p5596_p12 }
  0x9b   :  { %5604 = shalt.err (!%p5601_p0)
}
  0x9c   :  { %s5605_s1 = scalar_lea.vmem %s6152_s16, 512  ;;  %p5610_p2 = scmp.lt.s32.totalorder %s6152_s16, %s6152_s16 }
  0x9d   :  { %p5606_p1 = scmp.ne.s32.totalorder %s6152_s16, %s5605_s1  ;;  %p5611_p3 = scmp.lt.s32.totalorder %s5605_s1, %s5605_s1 }
  0x9f   :  { %p5612_p4 = por %p5611_p3, %p5610_p2 }
  0xa1   :  { %p5613_p5 = pnand %p5612_p4, %p5606_p1 }
  0xa3   :  { %5616 = shalt.err (!%p5613_p5)
}
  0xa4   :  { %254 = dma.hbm_to_vmem [thread:$0]  %s6033_s24, 512, %s6152_s16, [#allocation21], %s5900_s4, %s5900_s4, %s5901_s29  }
  0xa5   :  { %s5902_s14 = smov [#allocation23]   ;;  %s5903_s7 = smov [#allocation2]  }
  0xa6   :  { %s293_s2 = sshll.u32 %s5902_s14, 4  ;;  %s96_s10 = sshll.u32 %s5903_s7, 4  ;;  %s294_s2 = int_to_ptr.vmem [resolvable:$true] %s293_s2  ;;  %s6173_s10 = int_to_ptr.vmem [resolvable:$true] %s96_s10 }
  0xa7   :  { %s5617_s6 = scalar_lea.hbm %s6093_s17, 256 }
  0xa8   :  { %p5618_p6 = scmp.ne.s32.totalorder %s6093_s17, %s5617_s6  ;;  %p5621_p7 = scmp.lt.u32.totalorder %s5617_s6, %s6093_s17 }
  0xaa   :  { %p5623_p8 = pnand %p5621_p7, %p5618_p6 }
  0xac   :  { %5626 = shalt.err (!%p5623_p8)
}
  0xad   :  { %s5627_s11 = scalar_lea.vmem %s294_s2, 256  ;;  %p5632_p10 = scmp.lt.s32.totalorder %s294_s2, %s294_s2 }
  0xae   :  { %p5628_p9 = scmp.ne.s32.totalorder %s294_s2, %s5627_s11  ;;  %p5633_p11 = scmp.lt.s32.totalorder %s5627_s11, %s5627_s11 }
  0xb0   :  { %p5634_p12 = por %p5633_p11, %p5632_p10 }
  0xb2   :  { %p5635_p13 = pnand %p5634_p12, %p5628_p9 }
  0xb4   :  { %5638 = shalt.err (!%p5635_p13)
}
  0xb5   :  { %296 = dma.hbm_to_vmem [thread:$0]  %s6093_s17, 256, %s294_s2, [#allocation24]  }
  0xb6   :  { %s5639_s24 = scalar_lea.hbm %s5928_s9, 256 }
  0xb7   :  { %p5640_p0 = scmp.ne.s32.totalorder %s5928_s9, %s5639_s24  ;;  %p5643_p1 = scmp.lt.u32.totalorder %s5639_s24, %s5928_s9 }
  0xb9   :  { %p5645_p2 = pnand %p5643_p1, %p5640_p0 }
  0xbb   :  { %5648 = shalt.err (!%p5645_p2)
}
  0xbc   :  { %s5649_s20 = scalar_lea.vmem %s6173_s10, 256  ;;  %p5654_p4 = scmp.lt.s32.totalorder %s6173_s10, %s6173_s10 }
  0xbd   :  { %p5650_p3 = scmp.ne.s32.totalorder %s6173_s10, %s5649_s20  ;;  %p5655_p5 = scmp.lt.s32.totalorder %s5649_s20, %s5649_s20 }
  0xbf   :  { %p5656_p6 = por %p5655_p5, %p5654_p4 }
  0xc1   :  { %p5657_p7 = pnand %p5656_p6, %p5650_p3 }
  0xc3   :  { %5660 = shalt.err (!%p5657_p7)
}
  0xc4   :  { %102 = dma.hbm_to_vmem [thread:$0]  %s5928_s9, 256, %s6173_s10, [#allocation3], %s5894_s18, %s5894_s18, %s5895_s22  }
  0xc5   :  { %s5904_s17 = smov [#allocation7]   ;;  %s5905_s0 = smov [#allocation10]  }
  0xc6   :  { %s138_s15 = sshll.u32 %s5904_s17, 4  ;;  %s162_s16 = sshll.u32 %s5905_s0, 4  ;;  %s139_s15 = int_to_ptr.vmem [resolvable:$true] %s138_s15  ;;  %s6191_s16 = int_to_ptr.vmem [resolvable:$true] %s162_s16 }
  0xc7   :  { %s5661_s23 = scalar_lea.hbm %s5983_s30, 256 }
  0xc8   :  { %p5662_p8 = scmp.ne.s32.totalorder %s5983_s30, %s5661_s23  ;;  %p5665_p9 = scmp.lt.u32.totalorder %s5661_s23, %s5983_s30 }
  0xca   :  { %p5667_p10 = pnand %p5665_p9, %p5662_p8 }
  0xcc   :  { %5670 = shalt.err (!%p5667_p10)
}
  0xcd   :  { %s5671_s26 = scalar_lea.vmem %s139_s15, 256  ;;  %p5676_p12 = scmp.lt.s32.totalorder %s139_s15, %s139_s15 }
  0xce   :  { %p5672_p11 = scmp.ne.s32.totalorder %s139_s15, %s5671_s26  ;;  %p5677_p13 = scmp.lt.s32.totalorder %s5671_s26, %s5671_s26 }
  0xd0   :  { %p5678_p0 = por %p5677_p13, %p5676_p12 }
  0xd2   :  { %p5679_p1 = pnand %p5678_p0, %p5672_p11 }
  0xd4   :  { %5682 = shalt.err (!%p5679_p1)
}
  0xd5   :  { %144 = dma.hbm_to_vmem [thread:$0]  %s5983_s30, 256, %s139_s15, [#allocation6], %s5894_s18, %s5894_s18, %s5895_s22  }
  0xd6   :  { %s5683_s9 = scalar_lea.hbm %s5993_s12, 256 }
  0xd7   :  { %p5684_p2 = scmp.ne.s32.totalorder %s5993_s12, %s5683_s9  ;;  %p5687_p3 = scmp.lt.u32.totalorder %s5683_s9, %s5993_s12 }
  0xd9   :  { %p5689_p4 = pnand %p5687_p3, %p5684_p2 }
  0xdb   :  { %5692 = shalt.err (!%p5689_p4)
}
  0xdc   :  { %s5693_s28 = scalar_lea.vmem %s6191_s16, 256  ;;  %p5698_p6 = scmp.lt.s32.totalorder %s6191_s16, %s6191_s16 }
  0xdd   :  { %p5694_p5 = scmp.ne.s32.totalorder %s6191_s16, %s5693_s28  ;;  %p5699_p7 = scmp.lt.s32.totalorder %s5693_s28, %s5693_s28 }
  0xdf   :  { %p5700_p8 = por %p5699_p7, %p5698_p6 }
  0xe1   :  { %p5701_p9 = pnand %p5700_p8, %p5694_p5 }
  0xe3   :  { %5704 = shalt.err (!%p5701_p9)
}
  0xe4   :  { %168 = dma.hbm_to_vmem [thread:$0]  %s5993_s12, 256, %s6191_s16, [#allocation9], %s5894_s18, %s5894_s18, %s5895_s22  }
  0xe5   :  { %s5906_s30 = smov [#allocation13]   ;;  %s5907_s14 = smov [#allocation16]  }
  0xe6   :  { %s186_s1 = sshll.u32 %s5906_s30, 4  ;;  %s212_s2 = sshll.u32 %s5907_s14, 4  ;;  %s187_s1 = int_to_ptr.vmem [resolvable:$true] %s186_s1  ;;  %s6212_s2 = int_to_ptr.vmem [resolvable:$true] %s212_s2 }
  0xe7   :  { %s5705_s7 = scalar_lea.hbm %s6003_s27, 256 }
  0xe8   :  { %p5706_p10 = scmp.ne.s32.totalorder %s6003_s27, %s5705_s7  ;;  %p5709_p11 = scmp.lt.u32.totalorder %s5705_s7, %s6003_s27 }
  0xea   :  { %p5711_p12 = pnand %p5709_p11, %p5706_p10 }
  0xec   :  { %5714 = shalt.err (!%p5711_p12)
}
  0xed   :  { %s5715_s10 = scalar_lea.vmem %s187_s1, 256  ;;  %p5720_p0 = scmp.lt.s32.totalorder %s187_s1, %s187_s1 }
  0xee   :  { %p5716_p13 = scmp.ne.s32.totalorder %s187_s1, %s5715_s10  ;;  %p5721_p1 = scmp.lt.s32.totalorder %s5715_s10, %s5715_s10 }
  0xf0   :  { %p5722_p2 = por %p5721_p1, %p5720_p0 }
  0xf2   :  { %p5723_p3 = pnand %p5722_p2, %p5716_p13 }
  0xf4   :  { %5726 = shalt.err (!%p5723_p3)
}
  0xf5   :  { %192 = dma.hbm_to_vmem [thread:$0]  %s6003_s27, 256, %s187_s1, [#allocation12], %s5894_s18, %s5894_s18, %s5895_s22  }
  0xf6   :  { %s5727_s12 = scalar_lea.hbm %s6018_s19, 512 }
  0xf7   :  { %p5728_p4 = scmp.ne.s32.totalorder %s6018_s19, %s5727_s12  ;;  %p5731_p5 = scmp.lt.u32.totalorder %s5727_s12, %s6018_s19 }
  0xf9   :  { %p5733_p6 = pnand %p5731_p5, %p5728_p4 }
  0xfb   :  { %5736 = shalt.err (!%p5733_p6)
}
  0xfc   :  { %s5737_s6 = scalar_lea.vmem %s6212_s2, 512  ;;  %p5742_p8 = scmp.lt.s32.totalorder %s6212_s2, %s6212_s2 }
  0xfd   :  { %p5738_p7 = scmp.ne.s32.totalorder %s6212_s2, %s5737_s6  ;;  %p5743_p9 = scmp.lt.s32.totalorder %s5737_s6, %s5737_s6 }
  0xff   :  { %p5744_p10 = por %p5743_p9, %p5742_p8 }
 0x101   :  { %p5745_p11 = pnand %p5744_p10, %p5738_p7 }
 0x103   :  { %5748 = shalt.err (!%p5745_p11)
}
 0x104   :  { %218 = dma.hbm_to_vmem [thread:$0]  %s6018_s19, 512, %s6212_s2, [#allocation15], %s5900_s4, %s5900_s4, %s5901_s29  }
 0x105   :  { %s5908_s27 = smov [#allocation19]   ;;  %s5909_s22 = smov [#allocation22]  }
 0x106   :  { %s236_s18 = sshll.u32 %s5908_s27, 4  ;;  %s280_s11 = sshll.u32 %s5909_s22, 4  ;;  %s237_s18 = int_to_ptr.vmem [resolvable:$true] %s236_s18  ;;  %s6233_s11 = int_to_ptr.vmem [resolvable:$true] %s280_s11 }
 0x107   :  { %s5749_s24 = scalar_lea.hbm %s6028_s8, 512 }
 0x108   :  { %p5750_p12 = scmp.ne.s32.totalorder %s6028_s8, %s5749_s24  ;;  %p5753_p13 = scmp.lt.u32.totalorder %s5749_s24, %s6028_s8 }
 0x10a   :  { %p5755_p0 = pnand %p5753_p13, %p5750_p12 }
 0x10c   :  { %5758 = shalt.err (!%p5755_p0)
}
 0x10d   :  { %s5759_s20 = scalar_lea.vmem %s237_s18, 512  ;;  %p5764_p2 = scmp.lt.s32.totalorder %s237_s18, %s237_s18 }
 0x10e   :  { %p5760_p1 = scmp.ne.s32.totalorder %s237_s18, %s5759_s20  ;;  %p5765_p3 = scmp.lt.s32.totalorder %s5759_s20, %s5759_s20 }
 0x110   :  { %p5766_p4 = por %p5765_p3, %p5764_p2 }
 0x112   :  { %p5767_p5 = pnand %p5766_p4, %p5760_p1 }
 0x114   :  { %5770 = shalt.err (!%p5767_p5)
}
 0x115   :  { %242 = dma.hbm_to_vmem [thread:$0]  %s6028_s8, 512, %s237_s18, [#allocation18], %s5900_s4, %s5900_s4, %s5901_s29  }
 0x116   :  { %s5771_s19 = scalar_lea.hbm %s6088_s21, 256 }
 0x117   :  { %p5772_p6 = scmp.ne.s32.totalorder %s6088_s21, %s5771_s19  ;;  %p5775_p7 = scmp.lt.u32.totalorder %s5771_s19, %s6088_s21 }
 0x119   :  { %p5777_p8 = pnand %p5775_p7, %p5772_p6 }
 0x11b   :  { %5780 = shalt.err (!%p5777_p8)
}
 0x11c   :  { %s5781_s17 = scalar_lea.vmem %s6233_s11, 256  ;;  %p5786_p10 = scmp.lt.s32.totalorder %s6233_s11, %s6233_s11 }
 0x11d   :  { %p5782_p9 = scmp.ne.s32.totalorder %s6233_s11, %s5781_s17  ;;  %p5787_p11 = scmp.lt.s32.totalorder %s5781_s17, %s5781_s17 }
 0x11f   :  { %p5788_p12 = por %p5787_p11, %p5786_p10 }
 0x121   :  { %p5789_p13 = pnand %p5788_p12, %p5782_p9 }
 0x123   :  { %5792 = shalt.err (!%p5789_p13)
}
 0x124   :  { %286 = dma.hbm_to_vmem [thread:$0]  %s6088_s21, 256, %s6233_s11, [#allocation21], %s5900_s4, %s5900_s4, %s5901_s29  }
 0x125   :  { %s5910_s8 = smov [#allocation25]   ;;  %s5793_s0 = scalar_lea.hbm %s6098_s13, 192 }
 0x126   :  { %s303_s15 = sshll.u32 %s5910_s8, 4  ;;  %p5794_p0 = scmp.ne.s32.totalorder %s6098_s13, %s5793_s0  ;;  %s304_s15 = int_to_ptr.vmem [resolvable:$true] %s303_s15 }
 0x127   :  { %p5797_p1 = scmp.lt.u32.totalorder %s5793_s0, %s6098_s13 }
 0x129   :  { %p5799_p2 = pnand %p5797_p1, %p5794_p0 }
 0x12b   :  { %5802 = shalt.err (!%p5799_p2)
}
 0x12c   :  { %s5803_s16 = scalar_lea.vmem %s304_s15, 192  ;;  %p5808_p4 = scmp.lt.s32.totalorder %s304_s15, %s304_s15 }
 0x12d   :  { %p5804_p3 = scmp.ne.s32.totalorder %s304_s15, %s5803_s16  ;;  %p5809_p5 = scmp.lt.s32.totalorder %s5803_s16, %s5803_s16 }
 0x12f   :  { %p5810_p6 = por %p5809_p5, %p5808_p4 }
 0x131   :  { %p5811_p7 = pnand %p5810_p6, %p5804_p3 }
 0x133   :  { %5814 = shalt.err (!%p5811_p7)
}
 0x134   :  { %306 = dma.hbm_to_vmem [thread:$0]  %s6098_s13, 192, %s304_s15, [#allocation24]  }
 0x135   :  { %5837 = dma.done.wait [#allocation3], 256  }
 0x136   :  { %5838 = vsyncadd [#allocation3], 4294967040 }
 0x137   :  { %5839 = dma.done.wait [#allocation6], 512  }
 0x138   :  { %5840 = vsyncadd [#allocation6], 4294966784 }
 0x139   :  { %5841 = dma.done.wait [#allocation9], 512  }
 0x13a   :  { %5842 = vsyncadd [#allocation9], 4294966784 }
 0x13b   :  { %5843 = dma.done.wait [#allocation12], 512  }
 0x13c   :  { %5844 = vsyncadd [#allocation12], 4294966784 }
 0x13d   :  { %5845 = dma.done.wait [#allocation15], 768  }
 0x13e   :  { %5846 = vsyncadd [#allocation15], 4294966528 }
 0x13f   :  { %5847 = dma.done.wait [#allocation18], 1024  }
 0x140   :  { %5848 = vsyncadd [#allocation18], 4294966272 }
 0x141   :  { %5849 = dma.done.wait [#allocation21], 768  }
 0x142   :  { %5850 = vsyncadd [#allocation21], 4294966528 }
 0x143   :  { %5851 = dma.done.wait [#allocation24], 448  }
 0x144   :  { %5852 = vsyncadd [#allocation24], 4294966848  ;;  %v5911_v0 = vmov 0.0   ;;  %vm5912_vm0 = vmmov 0   ;;  %s7002_s13 = sld [smem:[#allocation54_spill]]  ;;  %v5091_v1 = vld [vmem:[#allocation2] sm:$0xff]  }
 0x145   :  { %4771 = vmatprep.subr.bf16.mxu0 %v5911_v0  ;;  %4775 = vmatprep.mubr.msk.bf16.mxu0 %vm5912_vm0, %v5911_v0  ;;  %v5092_v2 = vld [vmem:[#allocation2 + $0x8] sm:$0xff]   ;;  %v355_v3 = vld [vmem:[%s5923_s5] sm:$0xff]  ;;  %vm379_vm1 = vcmask 261120   ;;  %s7003_s21 = sld [smem:[#allocation36_spill]]  ;;  %s7005_s23 = sld [smem:[#allocation55_spill]]  ;;  %vm626_vm2 = vcmask 523264  }
 0x146   :  { %4779 = vmatprep.subr.bf16.mxu1 %v5911_v0  ;;  %4795 = vmatprep.mubr.msk.bf16.mxu1 %vm5912_vm0, %v5911_v0  ;;  %v356_v4 = vld [vmem:[%s5923_s5 + $0x8] sm:$0xff]  ;;  %s7004_s5 = sld [smem:[#allocation37_spill]]  ;;  %s7006_s26 = sld [smem:[#allocation38_spill]]  ;;  %vm3950_vm3 = vcmask 785408  }
 0x147   :  { %4772 = vmatpush3.bf16.msra.mxu0 %v5091_v1  ;;  %v6267_v5 = vpack.c.bf16 %v356_v4, %v355_v3  ;;  %s7007_s9 = sld [smem:[#allocation39_spill]]  ;;  %s7008_s28 = sld [smem:[#allocation40_spill]] }
 0x148   :  { %4773 = vmatprep.subr.bf16.mxu0 %v5911_v0  ;;  %s7009_s30 = sld [smem:[#allocation41_spill]]  ;;  %s7010_s1 = sld [smem:[#allocation42_spill]] }
 0x149   :  { %s7011_s14 = sld [smem:[#allocation43_spill]]  ;;  %s7012_s2 = sld [smem:[#allocation45_spill]] }
 0x14a   :  { %v4373_v6 = vld [vmem:[%s7002_s13] ss:$0 sm:$0xff]  ;;  %v4377_v43 = vld [vmem:[%s7002_s13 + $0x1] ss:$0 sm:$0xff]  ;;  %v4378_v45 = vld [vmem:[%s7002_s13 + $0x2] ss:$0 sm:$0xff] }
 0x14b   :  { %4774 = vmatpush3.bf16.msra.mxu0 %v5092_v2  ;;  %v5093_v15 = vld [vmem:[%s7003_s21] sm:$0xff]   ;;  %v5094_v16 = vld [vmem:[%s7003_s21 + $0x8] sm:$0xff]   ;;  %v5095_v17 = vld [vmem:[%s7003_s21 + $0x10] sm:$0xff]   ;;  %s7013_s7 = sld [smem:[#allocation44_spill]]  ;;  %s7014_s10 = sld [smem:[#allocation46_spill]] }
 0x14c   :  { %4799 = vmatprep.subr.bf16.mxu0 %v5911_v0  ;;  %4780 = vmatpush3.bf16.msra.mxu1 %v5093_v15  ;;  %v5096_v18 = vld [vmem:[%s7003_s21 + $0x18] sm:$0xff]   ;;  %v5097_v19 = vld [vmem:[%s7003_s21 + $0x20] sm:$0xff]   ;;  %v5098_v20 = vld [vmem:[%s7003_s21 + $0x28] sm:$0xff]   ;;  %s7015_s12 = sld [smem:[#allocation47_spill]]  ;;  %s7016_s6 = sld [smem:[#allocation48_spill]] }
 0x14d   :  { %4781 = vmatprep.subr.bf16.mxu1 %v5911_v0  ;;  %v5099_v21 = vld [vmem:[%s7003_s21 + $0x30] sm:$0xff]   ;;  %v5100_v22 = vld [vmem:[%s7003_s21 + $0x38] sm:$0xff]   ;;  %v5101_v23 = vld [vmem:[%s7004_s5] sm:$0xff]   ;;  %s7017_s27 = sld [smem:[#allocation49_spill]]  ;;  %s7018_s18 = sld [smem:[#allocation50_spill]] }
 0x14e   :  { %4776 = vmatmul.mubr.msk.bf16.vlgmr.msra.gmra.mrb[0].mxu0 %vm379_vm1, %v6267_v5  ;;  %v5102_v24 = vld [vmem:[%s7004_s5 + $0x8] sm:$0xff]   ;;  %v5103_v1 = vld [vmem:[%s7004_s5 + $0x10] sm:$0xff]   ;;  %v5104_v2 = vld [vmem:[%s7004_s5 + $0x18] sm:$0xff]   ;;  %s7019_s22 = sld [smem:[#allocation51_spill]]  ;;  %s7020_s11 = sld [smem:[#allocation52_spill]] }
 0x14f   :  { %4807 = vmatprep.mubr.msk.bf16.mxu0 %vm5912_vm0, %v5911_v0  ;;  %4800 = vmatpush3.bf16.msra.mxu0 %v5101_v23  ;;  %v4379_v3 = vld [vmem:[%s7005_s23] ss:$0 sm:$0xff]  ;;  %v5107_v23 = vld [vmem:[%s7006_s26 + $0x10] sm:$0xff]   ;;  %s5914_s24 = smov [#allocation26]  }
 0x150   :  { %4782 = vmatpush3.bf16.msra.mxu1 %v5094_v16  ;;  %4801 = vmatprep.subr.bf16.mxu0 %v5911_v0  ;;  %s4317_s20 = sshll.u32 %s5914_s24, 4  ;;  %s4318_s20 = int_to_ptr.vmem [resolvable:$true] %s4317_s20 }
 0x151   :  { %4783 = vmatprep.subr.bf16.mxu1 %v5911_v0  ;;  %s5815_s19 = scalar_lea.vmem %s4318_s20, 256  ;;  %p5820_p9 = scmp.lt.s32.totalorder %s4318_s20, %s4318_s20 }
 0x152   :  { %p5816_p8 = scmp.ne.s32.totalorder %s4318_s20, %s5815_s19  ;;  %p5821_p10 = scmp.lt.s32.totalorder %s5815_s19, %s5815_s19 }
 0x153   :  { %4802 = vmatpush3.bf16.msra.mxu0 %v5102_v24  ;;  %v5108_v24 = vld [vmem:[%s7006_s26 + $0x18] sm:$0xff]  }
 0x154   :  { %4784 = vmatpush3.bf16.msra.mxu1 %v5095_v17  ;;  %4803 = vmatprep.subr.bf16.mxu0 %v5911_v0  ;;  %p5822_p11 = por %p5821_p10, %p5820_p9 }
 0x155   :  { %4785 = vmatprep.subr.bf16.mxu1 %v5911_v0 }
 0x156   :  { %p5823_p12 = pnand %p5822_p11, %p5816_p8 }
 0x157   :  { %4804 = vmatpush3.bf16.msra.mxu0 %v5103_v1 }
 0x158   :  { %4786 = vmatpush3.bf16.msra.mxu1 %v5096_v18  ;;  %4805 = vmatprep.subr.bf16.mxu0 %v5911_v0 }
 0x159   :  { %4787 = vmatprep.subr.bf16.mxu1 %v5911_v0 }
 0x15b   :  { %4806 = vmatpush3.bf16.msra.mxu0 %v5104_v2 }
 0x15c   :  { %4788 = vmatpush3.bf16.msra.mxu1 %v5097_v19  ;;  %4811 = vmatprep.subr.bf16.mxu0 %v5911_v0 }
 0x15d   :  { %4789 = vmatprep.subr.bf16.mxu1 %v5911_v0 }
 0x160   :  { %4790 = vmatpush3.bf16.msra.mxu1 %v5098_v20 }
 0x161   :  { %4791 = vmatprep.subr.bf16.mxu1 %v5911_v0 }
 0x164   :  { %4792 = vmatpush3.bf16.msra.mxu1 %v5099_v21  ;;  %v5105_v21 = vld [vmem:[%s7006_s26] sm:$0xff]  }
 0x165   :  { %4793 = vmatprep.subr.bf16.mxu1 %v5911_v0 }
 0x168   :  { %4794 = vmatpush3.bf16.msra.mxu1 %v5100_v22  ;;  %v5106_v22 = vld [vmem:[%s7006_s26 + $0x8] sm:$0xff]  }
 0x169   :  { %4831 = vmatprep.subr.bf16.mxu1 %v5911_v0 }
 0x221   :  { %v417_v7 = vpop.f32.mrb[0].mxu0 }
 0x222   :  { %v6275_v8 = vadd.f32 %v4373_v6, %v417_v7  ;;  %v4777_v9 = vpop.f32.mrb[1].mxu0 }
 0x223   :  { %v420_v10 = vpop.f32.mrb[2].mxu0 }
 0x224   :  { %v6277_v11 = vadd.f32 %v4373_v6, %v420_v10  ;;  %424 = vadd.xlane.f32.xlu0 %v6275_v8  ;;  %v4778_v12 = vpop.f32.mrb[3].mxu0  ;;  %v431_v13 = vmul.f32 %v6275_v8, %v6275_v8 }
 0x225   :  { %v4388_v12 = vld [vmem:[%s7002_s13 + $0x3] ss:$0 sm:$0xff] }
 0x226   :  { %433 = vadd.xlane.f32.xlu1 %v431_v13  ;;  %v432_v14 = vmul.f32 %v6277_v11, %v6277_v11 }
 0x228   :  { %426 = vadd.xlane.f32.xlu0 %v6277_v11 }
 0x22a   :  { %435 = vadd.xlane.f32.xlu1 %v432_v14 }
 0x2b1   :  { %v425_v25 = vpop.xlane.xlu0 %424 }
 0x2b2   :  { %v429_v26 = vmul.f32 0.0078125, %v425_v25  ;;  %v5109_v25 = vld [vmem:[%s7006_s26 + $0x20] sm:$0xff]  }
 0x2b3   :  { %v434_v27 = vpop.xlane.xlu1 %433 }
 0x2b4   :  { %v439_v28 = vmul.f32 %v429_v26, %v429_v26  ;;  %v437_v29 = vmul.f32 0.0078125, %v434_v27  ;;  %v445_v41 = vsub.f32 %v6275_v8, %v429_v26  ;;  %v5110_v26 = vld [vmem:[%s7006_s26 + $0x28] sm:$0xff]   ;;  %v5111_v27 = vld [vmem:[%s7006_s26 + $0x30] sm:$0xff]  }
 0x2b5   :  { %v427_v30 = vpop.xlane.xlu0 %426 }
 0x2b6   :  { %v441_v31 = vsub.f32 %v437_v29, %v439_v28  ;;  %v430_v32 = vmul.f32 0.0078125, %v427_v30  ;;  %v5112_v28 = vld [vmem:[%s7006_s26 + $0x38] sm:$0xff]   ;;  %v5113_v29 = vld [vmem:[%s7007_s9] sm:$0xff]   ;;  %v5114_v30 = vld [vmem:[%s7007_s9 + $0x8] sm:$0xff]  }
 0x2b7   :  { %v436_v33 = vpop.xlane.xlu1 %435 }
 0x2b8   :  { %v443_v34 = vmax.f32 %v441_v31, 0.0  ;;  %v440_v35 = vmul.f32 %v430_v32, %v430_v32  ;;  %v438_v36 = vmul.f32 0.0078125, %v436_v33  ;;  %v446_v46 = vsub.f32 %v6277_v11, %v430_v32 }
 0x2ba   :  { %v447_v37 = vadd.f32 1e-05, %v443_v34  ;;  %v442_v38 = vsub.f32 %v438_v36, %v440_v35 }
 0x2bc   :  { %5401 = vrsqrt.f32 %v447_v37  ;;  %v444_v39 = vmax.f32 %v442_v38, 0.0 }
 0x2be   :  { %v448_v40 = vadd.f32 1e-05, %v444_v39 }
 0x2c0   :  { %5403 = vrsqrt.f32 %v448_v40 }
 0x2c6   :  { %v5402_v42 = vpop.eup %5401 }
 0x2c7   :  { %v451_v44 = vmul.f32 %v5402_v42, %v445_v41 }
 0x2c9   :  { %v458_v47 = vmul.f32 %v4377_v43, %v451_v44 }
 0x2ca   :  { %v5404_v48 = vpop.eup %5403 }
 0x2cb   :  { %v452_v49 = vmul.f32 %v5404_v48, %v446_v46  ;;  %v465_v50 = vadd.f32 %v4378_v45, %v458_v47 }
 0x2cd   :  { %v459_v51 = vmul.f32 %v4377_v43, %v452_v49  ;;  %v469_v52 = vmul.f32 0.70710677, %v465_v50  ;;  %v467_v58 = vmul.f32 0.5, %v465_v50  ;;  %v4394_v49 = vld [vmem:[%s7002_s13 + $0x4] ss:$0 sm:$0xff] }
 0x2cf   :  { %v466_v53 = vadd.f32 %v4378_v45, %v459_v51  ;;  %5405 = verf.f32 %v469_v52 }
 0x2d1   :  { %v470_v54 = vmul.f32 0.70710677, %v466_v53  ;;  %v468_v59 = vmul.f32 0.5, %v466_v53  ;;  %v4395_v53 = vld [vmem:[%s7002_s13 + $0x5] ss:$0 sm:$0xff] }
 0x2d3   :  { %5407 = verf.f32 %v470_v54 }
 0x2d9   :  { %v5406_v55 = vpop.eup %5405 }
 0x2da   :  { %v473_v56 = vadd.f32 1.0, %v5406_v55 }
 0x2dc   :  { %v475_v61 = vmul.f32 %v473_v56, %v467_v58 }
 0x2dd   :  { %v5408_v57 = vpop.eup %5407 }
 0x2de   :  { %v474_v60 = vadd.f32 1.0, %v5408_v57 }
 0x2e0   :  { %v476_v62 = vmul.f32 %v474_v60, %v468_v59 }
 0x2e2   :  { %v477_v63 = vpack.c.bf16 %v476_v62, %v475_v61 }
 0x2e4   :  { %4796 = vmatmul.mubr.bf16.vlgmr.msra.gmra.mrb[0].mxu1 %v477_v63 }
 0x2e5   :  { %4839 = vmatprep.mubr.msk.bf16.mxu1 %vm5912_vm0, %v5911_v0  ;;  %4832 = vmatpush3.bf16.msra.mxu1 %v5113_v29 }
 0x2e6   :  { %4833 = vmatprep.subr.bf16.mxu1 %v5911_v0 }
 0x2e9   :  { %4834 = vmatpush3.bf16.msra.mxu1 %v5114_v30  ;;  %v4411_v30 = vld [vmem:[%s7005_s23 + $0x2] ss:$0 sm:$0xff] }
 0x2ea   :  { %4835 = vmatprep.subr.bf16.mxu1 %v5911_v0 }
 0x3b7   :  { %v581_v4 = vpop.f32.mrb[0].mxu1 }
 0x3b8   :  { %v4797_v6 = vpop.f32.mrb[1].mxu1  ;;  %v6316_v8 = vadd.f32 %v4379_v3, %v581_v4 }
 0x3b9   :  { %v584_v7 = vpop.f32.mrb[2].mxu1 }
 0x3ba   :  { %v6318_v9 = vadd.f32 %v4379_v3, %v584_v7  ;;  %v4798_v10 = vpop.f32.mrb[3].mxu1 }
 0x3bb   :  { %v5115_v10 = vld [vmem:[%s7007_s9 + $0x10] sm:$0xff]  }
 0x3bc   :  { %v588_v11 = vpack.c.bf16 %v6318_v9, %v6316_v8  ;;  %4836 = vmatpush3.bf16.msra.mxu1 %v5115_v10 }
 0x3bd   :  { %4837 = vmatprep.subr.bf16.mxu1 %v5911_v0 }
 0x3be   :  { %4808 = vmatmul.mubr.msk.bf16.vlgmr.msra.gmra.mrb[4].mxu0 %vm626_vm2, %v588_v11  ;;  %v5116_v11 = vld [vmem:[%s7007_s9 + $0x18] sm:$0xff]  }
 0x3bf   :  { %4827 = vmatprep.mubr.msk.bf16.mxu0 %vm5912_vm0, %v5911_v0  ;;  %4812 = vmatpush3.bf16.msra.mxu0 %v5105_v21  ;;  %v5117_v21 = vld [vmem:[#allocation5] sm:$0xff]  }
 0x3c0   :  { %4813 = vmatprep.subr.bf16.mxu0 %v5911_v0  ;;  %4838 = vmatpush3.bf16.msra.mxu1 %v5116_v11 }
 0x3c1   :  { %4843 = vmatprep.subr.bf16.mxu1 %v5911_v0 }
 0x3c3   :  { %4814 = vmatpush3.bf16.msra.mxu0 %v5106_v22 }
 0x3c4   :  { %4815 = vmatprep.subr.bf16.mxu0 %v5911_v0 }
 0x3c7   :  { %4816 = vmatpush3.bf16.msra.mxu0 %v5107_v23  ;;  %v5118_v23 = vld [vmem:[#allocation5 + $0x8] sm:$0xff]  }
 0x3c8   :  { %4817 = vmatprep.subr.bf16.mxu0 %v5911_v0 }
 0x3cb   :  { %4818 = vmatpush3.bf16.msra.mxu0 %v5108_v24 }
 0x3cc   :  { %4819 = vmatprep.subr.bf16.mxu0 %v5911_v0 }
 0x3cf   :  { %4820 = vmatpush3.bf16.msra.mxu0 %v5109_v25 }
 0x3d0   :  { %4821 = vmatprep.subr.bf16.mxu0 %v5911_v0 }
 0x3d3   :  { %4822 = vmatpush3.bf16.msra.mxu0 %v5110_v26 }
 0x3d4   :  { %4823 = vmatprep.subr.bf16.mxu0 %v5911_v0 }
 0x3d7   :  { %4824 = vmatpush3.bf16.msra.mxu0 %v5111_v27 }
 0x3d8   :  { %4825 = vmatprep.subr.bf16.mxu0 %v5911_v0 }
 0x3db   :  { %4826 = vmatpush3.bf16.msra.mxu0 %v5112_v28 }
 0x3dc   :  { %4851 = vmatprep.subr.bf16.mxu0 %v5911_v0 }
 0x491   :  { %v664_v13 = vpop.f32.mrb[4].mxu0 }
 0x492   :  { %v6326_v14 = vadd.f32 %v4388_v12, %v664_v13  ;;  %v4809_v15 = vpop.f32.mrb[5].mxu0 }
 0x493   :  { %v667_v16 = vpop.f32.mrb[6].mxu0 }
 0x494   :  { %v6328_v17 = vadd.f32 %v4388_v12, %v667_v16  ;;  %671 = vadd.xlane.f32.xlu0 %v6326_v14  ;;  %v4810_v18 = vpop.f32.mrb[7].mxu0  ;;  %v677_v19 = vmul.f32 %v6326_v14, %v6326_v14  ;;  %v4396_v12 = vld [vmem:[%s7005_s23 + $0x1] ss:$0 sm:$0xff] }
 0x496   :  { %673 = vadd.xlane.f32.xlu1 %v6328_v17  ;;  %v678_v20 = vmul.f32 %v6328_v17, %v6328_v17 }
 0x498   :  { %679 = vadd.xlane.f32.xlu0 %v677_v19 }
 0x49a   :  { %681 = vadd.xlane.f32.xlu1 %v678_v20 }
 0x521   :  { %v672_v31 = vpop.xlane.xlu0 %671 }
 0x522   :  { %v675_v32 = vmul.f32 0.0078125, %v672_v31 }
 0x523   :  { %v674_v33 = vpop.xlane.xlu1 %673 }
 0x524   :  { %v676_v34 = vmul.f32 0.0078125, %v674_v33  ;;  %v685_v36 = vmul.f32 %v675_v32, %v675_v32  ;;  %v691_v47 = vsub.f32 %v6326_v14, %v675_v32 }
 0x525   :  { %v680_v35 = vpop.xlane.xlu0 %679 }
 0x526   :  { %v683_v37 = vmul.f32 0.0078125, %v680_v35  ;;  %v686_v39 = vmul.f32 %v676_v34, %v676_v34  ;;  %v692_v50 = vsub.f32 %v6328_v17, %v676_v34 }
 0x527   :  { %v682_v38 = vpop.xlane.xlu1 %681 }
 0x528   :  { %v687_v40 = vsub.f32 %v683_v37, %v685_v36  ;;  %v684_v41 = vmul.f32 0.0078125, %v682_v38 }
 0x52a   :  { %v689_v42 = vmax.f32 %v687_v40, 0.0  ;;  %v688_v43 = vsub.f32 %v684_v41, %v686_v39 }
 0x52c   :  { %v693_v44 = vadd.f32 1e-05, %v689_v42  ;;  %v690_v45 = vmax.f32 %v688_v43, 0.0  ;;  %v5119_v43 = vld [vmem:[%s7008_s28] sm:$0xff]  }
 0x52e   :  { %5409 = vrsqrt.f32 %v693_v44  ;;  %v694_v46 = vadd.f32 1e-05, %v690_v45  ;;  %v5120_v44 = vld [vmem:[%s7008_s28 + $0x8] sm:$0xff]   ;;  %v5121_v45 = vld [vmem:[%s7008_s28 + $0x10] sm:$0xff]  }
 0x530   :  { %5411 = vrsqrt.f32 %v694_v46  ;;  %v5122_v46 = vld [vmem:[%s7008_s28 + $0x18] sm:$0xff]  }
 0x538   :  { %v5410_v48 = vpop.eup %5409 }
 0x539   :  { %v697_v51 = vmul.f32 %v5410_v48, %v691_v47 }
 0x53a   :  { %v5412_v52 = vpop.eup %5411 }
 0x53b   :  { %v698_v54 = vmul.f32 %v5412_v52, %v692_v50  ;;  %v704_v55 = vmul.f32 %v4394_v49, %v697_v51 }
 0x53d   :  { %v705_v56 = vmul.f32 %v4394_v49, %v698_v54  ;;  %v711_v57 = vadd.f32 %v4395_v53, %v704_v55 }
 0x53f   :  { %v712_v58 = vadd.f32 %v4395_v53, %v705_v56  ;;  %v715_v59 = vmul.f32 0.70710677, %v711_v57  ;;  %v713_v1 = vmul.f32 0.5, %v711_v57 }
 0x541   :  { %v716_v60 = vmul.f32 0.70710677, %v712_v58  ;;  %5413 = verf.f32 %v715_v59  ;;  %v714_v2 = vmul.f32 0.5, %v712_v58 }
 0x543   :  { %5415 = verf.f32 %v716_v60 }
 0x54b   :  { %v5414_v61 = vpop.eup %5413 }
 0x54c   :  { %v719_v62 = vadd.f32 1.0, %v5414_v61 }
 0x54d   :  { %v5416_v63 = vpop.eup %5415 }
 0x54e   :  { %v720_v3 = vadd.f32 1.0, %v5416_v63  ;;  %v721_v4 = vmul.f32 %v719_v62, %v713_v1 }
 0x550   :  { %v722_v6 = vmul.f32 %v720_v3, %v714_v2  ;;  %v4415_v2 = vld [vmem:[%s7005_s23 + $0x3] ss:$0 sm:$0xff] }
 0x552   :  { %v723_v7 = vpack.c.bf16 %v722_v6, %v721_v4 }
 0x554   :  { %4828 = vmatmul.mubr.bf16.vlgmr.msra.gmra.mrb[8].mxu0 %v723_v7  ;;  %v4416_v7 = vld [vmem:[%s7005_s23 + $0x4] ss:$0 sm:$0xff] }
 0x555   :  { %4859 = vmatprep.mubr.msk.bf16.mxu0 %vm5912_vm0, %v5911_v0  ;;  %4852 = vmatpush3.bf16.msra.mxu0 %v5119_v43  ;;  %v5130_v43 = vld [vmem:[%s7009_s30 + $0x38] sm:$0xff]  }
 0x556   :  { %4853 = vmatprep.subr.bf16.mxu0 %v5911_v0 }
 0x559   :  { %4854 = vmatpush3.bf16.msra.mxu0 %v5120_v44  ;;  %v5131_v44 = vld [vmem:[%s7010_s1] sm:$0xff]  }
 0x55a   :  { %4855 = vmatprep.subr.bf16.mxu0 %v5911_v0 }
 0x55d   :  { %4856 = vmatpush3.bf16.msra.mxu0 %v5121_v45  ;;  %v5132_v45 = vld [vmem:[%s7010_s1 + $0x8] sm:$0xff]  }
 0x55e   :  { %4857 = vmatprep.subr.bf16.mxu0 %v5911_v0 }
 0x561   :  { %4858 = vmatpush3.bf16.msra.mxu0 %v5122_v46 }
 0x562   :  { %4883 = vmatprep.subr.bf16.mxu0 %v5911_v0 }
 0x627   :  { %v827_v13 = vpop.f32.mrb[8].mxu0 }
 0x628   :  { %v828_v14 = vadd.f32 %v4396_v12, %v827_v13  ;;  %v4829_v15 = vpop.f32.mrb[9].mxu0 }
 0x629   :  { %v830_v16 = vpop.f32.mrb[10].mxu0 }
 0x62a   :  { %v831_v17 = vadd.f32 %v4396_v12, %v830_v16  ;;  %v4830_v18 = vpop.f32.mrb[11].mxu0  ;;  %v834_v19 = vadd.f32 %v828_v14, %v6316_v8  ;;  %v4405_v8 = vld [vmem:[#allocation22] ss:$0 sm:$0xff] }
 0x62c   :  { %v835_v20 = vadd.f32 %v831_v17, %v6318_v9 }
 0x62e   :  { %v836_v22 = vpack.c.bf16 %v835_v20, %v834_v19 }
 0x630   :  { %4840 = vmatmul.mubr.msk.bf16.vlgmr.msra.gmra.mrb[4].mxu1 %vm626_vm2, %v836_v22 }
 0x631   :  { %4844 = vmatpush3.bf16.msra.mxu1 %v5117_v21  ;;  %4847 = vmatprep.mubr.msk.bf16.mxu1 %vm5912_vm0, %v5911_v0 }
 0x632   :  { %4845 = vmatprep.subr.bf16.mxu1 %v5911_v0 }
 0x635   :  { %4846 = vmatpush3.bf16.msra.mxu1 %v5118_v23 }
 0x636   :  { %4863 = vmatprep.subr.bf16.mxu1 %v5911_v0 }
 0x638   :  { %4848 = vmatmul.mubr.msk.bf16.vlgmr.msra.gmra.mrb[8].mxu1 %vm379_vm1, %v6267_v5 }
 0x639   :  { %4879 = vmatprep.mubr.msk.bf16.mxu1 %vm5912_vm0, %v5911_v0 }
 0x703   :  { %v911_v9 = vpop.f32.mrb[4].mxu1 }
 0x704   :  { %v4841_v24 = vpop.f32.mrb[5].mxu1  ;;  %v6378_v26 = vadd.f32 %v4405_v8, %v911_v9 }
 0x705   :  { %v914_v25 = vpop.f32.mrb[6].mxu1  ;;  %v4417_v24 = vld [vmem:[%s7002_s13 + $0x6] ss:$0 sm:$0xff] }
 0x706   :  { %v6380_v27 = vadd.f32 %v4405_v8, %v914_v25  ;;  %v4842_v28 = vpop.f32.mrb[7].mxu1 }
 0x708   :  { %v1963_v29 = vpack.c.bf16 %v6380_v27, %v6378_v26 }
 0x70b   :  { %v973_v31 = vpop.f32.mrb[8].mxu1 }
 0x70c   :  { %v974_v32 = vadd.f32 %v4411_v30, %v973_v31  ;;  %v4849_v33 = vpop.f32.mrb[9].mxu1 }
 0x70d   :  { %v976_v34 = vpop.f32.mrb[10].mxu1 }
 0x70e   :  { %v977_v35 = vadd.f32 %v4411_v30, %v976_v34  ;;  %v4850_v36 = vpop.f32.mrb[11].mxu1  ;;  %v980_v37 = vsel %vm626_vm2, %v974_v32, 0.0  ;;  %v989_v38 = vmul.f32 %v974_v32, %v974_v32 }
 0x70f   :  { %981 = vadd.xlane.f32.xlu0 %v980_v37  ;;  %v5123_v36 = vld [vmem:[%s7009_s30] sm:$0xff]   ;;  %v5124_v37 = vld [vmem:[%s7009_s30 + $0x8] sm:$0xff]  }
 0x710   :  { %v983_v39 = vsel %vm626_vm2, %v977_v35, 0.0  ;;  %v990_v40 = vmul.f32 %v977_v35, %v977_v35  ;;  %v991_v41 = vsel %vm626_vm2, %v989_v38, 0.0  ;;  %4864 = vmatpush3.bf16.msra.mxu1 %v5123_v36  ;;  %v5125_v38 = vld [vmem:[%s7009_s30 + $0x10] sm:$0xff]  }
 0x711   :  { %984 = vadd.xlane.f32.xlu1 %v983_v39  ;;  %4865 = vmatprep.subr.bf16.mxu1 %v5911_v0  ;;  %v5126_v39 = vld [vmem:[%s7009_s30 + $0x18] sm:$0xff]  }
 0x712   :  { %v994_v42 = vsel %vm626_vm2, %v990_v40, 0.0  ;;  %v5127_v40 = vld [vmem:[%s7009_s30 + $0x20] sm:$0xff]  }
 0x713   :  { %992 = vadd.xlane.f32.xlu0 %v991_v41  ;;  %v5128_v41 = vld [vmem:[%s7009_s30 + $0x28] sm:$0xff]  }
 0x714   :  { %4866 = vmatpush3.bf16.msra.mxu1 %v5124_v37 }
 0x715   :  { %995 = vadd.xlane.f32.xlu1 %v994_v42  ;;  %4867 = vmatprep.subr.bf16.mxu1 %v5911_v0  ;;  %v5129_v42 = vld [vmem:[%s7009_s30 + $0x30] sm:$0xff]  }
 0x718   :  { %4868 = vmatpush3.bf16.msra.mxu1 %v5125_v38 }
 0x719   :  { %4869 = vmatprep.subr.bf16.mxu1 %v5911_v0 }
 0x71c   :  { %4870 = vmatpush3.bf16.msra.mxu1 %v5126_v39  ;;  %v5135_v39 = vld [vmem:[%s7011_s14] sm:$0xff]  }
 0x71d   :  { %4871 = vmatprep.subr.bf16.mxu1 %v5911_v0 }
 0x720   :  { %4872 = vmatpush3.bf16.msra.mxu1 %v5127_v40 }
 0x721   :  { %4873 = vmatprep.subr.bf16.mxu1 %v5911_v0 }
 0x724   :  { %4874 = vmatpush3.bf16.msra.mxu1 %v5128_v41  ;;  %v5136_v41 = vld [vmem:[%s7011_s14 + $0x8] sm:$0xff]  }
 0x725   :  { %4875 = vmatprep.subr.bf16.mxu1 %v5911_v0 }
 0x728   :  { %4876 = vmatpush3.bf16.msra.mxu1 %v5129_v42  ;;  %v4434_v42 = vld [vmem:[%s7005_s23 + $0x6] ss:$0 sm:$0xff] }
 0x729   :  { %4877 = vmatprep.subr.bf16.mxu1 %v5911_v0 }
 0x72c   :  { %4878 = vmatpush3.bf16.msra.mxu1 %v5130_v43 }
 0x72d   :  { %4907 = vmatprep.subr.bf16.mxu1 %v5911_v0 }
 0x79c   :  { %v982_v47 = vpop.xlane.xlu0 %981 }
 0x79d   :  { %v987_v48 = vmul.f32 0.015625, %v982_v47 }
 0x79e   :  { %v985_v49 = vpop.xlane.xlu1 %984 }
 0x79f   :  { %v988_v50 = vmul.f32 0.015625, %v985_v49  ;;  %v999_v52 = vmul.f32 %v987_v48, %v987_v48  ;;  %v1005_v63 = vsub.f32 %v974_v32, %v987_v48 }
 0x7a0   :  { %v993_v51 = vpop.xlane.xlu0 %992 }
 0x7a1   :  { %v997_v53 = vmul.f32 0.015625, %v993_v51  ;;  %v1000_v55 = vmul.f32 %v988_v50, %v988_v50  ;;  %v1006_v3 = vsub.f32 %v977_v35, %v988_v50 }
 0x7a2   :  { %v996_v54 = vpop.xlane.xlu1 %995 }
 0x7a3   :  { %v1001_v56 = vsub.f32 %v997_v53, %v999_v52  ;;  %v998_v57 = vmul.f32 0.015625, %v996_v54 }
 0x7a5   :  { %v1003_v58 = vmax.f32 %v1001_v56, 0.0  ;;  %v1002_v59 = vsub.f32 %v998_v57, %v1000_v55 }
 0x7a7   :  { %v1007_v60 = vadd.f32 1e-05, %v1003_v58  ;;  %v1004_v61 = vmax.f32 %v1002_v59, 0.0 }
 0x7a9   :  { %5417 = vrsqrt.f32 %v1007_v60  ;;  %v1008_v62 = vadd.f32 1e-05, %v1004_v61 }
 0x7ab   :  { %5419 = vrsqrt.f32 %v1008_v62 }
 0x7b3   :  { %v5418_v1 = vpop.eup %5417 }
 0x7b4   :  { %v1011_v4 = vmul.f32 %v5418_v1, %v1005_v63  ;;  %v4423_v1 = vld [vmem:[%s7002_s13 + $0x7] ss:$0 sm:$0xff] }
 0x7b5   :  { %v5420_v6 = vpop.eup %5419 }
 0x7b6   :  { %v1018_v10 = vmul.f32 %v4415_v2, %v1011_v4  ;;  %v1012_v11 = vmul.f32 %v5420_v6, %v1006_v3  ;;  %v4424_v6 = vld [vmem:[%s7002_s13 + $0x8] ss:$0 sm:$0xff] }
 0x7b8   :  { %v1019_v12 = vmul.f32 %v4415_v2, %v1012_v11  ;;  %v1025_v13 = vadd.f32 %v4416_v7, %v1018_v10 }
 0x7ba   :  { %v1026_v14 = vadd.f32 %v4416_v7, %v1019_v12  ;;  %v1029_v15 = vmul.f32 0.70710677, %v1025_v13  ;;  %v1027_v20 = vmul.f32 0.5, %v1025_v13 }
 0x7bc   :  { %v1030_v16 = vmul.f32 0.70710677, %v1026_v14  ;;  %5421 = verf.f32 %v1029_v15  ;;  %v1028_v21 = vmul.f32 0.5, %v1026_v14 }
 0x7be   :  { %5423 = verf.f32 %v1030_v16 }
 0x7c6   :  { %v5422_v17 = vpop.eup %5421 }
 0x7c7   :  { %v1033_v18 = vadd.f32 1.0, %v5422_v17 }
 0x7c8   :  { %v5424_v19 = vpop.eup %5423 }
 0x7c9   :  { %v1034_v22 = vadd.f32 1.0, %v5424_v19  ;;  %v6399_v23 = vmul.f32 %v1033_v18, %v1027_v20 }
 0x7cb   :  { %v6401_v8 = vmul.f32 %v1034_v22, %v1028_v21 }
 0x7cd   :  { %v1037_v9 = vpack.c.bf16 %v6401_v8, %v6399_v23 }
 0x7cf   :  { %4860 = vmatmul.mubr.msk.bf16.vlgmr.msra.gmra.mrb[12].mxu0 %vm626_vm2, %v1037_v9 }
 0x7d0   :  { %4891 = vmatprep.mubr.msk.bf16.mxu0 %vm5912_vm0, %v5911_v0  ;;  %4884 = vmatpush3.bf16.msra.mxu0 %v5131_v44 }
 0x7d1   :  { %4885 = vmatprep.subr.bf16.mxu0 %v5911_v0 }
 0x7d4   :  { %4886 = vmatpush3.bf16.msra.mxu0 %v5132_v45 }
 0x7d5   :  { %4887 = vmatprep.subr.bf16.mxu0 %v5911_v0 }
 0x8a2   :  { %v1112_v25 = vpop.f32.mrb[12].mxu0 }
 0x8a3   :  { %v6409_v28 = vadd.f32 %v4417_v24, %v1112_v25  ;;  %v4861_v30 = vpop.f32.mrb[13].mxu0  ;;  %v5133_v25 = vld [vmem:[%s7010_s1 + $0x10] sm:$0xff]  }
 0x8a4   :  { %v1115_v31 = vpop.f32.mrb[14].mxu0  ;;  %4888 = vmatpush3.bf16.msra.mxu0 %v5133_v25  ;;  %v4425_v30 = vld [vmem:[%s7005_s23 + $0x5] ss:$0 sm:$0xff] }
 0x8a5   :  { %v6411_v32 = vadd.f32 %v4417_v24, %v1115_v31  ;;  %1119 = vadd.xlane.f32.xlu0 %v6409_v28  ;;  %v4862_v33 = vpop.f32.mrb[15].mxu0  ;;  %v1125_v34 = vmul.f32 %v6409_v28, %v6409_v28  ;;  %4889 = vmatprep.subr.bf16.mxu0 %v5911_v0 }
 0x8a7   :  { %1121 = vadd.xlane.f32.xlu1 %v6411_v32  ;;  %v1126_v35 = vmul.f32 %v6411_v32, %v6411_v32 }
 0x8a9   :  { %1127 = vadd.xlane.f32.xlu0 %v1125_v34 }
 0x8ab   :  { %1129 = vadd.xlane.f32.xlu1 %v1126_v35 }
 0x932   :  { %v1120_v46 = vpop.xlane.xlu0 %1119 }
 0x933   :  { %v1123_v47 = vmul.f32 0.0078125, %v1120_v46 }
 0x934   :  { %v1122_v48 = vpop.xlane.xlu1 %1121 }
 0x935   :  { %v1124_v49 = vmul.f32 0.0078125, %v1122_v48  ;;  %v1133_v51 = vmul.f32 %v1123_v47, %v1123_v47  ;;  %v1139_v62 = vsub.f32 %v6409_v28, %v1123_v47  ;;  %v5134_v28 = vld [vmem:[%s7010_s1 + $0x18] sm:$0xff]  }
 0x936   :  { %v1128_v50 = vpop.xlane.xlu0 %1127  ;;  %4890 = vmatpush3.bf16.msra.mxu0 %v5134_v28 }
 0x937   :  { %v1131_v52 = vmul.f32 0.0078125, %v1128_v50  ;;  %v1134_v54 = vmul.f32 %v1124_v49, %v1124_v49  ;;  %v1140_v2 = vsub.f32 %v6411_v32, %v1124_v49  ;;  %4895 = vmatprep.subr.bf16.mxu0 %v5911_v0  ;;  %v5139_v49 = vld [vmem:[#allocation7] sm:$0xff]  }
 0x938   :  { %v1130_v53 = vpop.xlane.xlu1 %1129 }
 0x939   :  { %v1135_v55 = vsub.f32 %v1131_v52, %v1133_v51  ;;  %v1132_v56 = vmul.f32 0.0078125, %v1130_v53  ;;  %v5140_v51 = vld [vmem:[#allocation7 + $0x8] sm:$0xff]   ;;  %v5141_v52 = vld [vmem:[#allocation10] sm:$0xff]  }
 0x93a   :  { %v5142_v53 = vld [vmem:[#allocation10 + $0x8] sm:$0xff]  }
 0x93b   :  { %v1137_v57 = vmax.f32 %v1135_v55, 0.0  ;;  %v1136_v58 = vsub.f32 %v1132_v56, %v1134_v54  ;;  %v5143_v54 = vld [vmem:[#allocation13] sm:$0xff]   ;;  %v5144_v55 = vld [vmem:[#allocation13 + $0x8] sm:$0xff]  }
 0x93c   :  { %v5147_v56 = vld [vmem:[%s7012_s2 + $0x4] ss:$8 sps:$4 sm:$0xff]  }
 0x93d   :  { %v1141_v59 = vadd.f32 1e-05, %v1137_v57  ;;  %v1138_v60 = vmax.f32 %v1136_v58, 0.0  ;;  %v5145_v57 = vld [vmem:[%s7012_s2] ss:$8 sps:$4 sm:$0xff]  }
 0x93e   :  { %v5150_v58 = vld [vmem:[%s7012_s2 + $0x14] ss:$8 sps:$4 sm:$0xff]  }
 0x93f   :  { %5425 = vrsqrt.f32 %v1141_v59  ;;  %v1142_v61 = vadd.f32 1e-05, %v1138_v60  ;;  %v5148_v59 = vld [vmem:[%s7012_s2 + $0x10] ss:$8 sps:$4 sm:$0xff]   ;;  %v5913_v60 = vmov 0  }
 0x941   :  { %5427 = vrsqrt.f32 %v1142_v61  ;;  %v4440_v61 = vld [vmem:[%s7005_s23 + $0x7] ss:$0 sm:$0xff] }
 0x949   :  { %v5426_v63 = vpop.eup %5425 }
 0x94a   :  { %v1145_v3 = vmul.f32 %v5426_v63, %v1139_v62 }
 0x94b   :  { %v5428_v4 = vpop.eup %5427 }
 0x94c   :  { %v1146_v7 = vmul.f32 %v5428_v4, %v1140_v2  ;;  %v1152_v10 = vmul.f32 %v4423_v1, %v1145_v3 }
 0x94e   :  { %v1153_v11 = vmul.f32 %v4423_v1, %v1146_v7  ;;  %v1159_v12 = vadd.f32 %v4424_v6, %v1152_v10 }
 0x950   :  { %v1160_v13 = vadd.f32 %v4424_v6, %v1153_v11  ;;  %v1163_v14 = vmul.f32 0.70710677, %v1159_v12  ;;  %v1161_v19 = vmul.f32 0.5, %v1159_v12  ;;  %v5151_v12 = vld [vmem:[%s7013_s7] sm:$0xff]  }
 0x952   :  { %v1164_v15 = vmul.f32 0.70710677, %v1160_v13  ;;  %5429 = verf.f32 %v1163_v14  ;;  %v1162_v20 = vmul.f32 0.5, %v1160_v13  ;;  %v5152_v13 = vld [vmem:[%s7013_s7 + $0x8] sm:$0xff]   ;;  %v5153_v14 = vld [vmem:[%s7013_s7 + $0x10] sm:$0xff]  }
 0x954   :  { %5431 = verf.f32 %v1164_v15  ;;  %v5154_v15 = vld [vmem:[%s7013_s7 + $0x18] sm:$0xff]  }
 0x95c   :  { %v5430_v16 = vpop.eup %5429 }
 0x95d   :  { %v1167_v17 = vadd.f32 1.0, %v5430_v16  ;;  %v4454_v16 = vld [vmem:[#allocation22 + $0x2] ss:$0 sm:$0xff] }
 0x95e   :  { %v5432_v18 = vpop.eup %5431 }
 0x95f   :  { %v1168_v21 = vadd.f32 1.0, %v5432_v18  ;;  %v1169_v22 = vmul.f32 %v1167_v17, %v1161_v19 }
 0x961   :  { %v1170_v9 = vmul.f32 %v1168_v21, %v1162_v20 }
 0x963   :  { %v1171_v24 = vpack.c.bf16 %v1170_v9, %v1169_v22 }
 0x965   :  { %4880 = vmatmul.mubr.bf16.vlgmr.msra.gmra.mrb[12].mxu1 %v1171_v24  ;;  %v4462_v24 = vld [vmem:[#allocation22 + $0x4] ss:$0 sm:$0xff] }
 0x966   :  { %4915 = vmatprep.mubr.msk.bf16.mxu1 %vm5912_vm0, %v5911_v0  ;;  %4908 = vmatpush3.bf16.msra.mxu1 %v5151_v12  ;;  %v5156_v12 = vld [vmem:[#allocation8 + $0x8] sm:$0xff]  }
 0x967   :  { %4909 = vmatprep.subr.bf16.mxu1 %v5911_v0 }
 0x96a   :  { %4910 = vmatpush3.bf16.msra.mxu1 %v5152_v13  ;;  %v5159_v13 = vld [vmem:[#allocation14] sm:$0xff]  }
 0x96b   :  { %4911 = vmatprep.subr.bf16.mxu1 %v5911_v0 }
 0x96e   :  { %4912 = vmatpush3.bf16.msra.mxu1 %v5153_v14  ;;  %v5160_v14 = vld [vmem:[#allocation14 + $0x8] sm:$0xff]  }
 0x96f   :  { %4913 = vmatprep.subr.bf16.mxu1 %v5911_v0 }
 0x972   :  { %4914 = vmatpush3.bf16.msra.mxu1 %v5154_v15  ;;  %v5164_v15 = vld [vmem:[#allocation16 + $0x10] ss:$8 sps:$4 sm:$0xff]  }
 0x973   :  { %4927 = vmatprep.subr.bf16.mxu1 %v5911_v0 }
 0xa38   :  { %v1275_v31 = vpop.f32.mrb[12].mxu1 }
 0xa39   :  { %v1276_v32 = vadd.f32 %v4425_v30, %v1275_v31  ;;  %v4881_v33 = vpop.f32.mrb[13].mxu1 }
 0xa3a   :  { %v1278_v34 = vpop.f32.mrb[14].mxu1 }
 0xa3b   :  { %v1279_v35 = vadd.f32 %v4425_v30, %v1278_v34  ;;  %v4882_v36 = vpop.f32.mrb[15].mxu1  ;;  %v6451_v37 = vadd.f32 %v1276_v32, %v6399_v23  ;;  %v5137_v23 = vld [vmem:[%s7011_s14 + $0x10] sm:$0xff]  }
 0xa3d   :  { %v6454_v38 = vadd.f32 %v1279_v35, %v6401_v8  ;;  %v5138_v8 = vld [vmem:[%s7011_s14 + $0x18] sm:$0xff]   ;;  %v4470_v35 = vld [vmem:[#allocation22 + $0x6] ss:$0 sm:$0xff] }
 0xa3f   :  { %v1284_v40 = vpack.c.bf16 %v6454_v38, %v6451_v37 }
 0xa41   :  { %4892 = vmatmul.mubr.msk.bf16.vlgmr.msra.gmra.mrb[16].mxu0 %vm626_vm2, %v1284_v40 }
 0xa42   :  { %4896 = vmatpush3.bf16.msra.mxu0 %v5135_v39  ;;  %4903 = vmatprep.mubr.msk.bf16.mxu0 %vm5912_vm0, %v5911_v0 }
 0xa43   :  { %4897 = vmatprep.subr.bf16.mxu0 %v5911_v0 }
 0xa46   :  { %4898 = vmatpush3.bf16.msra.mxu0 %v5136_v41 }
 0xa47   :  { %4899 = vmatprep.subr.bf16.mxu0 %v5911_v0 }
 0xa4a   :  { %4900 = vmatpush3.bf16.msra.mxu0 %v5137_v23 }
 0xa4b   :  { %4901 = vmatprep.subr.bf16.mxu0 %v5911_v0 }
 0xa4e   :  { %4902 = vmatpush3.bf16.msra.mxu0 %v5138_v8  ;;  %v5161_v8 = vld [vmem:[#allocation16] ss:$8 sps:$4 sm:$0xff]  }
 0xa4f   :  { %4919 = vmatprep.subr.bf16.mxu0 %v5911_v0 }
 0xb14   :  { %v1359_v43 = vpop.f32.mrb[16].mxu0 }
 0xb15   :  { %v4893_v44 = vpop.f32.mrb[17].mxu0  ;;  %v1360_v46 = vadd.f32 %v4434_v42, %v1359_v43 }
 0xb16   :  { %v1362_v45 = vpop.f32.mrb[18].mxu0 }
 0xb17   :  { %v1363_v47 = vadd.f32 %v4434_v42, %v1362_v45  ;;  %v4894_v48 = vpop.f32.mrb[19].mxu0  ;;  %v5163_v42 = vld [vmem:[#allocation16 + $0x4] ss:$8 sps:$4 sm:$0xff]  }
 0xb19   :  { %v1366_v50 = vpack.c.bf16 %v1363_v47, %v1360_v46 }
 0xb1b   :  { %4904 = vmatmul.mubr.msk.bf16.vlgmr.msra.gmra.mrb[20].mxu0 %vm626_vm2, %v1366_v50 }
 0xb1c   :  { %4920 = vmatpush3.bf16.msra.mxu0 %v5139_v49  ;;  %4923 = vmatprep.mubr.msk.bf16.mxu0 %vm5912_vm0, %v5911_v0 }
 0xb1d   :  { %4921 = vmatprep.subr.bf16.mxu0 %v5911_v0 }
 0xb20   :  { %4922 = vmatpush3.bf16.msra.mxu0 %v5140_v51 }
 0xb21   :  { %4935 = vmatprep.subr.bf16.mxu0 %v5911_v0 }
 0xb23   :  { %4924 = vmatmul.mubr.msk.bf16.vlgmr.msra.gmra.mrb[24].mxu0 %vm379_vm1, %v6267_v5 }
 0xb24   :  { %4936 = vmatpush3.bf16.msra.mxu0 %v5141_v52  ;;  %4939 = vmatprep.mubr.msk.bf16.mxu0 %vm5912_vm0, %v5911_v0 }
 0xb25   :  { %4937 = vmatprep.subr.bf16.mxu0 %v5911_v0 }
 0xb28   :  { %4938 = vmatpush3.bf16.msra.mxu0 %v5142_v53 }
 0xb29   :  { %4951 = vmatprep.subr.bf16.mxu0 %v5911_v0 }
 0xb2b   :  { %4940 = vmatmul.mubr.msk.bf16.vlgmr.msra.gmra.mrb[28].mxu0 %vm379_vm1, %v6267_v5 }
 0xb2c   :  { %4952 = vmatpush3.bf16.msra.mxu0 %v5143_v54  ;;  %4955 = vmatprep.mubr.msk.bf16.mxu0 %vm5912_vm0, %v5911_v0 }
 0xb2d   :  { %4953 = vmatprep.subr.bf16.mxu0 %v5911_v0 }
 0xb30   :  { %4954 = vmatpush3.bf16.msra.mxu0 %v5144_v55 }
 0xb31   :  { %1991 = vmatprep.subr.bf16.mxu0 %v5147_v56 }
 0xb33   :  { %4956 = vmatmul.mubr.msk.bf16.vlgmr.msra.gmra.mrb[32].mxu0 %vm379_vm1, %v6267_v5 }
 0xb34   :  { %1992 = vmatpush1.bf16.msra.mxu0 %v5145_v57  ;;  %2023 = vmatprep.mubr.bf16.mxu0 %v5913_v60 }
 0xb35   :  { %1993 = vmatprep.subr.bf16.mxu0 %v5150_v58 }
 0xb38   :  { %1994 = vmatpush1.bf16.msra.mxu0 %v5148_v59 }
 0xb39   :  { %2077 = vmatprep.subr.bf16.mxu0 %v5163_v42 }
 0xb3b   :  { %4482 = vmatmul.mubr.msk.bf16.vlgmr.msra.gmra.mrb[36].mxu0 %vm379_vm1, %v1963_v29 }
 0xb3c   :  { %2109 = vmatprep.mubr.bf16.mxu0 %v5913_v60  ;;  %2078 = vmatpush1.bf16.msra.mxu0 %v5161_v8 }
 0xbee   :  { %v1441_v62 = vpop.f32.mrb[20].mxu0 }
 0xbef   :  { %v1442_v63 = vadd.f32 %v4440_v61, %v1441_v62  ;;  %v4905_v1 = vpop.f32.mrb[21].mxu0  ;;  %v4446_v62 = vld [vmem:[%s7005_s23 + $0x8] ss:$0 sm:$0xff] }
 0xbf0   :  { %v1444_v5 = vpop.f32.mrb[22].mxu0 }
 0xbf1   :  { %v6500_v2 = vadd.f32 %v1442_v63, %v6451_v37  ;;  %v1445_v3 = vadd.f32 %v4440_v61, %v1444_v5  ;;  %v4906_v4 = vpop.f32.mrb[23].mxu0 }
 0xbf3   :  { %v6503_v6 = vadd.f32 %v1445_v3, %v6454_v38  ;;  %v1450_v26 = vsel %vm626_vm2, %v6500_v2, 0.0  ;;  %v1458_v27 = vmul.f32 %v6500_v2, %v6500_v2 }
 0xbf4   :  { %1451 = vadd.xlane.f32.xlu0 %v1450_v26  ;;  %v4447_v26 = vld [vmem:[%s7005_s23 + $0x9] ss:$0 sm:$0xff] }
 0xbf5   :  { %v1453_v29 = vsel %vm626_vm2, %v6503_v6, 0.0  ;;  %v1459_v7 = vmul.f32 %v6503_v6, %v6503_v6  ;;  %v1460_v10 = vsel %vm626_vm2, %v1458_v27, 0.0 }
 0xbf6   :  { %1454 = vadd.xlane.f32.xlu1 %v1453_v29  ;;  %v1633_v17 = vpop.f32.mrb[24].mxu0 }
 0xbf7   :  { %v1463_v11 = vsel %vm626_vm2, %v1459_v7, 0.0  ;;  %v6523_v18 = vadd.f32 %v4454_v16, %v1633_v17  ;;  %v4925_v19 = vpop.f32.mrb[25].mxu0  ;;  %v5169_v17 = vld [vmem:[#allocation17 + $0x4] ss:$8 sps:$4 sm:$0xff]  }
 0xbf8   :  { %1461 = vadd.xlane.f32.xlu0 %v1460_v10  ;;  %v1636_v20 = vpop.f32.mrb[26].mxu0  ;;  %v5155_v10 = vld [vmem:[#allocation8] sm:$0xff]  }
 0xbf9   :  { %v6525_v21 = vadd.f32 %v4454_v16, %v1636_v20  ;;  %v4926_v22 = vpop.f32.mrb[27].mxu0  ;;  %v5166_v16 = vld [vmem:[#allocation16 + $0x14] ss:$8 sps:$4 sm:$0xff]  }
 0xbfa   :  { %1464 = vadd.xlane.f32.xlu1 %v1463_v11  ;;  %2079 = vmatprep.subr.bf16.mxu0 %v5166_v16 }
 0xbfb   :  { %v1640_v9 = vpack.c.bf16 %v6525_v21, %v6523_v18  ;;  %2080 = vmatpush1.bf16.msra.mxu0 %v5164_v15  ;;  %v4448_v18 = vld [vmem:[#allocation22 + $0x1] ss:$0 sm:$0xff] }
 0xbfc   :  { %2152 = vmatprep.subr.bf16.mxu0 %v5169_v17 }
 0xbfe   :  { %v1761_v25 = vpop.f32.mrb[28].mxu0 }
 0xbff   :  { %v6529_v28 = vadd.f32 %v4462_v24, %v1761_v25  ;;  %v4941_v30 = vpop.f32.mrb[29].mxu0  ;;  %v5167_v25 = vld [vmem:[#allocation17] ss:$8 sps:$4 sm:$0xff]  }
 0xc00   :  { %v1764_v31 = vpop.f32.mrb[30].mxu0  ;;  %v5172_v30 = vld [vmem:[#allocation17 + $0x14] ss:$8 sps:$4 sm:$0xff]  }
 0xc01   :  { %v6531_v32 = vadd.f32 %v4462_v24, %v1764_v31  ;;  %v4942_v33 = vpop.f32.mrb[31].mxu0  ;;  %v4458_v31 = vld [vmem:[#allocation22 + $0x3] ss:$0 sm:$0xff] }
 0xc02   :  { %v5170_v33 = vld [vmem:[#allocation17 + $0x10] ss:$8 sps:$4 sm:$0xff]  }
 0xc03   :  { %v1768_v34 = vpack.c.bf16 %v6531_v32, %v6529_v28 }
 0xc06   :  { %v1889_v36 = vpop.f32.mrb[32].mxu0 }
 0xc07   :  { %v6535_v37 = vadd.f32 %v4470_v35, %v1889_v36  ;;  %v4957_v38 = vpop.f32.mrb[33].mxu0  ;;  %v5175_v36 = vld [vmem:[#allocation19 + $0x4] ss:$8 sps:$4 sm:$0xff]  }
 0xc08   :  { %v1892_v39 = vpop.f32.mrb[34].mxu0 }
 0xc09   :  { %v1893_v40 = vadd.f32 %v4470_v35, %v1892_v39  ;;  %v4958_v41 = vpop.f32.mrb[35].mxu0 }
 0xc0a   :  { %v4466_v41 = vld [vmem:[#allocation22 + $0x5] ss:$0 sm:$0xff] }
 0xc0b   :  { %v1896_v23 = vpack.c.bf16 %v1893_v40, %v6535_v37 }
 0xc81   :  { %v1452_v43 = vpop.xlane.xlu0 %1451 }
 0xc82   :  { %v1456_v44 = vmul.f32 0.015625, %v1452_v43 }
 0xc83   :  { %v1455_v45 = vpop.xlane.xlu1 %1454 }
 0xc84   :  { %v1457_v46 = vmul.f32 0.015625, %v1455_v45  ;;  %v1468_v48 = vmul.f32 %v1456_v44, %v1456_v44  ;;  %v1474_v59 = vsub.f32 %v6500_v2, %v1456_v44  ;;  %v5157_v2 = vld [vmem:[#allocation11] sm:$0xff]  }
 0xc85   :  { %v1462_v47 = vpop.xlane.xlu0 %1461  ;;  %v5178_v44 = vld [vmem:[#allocation19 + $0x14] ss:$8 sps:$4 sm:$0xff]  }
 0xc86   :  { %v1466_v49 = vmul.f32 0.015625, %v1462_v47  ;;  %v1469_v51 = vmul.f32 %v1457_v46, %v1457_v46  ;;  %v1475_v63 = vsub.f32 %v6503_v6, %v1457_v46  ;;  %v5158_v6 = vld [vmem:[#allocation11 + $0x8] sm:$0xff]  }
 0xc87   :  { %v1465_v50 = vpop.xlane.xlu1 %1464 }
 0xc88   :  { %v1470_v52 = vsub.f32 %v1466_v49, %v1468_v48  ;;  %v1467_v53 = vmul.f32 0.015625, %v1465_v50  ;;  %v5176_v48 = vld [vmem:[#allocation19 + $0x10] ss:$8 sps:$4 sm:$0xff]   ;;  %v5181_v50 = vld [vmem:[#allocation20 + $0x4] ss:$8 sps:$4 sm:$0xff]  }
 0xc8a   :  { %v1472_v54 = vmax.f32 %v1470_v52, 0.0  ;;  %v1471_v55 = vsub.f32 %v1467_v53, %v1469_v51  ;;  %v4474_v51 = vld [vmem:[#allocation22 + $0x7] ss:$0 sm:$0xff] }
 0xc8c   :  { %v1476_v56 = vadd.f32 1e-05, %v1472_v54  ;;  %v1473_v57 = vmax.f32 %v1471_v55, 0.0 }
 0xc8e   :  { %5433 = vrsqrt.f32 %v1476_v56  ;;  %v1477_v58 = vadd.f32 1e-05, %v1473_v57 }
 0xc90   :  { %5435 = vrsqrt.f32 %v1477_v58  ;;  %v5179_v58 = vld [vmem:[#allocation20] ss:$8 sps:$4 sm:$0xff]  }
 0xc98   :  { %v5434_v61 = vpop.eup %5433 }
 0xc99   :  { %v1480_v1 = vmul.f32 %v5434_v61, %v1474_v59  ;;  %v5184_v61 = vld [vmem:[#allocation20 + $0x14] ss:$8 sps:$4 sm:$0xff]  }
 0xc9a   :  { %v5436_v5 = vpop.eup %5435 }
 0xc9b   :  { %v1481_v3 = vmul.f32 %v5436_v5, %v1475_v63  ;;  %v1487_v4 = vmul.f32 %v4446_v62, %v1480_v1  ;;  %v2035_v63 = vlaneseq }
 0xc9d   :  { %v1488_v27 = vmul.f32 %v4446_v62, %v1481_v3  ;;  %v1494_v29 = vadd.f32 %v4447_v26, %v1487_v4  ;;  %v5182_v62 = vld [vmem:[#allocation20 + $0x10] ss:$8 sps:$4 sm:$0xff]   ;;  %v6565_v1 = vshrl.u32 %v2035_v63, 7 }
 0xc9e   :  { %v1962_v3 = vld [vmem:[#allocation23] ss:$8 sm:$0x3] }
 0xc9f   :  { %v1495_v7 = vadd.f32 %v4447_v26, %v1488_v27  ;;  %v6568_v5 = vsub.s32 1, %v6565_v1  ;;  %v6571_v4 = vsub.s32 0, %v6565_v1  ;;  %v5232_v63 = vld [vmem:[%s7014_s10 + $0x110] ss:$12 sps:$4 sm:$0xff]  }
 0xca1   :  { %v1496_v11 = vpack.c.bf16 %v1495_v7, %v1494_v29  ;;  %v2042_v26 = vrot.slane %v1962_v3, %v6568_v5  ;;  %v2038_v27 = vrot.slane %v1962_v3, %v6571_v4 }
 0xca3   :  { %4916 = vmatmul.mubr.msk.bf16.vlgmr.msra.gmra.mrb[16].mxu1 %vm626_vm2, %v1496_v11 }
 0xca4   :  { %4928 = vmatpush3.bf16.msra.mxu1 %v5155_v10  ;;  %4931 = vmatprep.mubr.msk.bf16.mxu1 %vm5912_vm0, %v5911_v0 }
 0xca5   :  { %4929 = vmatprep.subr.bf16.mxu1 %v5911_v0 }
 0xca8   :  { %4930 = vmatpush3.bf16.msra.mxu1 %v5156_v12 }
 0xca9   :  { %4943 = vmatprep.subr.bf16.mxu1 %v5911_v0 }
 0xcab   :  { %4932 = vmatmul.mubr.msk.bf16.vlgmr.msra.gmra.mrb[20].mxu1 %vm379_vm1, %v1640_v9 }
 0xcac   :  { %4944 = vmatpush3.bf16.msra.mxu1 %v5157_v2  ;;  %4947 = vmatprep.mubr.msk.bf16.mxu1 %vm5912_vm0, %v5911_v0 }
 0xcad   :  { %4945 = vmatprep.subr.bf16.mxu1 %v5911_v0 }
 0xcb0   :  { %4946 = vmatpush3.bf16.msra.mxu1 %v5158_v6 }
 0xcb1   :  { %4959 = vmatprep.subr.bf16.mxu1 %v5911_v0 }
 0xcb3   :  { %4948 = vmatmul.mubr.msk.bf16.vlgmr.msra.gmra.mrb[24].mxu1 %vm379_vm1, %v1768_v34 }
 0xcb4   :  { %4960 = vmatpush3.bf16.msra.mxu1 %v5159_v13  ;;  %4963 = vmatprep.mubr.msk.bf16.mxu1 %vm5912_vm0, %v5911_v0 }
 0xcb5   :  { %4961 = vmatprep.subr.bf16.mxu1 %v5911_v0 }
 0xcb8   :  { %4962 = vmatpush3.bf16.msra.mxu1 %v5160_v14 }
 0xcbb   :  { %4964 = vmatmul.mubr.msk.bf16.vlgmr.msra.gmra.mrb[28].mxu1 %vm379_vm1, %v1896_v23  ;;  %v5173_v23 = vld [vmem:[#allocation19] ss:$8 sps:$4 sm:$0xff]  }
 0xd76   :  { %v1571_v19 = vpop.f32.mrb[16].mxu1 }
 0xd77   :  { %v4917_v20 = vpop.f32.mrb[17].mxu1  ;;  %v1572_v22 = vadd.f32 %v4448_v18, %v1571_v19 }
 0xd78   :  { %v1574_v21 = vpop.f32.mrb[18].mxu1 }
 0xd79   :  { %v1575_v9 = vadd.f32 %v4448_v18, %v1574_v21  ;;  %v4918_v24 = vpop.f32.mrb[19].mxu1 }
 0xd7b   :  { %v2049_v28 = vpack.c.bf16 %v1575_v9, %v1572_v22 }
 0xd7d   :  { %4487 = vmatmul.mubr.msk.bf16.vlgmr.msra.gmra.mrb[36].mxu0 %vm379_vm1, %v2049_v28  ;;  %v5187_v28 = vld [vmem:[%s7014_s10 + $0x4] ss:$12 sps:$4 sm:$0xff]  }
 0xd7e   :  { %2153 = vmatpush1.bf16.msra.mxu0 %v5167_v25  ;;  %v1699_v32 = vpop.f32.mrb[20].mxu1  ;;  %2184 = vmatprep.mubr.bf16.mxu0 %v5913_v60 }
 0xd7f   :  { %v1700_v34 = vadd.f32 %v4458_v31, %v1699_v32  ;;  %v4933_v35 = vpop.f32.mrb[21].mxu1  ;;  %2154 = vmatprep.subr.bf16.mxu0 %v5172_v30  ;;  %v5185_v30 = vld [vmem:[%s7014_s10] ss:$12 sps:$4 sm:$0xff]   ;;  %2708 = vmatprep.subr.bf16.mxu1 %v5187_v28  ;;  %v5191_v32 = vld [vmem:[%s7014_s10 + $0x1c] ss:$12 sps:$4 sm:$0xff]  }
 0xd80   :  { %v1702_v37 = vpop.f32.mrb[22].mxu1  ;;  %2709 = vmatpush1.bf16.msra.mxu1 %v5185_v30  ;;  %v5195_v35 = vld [vmem:[%s7014_s10 + $0x34] ss:$12 sps:$4 sm:$0xff]  }
 0xd81   :  { %v1703_v38 = vadd.f32 %v4458_v31, %v1702_v37  ;;  %v4934_v39 = vpop.f32.mrb[23].mxu1  ;;  %v5188_v31 = vld [vmem:[%s7014_s10 + $0x8] ss:$12 sps:$4 sm:$0xff]   ;;  %2710 = vmatprep.subr.bf16.mxu1 %v5191_v32  ;;  %v5196_v37 = vld [vmem:[%s7014_s10 + $0x38] ss:$12 sps:$4 sm:$0xff]  }
 0xd82   :  { %2155 = vmatpush1.bf16.msra.mxu0 %v5170_v33  ;;  %v5189_v33 = vld [vmem:[%s7014_s10 + $0x18] ss:$12 sps:$4 sm:$0xff]   ;;  %v5197_v39 = vld [vmem:[%s7014_s10 + $0x48] ss:$12 sps:$4 sm:$0xff]  }
 0xd83   :  { %v2124_v40 = vpack.c.bf16 %v1703_v38, %v1700_v34  ;;  %2227 = vmatprep.subr.bf16.mxu0 %v5175_v36  ;;  %v5192_v34 = vld [vmem:[%s7014_s10 + $0x20] ss:$12 sps:$4 sm:$0xff]   ;;  %v5193_v36 = vld [vmem:[%s7014_s10 + $0x30] ss:$12 sps:$4 sm:$0xff]  }
 0xd84   :  { %2711 = vmatpush1.bf16.msra.mxu1 %v5189_v33  ;;  %v5199_v38 = vld [vmem:[%s7014_s10 + $0x4c] ss:$12 sps:$4 sm:$0xff]  }
 0xd85   :  { %2712 = vmatprep.subr.bf16.mxu1 %v5195_v35 }
 0xd86   :  { %v1827_v8 = vpop.f32.mrb[24].mxu1 }
 0xd87   :  { %v1828_v42 = vadd.f32 %v4466_v41, %v1827_v8  ;;  %v4949_v43 = vpop.f32.mrb[25].mxu1  ;;  %v5204_v8 = vld [vmem:[%s7014_s10 + $0x68] ss:$12 sps:$4 sm:$0xff]  }
 0xd88   :  { %v1830_v45 = vpop.f32.mrb[26].mxu1  ;;  %2713 = vmatpush1.bf16.msra.mxu1 %v5193_v36  ;;  %v5205_v43 = vld [vmem:[%s7014_s10 + $0x78] ss:$12 sps:$4 sm:$0xff]  }
 0xd89   :  { %4492 = vmatmul.mubr.msk.bf16.vlgmr.msra.gmra.mrb[36].mxu0 %vm379_vm1, %v2124_v40  ;;  %v1831_v46 = vadd.f32 %v4466_v41, %v1830_v45  ;;  %v4950_v47 = vpop.f32.mrb[27].mxu1  ;;  %v5200_v40 = vld [vmem:[%s7014_s10 + $0x50] ss:$12 sps:$4 sm:$0xff]   ;;  %2714 = vmatprep.subr.bf16.mxu1 %v5199_v38 }
 0xd8a   :  { %2228 = vmatpush1.bf16.msra.mxu0 %v5173_v23  ;;  %2259 = vmatprep.mubr.bf16.mxu0 %v5913_v60  ;;  %v5203_v41 = vld [vmem:[%s7014_s10 + $0x64] ss:$12 sps:$4 sm:$0xff]   ;;  %v5201_v23 = vld [vmem:[%s7014_s10 + $0x60] ss:$12 sps:$4 sm:$0xff]  }
 0xd8b   :  { %v2199_v49 = vpack.c.bf16 %v1831_v46, %v1828_v42  ;;  %2229 = vmatprep.subr.bf16.mxu0 %v5178_v44  ;;  %v5207_v42 = vld [vmem:[%s7014_s10 + $0x7c] ss:$12 sps:$4 sm:$0xff]   ;;  %v5208_v44 = vld [vmem:[%s7014_s10 + $0x80] ss:$12 sps:$4 sm:$0xff]   ;;  %v5212_v47 = vld [vmem:[%s7014_s10 + $0x98] ss:$12 sps:$4 sm:$0xff]  }
 0xd8c   :  { %2715 = vmatpush1.bf16.msra.mxu1 %v5197_v39  ;;  %v5209_v45 = vld [vmem:[%s7014_s10 + $0x90] ss:$12 sps:$4 sm:$0xff]   ;;  %v5211_v46 = vld [vmem:[%s7014_s10 + $0x94] ss:$12 sps:$4 sm:$0xff]  }
 0xd8d   :  { %2716 = vmatprep.subr.bf16.mxu1 %v5203_v41 }
 0xd8e   :  { %2230 = vmatpush1.bf16.msra.mxu0 %v5176_v48  ;;  %v1955_v52 = vpop.f32.mrb[28].mxu1  ;;  %v5215_v48 = vld [vmem:[%s7014_s10 + $0xac] ss:$12 sps:$4 sm:$0xff]  }
 0xd8f   :  { %2302 = vmatprep.subr.bf16.mxu0 %v5181_v50  ;;  %v1956_v53 = vadd.f32 %v4474_v51, %v1955_v52  ;;  %v4965_v54 = vpop.f32.mrb[29].mxu1  ;;  %v5216_v50 = vld [vmem:[%s7014_s10 + $0xb0] ss:$12 sps:$4 sm:$0xff]   ;;  %v5217_v52 = vld [vmem:[%s7014_s10 + $0xc0] ss:$12 sps:$4 sm:$0xff]  }
 0xd90   :  { %v1958_v55 = vpop.f32.mrb[30].mxu1  ;;  %2717 = vmatpush1.bf16.msra.mxu1 %v5201_v23  ;;  %v5223_v54 = vld [vmem:[%s7014_s10 + $0xdc] ss:$12 sps:$4 sm:$0xff]  }
 0xd91   :  { %v1959_v56 = vadd.f32 %v4474_v51, %v1958_v55  ;;  %v4966_v57 = vpop.f32.mrb[31].mxu1  ;;  %2718 = vmatprep.subr.bf16.mxu1 %v5207_v42  ;;  %v5219_v51 = vld [vmem:[%s7014_s10 + $0xc4] ss:$12 sps:$4 sm:$0xff]  }
 0xd92   :  { %v5221_v55 = vld [vmem:[%s7014_s10 + $0xd8] ss:$12 sps:$4 sm:$0xff]   ;;  %v5227_v57 = vld [vmem:[%s7014_s10 + $0xf4] ss:$12 sps:$4 sm:$0xff]  }
 0xd93   :  { %v2274_v59 = vpack.c.bf16 %v1959_v56, %v1956_v53  ;;  %v5220_v53 = vld [vmem:[%s7014_s10 + $0xc8] ss:$12 sps:$4 sm:$0xff]   ;;  %v5224_v56 = vld [vmem:[%s7014_s10 + $0xe0] ss:$12 sps:$4 sm:$0xff]  }
 0xd94   :  { %2719 = vmatpush1.bf16.msra.mxu1 %v5205_v43 }
 0xd95   :  { %4497 = vmatmul.mubr.msk.bf16.vlgmr.msra.gmra.mrb[36].mxu0 %vm379_vm1, %v2199_v49  ;;  %2720 = vmatprep.subr.bf16.mxu1 %v5211_v46  ;;  %v5213_v49 = vld [vmem:[%s7014_s10 + $0xa8] ss:$12 sps:$4 sm:$0xff]  }
 0xd96   :  { %2303 = vmatpush1.bf16.msra.mxu0 %v5179_v58  ;;  %2334 = vmatprep.mubr.bf16.mxu0 %v5913_v60  ;;  %v5225_v58 = vld [vmem:[%s7014_s10 + $0xf0] ss:$12 sps:$4 sm:$0xff]  }
 0xd97   :  { %2304 = vmatprep.subr.bf16.mxu0 %v5184_v61  ;;  %v5231_v61 = vld [vmem:[%s7014_s10 + $0x10c] ss:$12 sps:$4 sm:$0xff]  }
 0xd98   :  { %2721 = vmatpush1.bf16.msra.mxu1 %v5209_v45 }
 0xd99   :  { %2722 = vmatprep.subr.bf16.mxu1 %v5215_v48 }
 0xd9a   :  { %2305 = vmatpush1.bf16.msra.mxu0 %v5182_v62  ;;  %v5229_v62 = vld [vmem:[%s7014_s10 + $0x108] ss:$12 sps:$4 sm:$0xff]  }
 0xd9b   :  { %2751 = vmatprep.subr.bf16.mxu0 %v5913_v60 }
 0xd9c   :  { %2723 = vmatpush1.bf16.msra.mxu1 %v5213_v49 }
 0xd9d   :  { %2724 = vmatprep.subr.bf16.mxu1 %v5219_v51 }
 0xda0   :  { %2725 = vmatpush1.bf16.msra.mxu1 %v5217_v52 }
 0xda1   :  { %4502 = vmatmul.mubr.msk.bf16.vlgmr.msra.gmra.mrb[36].mxu0 %vm379_vm1, %v2274_v59  ;;  %2726 = vmatprep.subr.bf16.mxu1 %v5223_v54  ;;  %v5228_v59 = vld [vmem:[%s7014_s10 + $0xf8] ss:$12 sps:$4 sm:$0xff]  }
 0xda2   :  { %2752 = vmatpush1.bf16.msra.mxu0 %v5188_v31 }
 0xda3   :  { %2753 = vmatprep.subr.bf16.mxu0 %v5913_v60 }
 0xda4   :  { %2727 = vmatpush1.bf16.msra.mxu1 %v5221_v55 }
 0xda5   :  { %2728 = vmatprep.subr.bf16.mxu1 %v5227_v57 }
 0xda6   :  { %2754 = vmatpush1.bf16.msra.mxu0 %v5192_v34 }
 0xda7   :  { %2755 = vmatprep.subr.bf16.mxu0 %v5913_v60 }
 0xda8   :  { %2729 = vmatpush1.bf16.msra.mxu1 %v5225_v58 }
 0xda9   :  { %2730 = vmatprep.subr.bf16.mxu1 %v5231_v61 }
 0xdaa   :  { %2756 = vmatpush1.bf16.msra.mxu0 %v5196_v37 }
 0xdab   :  { %2757 = vmatprep.subr.bf16.mxu0 %v5913_v60 }
 0xdac   :  { %2731 = vmatpush1.bf16.msra.mxu1 %v5229_v62 }
 0xdae   :  { %2758 = vmatpush1.bf16.msra.mxu0 %v5200_v40 }
 0xdaf   :  { %2759 = vmatprep.subr.bf16.mxu0 %v5913_v60 }
 0xdb2   :  { %2760 = vmatpush1.bf16.msra.mxu0 %v5204_v8 }
 0xdb3   :  { %2761 = vmatprep.subr.bf16.mxu0 %v5913_v60 }
 0xdb6   :  { %2762 = vmatpush1.bf16.msra.mxu0 %v5208_v44 }
 0xdb7   :  { %2763 = vmatprep.subr.bf16.mxu0 %v5913_v60 }
 0xdba   :  { %2764 = vmatpush1.bf16.msra.mxu0 %v5212_v47 }
 0xdbb   :  { %2765 = vmatprep.subr.bf16.mxu0 %v5913_v60 }
 0xdbe   :  { %2766 = vmatpush1.bf16.msra.mxu0 %v5216_v50 }
 0xdbf   :  { %2767 = vmatprep.subr.bf16.mxu0 %v5913_v60 }
 0xdc2   :  { %2768 = vmatpush1.bf16.msra.mxu0 %v5220_v53 }
 0xdc3   :  { %2769 = vmatprep.subr.bf16.mxu0 %v5913_v60 }
 0xdc6   :  { %2770 = vmatpush1.bf16.msra.mxu0 %v5224_v56 }
 0xdc7   :  { %2771 = vmatprep.subr.bf16.mxu0 %v5913_v60 }
 0xdca   :  { %2772 = vmatpush1.bf16.msra.mxu0 %v5228_v59 }
 0xdcb   :  { %2773 = vmatprep.subr.bf16.mxu0 %v5913_v60 }
 0xdce   :  { %2774 = vmatpush1.bf16.msra.mxu0 %v5232_v63 }
 0xe74   :  { %v2336_v29 = vpop.f32.mrb[36].mxu0 }
 0xe75   :  { %v2338_v7 = vpop.f32.mrb[37].mxu0  ;;  %v6577_v12 = vadd.f32 %v2336_v29, %v2038_v27 }
 0xe76   :  { %v6575_v10 = vadd.f32 %v2338_v7, %v2042_v26  ;;  %v2340_v11 = vpop.f32.mrb[38].mxu0 }
 0xe77   :  { %v2342_v2 = vpop.f32.mrb[39].mxu0  ;;  %v6585_v15 = vadd.f32 %v2340_v11, %v2038_v27  ;;  %v2360_v21 = vmul.f32 %v6577_v12, %v6577_v12 }
 0xe78   :  { %v6579_v6 = vadd.f32 %v2342_v2, %v2042_v26  ;;  %v2349_v13 = vsel %vm626_vm2, %v6575_v10, 0.0  ;;  %v2361_v14 = vmul.f32 %v6575_v10, %v6575_v10 }
 0xe79   :  { %v2350_v16 = vadd.f32 %v6577_v12, %v2349_v13  ;;  %v2362_v24 = vmul.f32 %v6585_v15, %v6585_v15 }
 0xe7a   :  { %v2353_v17 = vsel %vm626_vm2, %v6579_v6, 0.0  ;;  %v2364_v18 = vsel %vm626_vm2, %v2361_v14, 0.0  ;;  %v2363_v19 = vmul.f32 %v6579_v6, %v6579_v6 }
 0xe7b   :  { %2351 = vadd.xlane.f32.xlu0 %v2350_v16  ;;  %v2354_v20 = vadd.f32 %v6585_v15, %v2353_v17  ;;  %v2365_v9 = vadd.f32 %v2364_v18, %v2360_v21 }
 0xe7c   :  { %v2368_v22 = vsel %vm626_vm2, %v2363_v19, 0.0 }
 0xe7d   :  { %2355 = vadd.xlane.f32.xlu1 %v2354_v20  ;;  %v2369_v25 = vadd.f32 %v2368_v22, %v2362_v24  ;;  %v2410_v24 = vld [vmem:[#allocation23 + $0x2] ss:$8 sm:$0x3] }
 0xe7e   :  { %v2419_v33 = vrot.slane %v2410_v24, %v6568_v5  ;;  %v2415_v34 = vrot.slane %v2410_v24, %v6571_v4 }
 0xe7f   :  { %2366 = vadd.xlane.f32.xlu0 %v2365_v9  ;;  %v2393_v9 = vld [vmem:[#allocation23 + $0x1] ss:$8 sm:$0x3] }
 0xe80   :  { %v2402_v30 = vrot.slane %v2393_v9, %v6568_v5  ;;  %v2398_v31 = vrot.slane %v2393_v9, %v6571_v4 }
 0xe81   :  { %2370 = vadd.xlane.f32.xlu1 %v2369_v25 }
 0xf08   :  { %v2352_v3 = vpop.xlane.xlu0 %2351 }
 0xf09   :  { %v2358_v26 = vmul.f32 0.0052083335, %v2352_v3 }
 0xf0a   :  { %v2356_v27 = vpop.xlane.xlu1 %2355 }
 0xf0b   :  { %v2359_v29 = vmul.f32 0.0052083335, %v2356_v27  ;;  %v2374_v11 = vmul.f32 %v2358_v26, %v2358_v26  ;;  %v2380_v25 = vsub.f32 %v6577_v12, %v2358_v26  ;;  %v2381_v28 = vsub.f32 %v6575_v10, %v2358_v26 }
 0xf0c   :  { %v2367_v7 = vpop.xlane.xlu0 %2366 }
 0xf0d   :  { %v2372_v2 = vmul.f32 0.0052083335, %v2367_v7  ;;  %v2375_v16 = vmul.f32 %v2359_v29, %v2359_v29  ;;  %v2382_v35 = vsub.f32 %v6585_v15, %v2359_v29  ;;  %v2383_v36 = vsub.f32 %v6579_v6, %v2359_v29  ;;  %v5233_v29 = vld [vmem:[%s7015_s12] ss:$8 sps:$4 sm:$0xff]   ;;  %v5235_v7 = vld [vmem:[%s7015_s12 + $0x4] ss:$8 sps:$4 sm:$0xff]  }
 0xf0e   :  { %v2371_v13 = vpop.xlane.xlu1 %2370  ;;  %3223 = vmatprep.subr.bf16.mxu1 %v5235_v7  ;;  %v5271_v7 = vld [vmem:[%s7015_s12 + $0xc4] ss:$8 sps:$4 sm:$0xff]  }
 0xf0f   :  { %v2376_v14 = vsub.f32 %v2372_v2, %v2374_v11  ;;  %v2373_v17 = vmul.f32 0.0052083335, %v2371_v13  ;;  %v5238_v11 = vld [vmem:[%s7015_s12 + $0x14] ss:$8 sps:$4 sm:$0xff]   ;;  %v5236_v2 = vld [vmem:[%s7015_s12 + $0x10] ss:$8 sps:$4 sm:$0xff]  }
 0xf10   :  { %v5241_v13 = vld [vmem:[%s7015_s12 + $0x24] ss:$8 sps:$4 sm:$0xff]  }
 0xf11   :  { %v2378_v18 = vmax.f32 %v2376_v14, 0.0  ;;  %v2377_v19 = vsub.f32 %v2373_v17, %v2375_v16  ;;  %v5239_v14 = vld [vmem:[%s7015_s12 + $0x20] ss:$8 sps:$4 sm:$0xff]   ;;  %v5244_v16 = vld [vmem:[%s7015_s12 + $0x34] ss:$8 sps:$4 sm:$0xff]  }
 0xf12   :  { %v5242_v17 = vld [vmem:[%s7015_s12 + $0x30] ss:$8 sps:$4 sm:$0xff]  }
 0xf13   :  { %v2384_v20 = vadd.f32 1e-05, %v2378_v18  ;;  %v2379_v21 = vmax.f32 %v2377_v19, 0.0  ;;  %v2496_v18 = vld [vmem:[#allocation25] ss:$4 sm:$0x7] }
 0xf14   :  { %v6677_v19 = vsub.s32 2, %v6565_v1 }
 0xf15   :  { %5437 = vrsqrt.f32 %v2384_v20  ;;  %v2385_v22 = vadd.f32 1e-05, %v2379_v21  ;;  %v2501_v20 = vrot.slane %v2496_v18, %v6571_v4  ;;  %v2505_v21 = vrot.slane %v2496_v18, %v6568_v5 }
 0xf16   :  { %v2509_v9 = vrot.slane %v2496_v18, %v6677_v19  ;;  %v5278_v18 = vld [vmem:[%s7015_s12 + $0xf0] ss:$8 sps:$4 sm:$0xff]  }
 0xf17   :  { %5439 = vrsqrt.f32 %v2385_v22 }
 0xf1f   :  { %v5438_v32 = vpop.eup %5437 }
 0xf20   :  { %v2388_v37 = vmul.f32 %v5438_v32, %v2380_v25  ;;  %v2389_v38 = vmul.f32 %v5438_v32, %v2381_v28 }
 0xf21   :  { %v5440_v39 = vpop.eup %5439 }
 0xf22   :  { %v2390_v40 = vmul.f32 %v5440_v39, %v2382_v35  ;;  %v2391_v12 = vmul.f32 %v5440_v39, %v2383_v36  ;;  %v2406_v41 = vmul.f32 %v2402_v30, %v2389_v38  ;;  %v2405_v10 = vmul.f32 %v2398_v31, %v2388_v37 }
 0xf24   :  { %v2408_v23 = vmul.f32 %v2402_v30, %v2391_v12  ;;  %v2423_v8 = vadd.f32 %v2419_v33, %v2406_v41  ;;  %v2407_v42 = vmul.f32 %v2398_v31, %v2390_v40  ;;  %v2422_v43 = vadd.f32 %v2415_v34, %v2405_v10 }
 0xf26   :  { %v2425_v44 = vadd.f32 %v2419_v33, %v2408_v23  ;;  %v2431_v45 = vmul.f32 0.70710677, %v2423_v8  ;;  %v2424_v46 = vadd.f32 %v2415_v34, %v2407_v42  ;;  %v2430_v47 = vmul.f32 0.70710677, %v2422_v43 }
 0xf27   :  { %v2427_v54 = vmul.f32 0.5, %v2423_v8  ;;  %v2426_v57 = vmul.f32 0.5, %v2422_v43 }
 0xf28   :  { %v2433_v48 = vmul.f32 0.70710677, %v2425_v44  ;;  %5441 = verf.f32 %v2431_v45  ;;  %v2432_v15 = vmul.f32 0.70710677, %v2424_v46  ;;  %v2429_v55 = vmul.f32 0.5, %v2425_v44 }
 0xf29   :  { %5443 = verf.f32 %v2430_v47  ;;  %v2428_v58 = vmul.f32 0.5, %v2424_v46 }
 0xf2a   :  { %5445 = verf.f32 %v2433_v48 }
 0xf2b   :  { %5447 = verf.f32 %v2432_v15  ;;  %v5247_v15 = vld [vmem:[%s7015_s12 + $0x44] ss:$8 sps:$4 sm:$0xff]  }
 0xf32   :  { %v5442_v6 = vpop.eup %5441 }
 0xf33   :  { %v5444_v49 = vpop.eup %5443  ;;  %v2439_v50 = vadd.f32 1.0, %v5442_v6  ;;  %v5245_v6 = vld [vmem:[%s7015_s12 + $0x40] ss:$8 sps:$4 sm:$0xff]  }
 0xf34   :  { %v5446_v51 = vpop.eup %5445  ;;  %v2438_v52 = vadd.f32 1.0, %v5444_v49  ;;  %v5250_v49 = vld [vmem:[%s7015_s12 + $0x54] ss:$8 sps:$4 sm:$0xff]  }
 0xf35   :  { %v5448_v53 = vpop.eup %5447  ;;  %v2441_v56 = vadd.f32 1.0, %v5446_v51  ;;  %v6654_v61 = vmul.f32 %v2439_v50, %v2427_v54  ;;  %v5248_v50 = vld [vmem:[%s7015_s12 + $0x50] ss:$8 sps:$4 sm:$0xff]   ;;  %v5253_v51 = vld [vmem:[%s7015_s12 + $0x64] ss:$8 sps:$4 sm:$0xff]  }
 0xf36   :  { %v2440_v59 = vadd.f32 1.0, %v5448_v53  ;;  %v6658_v63 = vmul.f32 %v2438_v52, %v2426_v57  ;;  %v5251_v52 = vld [vmem:[%s7015_s12 + $0x60] ss:$8 sps:$4 sm:$0xff]   ;;  %v5256_v53 = vld [vmem:[%s7015_s12 + $0x74] ss:$8 sps:$4 sm:$0xff]  }
 0xf37   :  { %v6656_v62 = vmul.f32 %v2441_v56, %v2429_v55  ;;  %v5254_v54 = vld [vmem:[%s7015_s12 + $0x70] ss:$8 sps:$4 sm:$0xff]   ;;  %v5259_v55 = vld [vmem:[%s7015_s12 + $0x84] ss:$8 sps:$4 sm:$0xff]   ;;  %v5257_v56 = vld [vmem:[%s7015_s12 + $0x80] ss:$8 sps:$4 sm:$0xff]  }
 0xf38   :  { %v6660_v3 = vmul.f32 %v2440_v59, %v2428_v58  ;;  %v5262_v57 = vld [vmem:[%s7015_s12 + $0x94] ss:$8 sps:$4 sm:$0xff]   ;;  %v5260_v58 = vld [vmem:[%s7015_s12 + $0x90] ss:$8 sps:$4 sm:$0xff]   ;;  %v5265_v59 = vld [vmem:[%s7015_s12 + $0xa4] ss:$8 sps:$4 sm:$0xff]  }
 0xf39   :  { %v2447_v26 = vpack.c.bf16 %v6656_v62, %v6654_v61 }
 0xf3a   :  { %v2446_v27 = vpack.c.bf16 %v6660_v3, %v6658_v63 }
 0xf3b   :  { %4539 = vmatprep.mubr.msk.bf16.mxu1 %vm626_vm2, %v2447_v26  ;;  %4540 = vmatprep.mubr.msk.bf16.mxu0 %vm626_vm2, %v2447_v26  ;;  %v5263_v26 = vld [vmem:[%s7015_s12 + $0xa0] ss:$8 sps:$4 sm:$0xff]  }
 0xf3c   :  { %2741 = vmatmul.mubr.bf16.vlgmr.msra.gmra.mrb[32].mxu1 %v2446_v27  ;;  %2784 = vmatmul.mubr.bf16.vlgmr.msra.gmra.mrb[40].mxu0 %v2446_v27  ;;  %v5268_v27 = vld [vmem:[%s7015_s12 + $0xb4] ss:$8 sps:$4 sm:$0xff]  }
 0xf3d   :  { %3224 = vmatpush1.bf16.msra.mxu1 %v5233_v29  ;;  %v5266_v29 = vld [vmem:[%s7015_s12 + $0xb0] ss:$8 sps:$4 sm:$0xff]  }
 0xf3e   :  { %3225 = vmatprep.subr.bf16.mxu1 %v5238_v11  ;;  %v5269_v11 = vld [vmem:[%s7015_s12 + $0xc0] ss:$8 sps:$4 sm:$0xff]  }
 0xf41   :  { %3226 = vmatpush1.bf16.msra.mxu1 %v5236_v2  ;;  %v5274_v2 = vld [vmem:[%s7015_s12 + $0xd4] ss:$8 sps:$4 sm:$0xff]  }
 0xf42   :  { %3227 = vmatprep.subr.bf16.mxu1 %v5241_v13  ;;  %v5272_v13 = vld [vmem:[%s7015_s12 + $0xd0] ss:$8 sps:$4 sm:$0xff]  }
 0xf45   :  { %3228 = vmatpush1.bf16.msra.mxu1 %v5239_v14  ;;  %v5277_v14 = vld [vmem:[%s7015_s12 + $0xe4] ss:$8 sps:$4 sm:$0xff]  }
 0xf46   :  { %3229 = vmatprep.subr.bf16.mxu1 %v5244_v16  ;;  %v5275_v16 = vld [vmem:[%s7015_s12 + $0xe0] ss:$8 sps:$4 sm:$0xff]  }
 0xf49   :  { %3230 = vmatpush1.bf16.msra.mxu1 %v5242_v17  ;;  %v5280_v17 = vld [vmem:[%s7015_s12 + $0xf4] ss:$8 sps:$4 sm:$0xff]  }
 0xf4a   :  { %3231 = vmatprep.subr.bf16.mxu1 %v5247_v15 }
 0xf4d   :  { %3232 = vmatpush1.bf16.msra.mxu1 %v5245_v6 }
 0xf4e   :  { %3233 = vmatprep.subr.bf16.mxu1 %v5250_v49 }
 0xf51   :  { %3234 = vmatpush1.bf16.msra.mxu1 %v5248_v50 }
 0xf52   :  { %3235 = vmatprep.subr.bf16.mxu1 %v5253_v51 }
 0xf55   :  { %3236 = vmatpush1.bf16.msra.mxu1 %v5251_v52 }
 0xf56   :  { %3237 = vmatprep.subr.bf16.mxu1 %v5256_v53 }
 0xf59   :  { %3238 = vmatpush1.bf16.msra.mxu1 %v5254_v54 }
 0xf5a   :  { %3239 = vmatprep.subr.bf16.mxu1 %v5259_v55 }
 0xf5d   :  { %3240 = vmatpush1.bf16.msra.mxu1 %v5257_v56 }
 0xf5e   :  { %3241 = vmatprep.subr.bf16.mxu1 %v5262_v57 }
 0xf61   :  { %3242 = vmatpush1.bf16.msra.mxu1 %v5260_v58 }
 0xf62   :  { %3243 = vmatprep.subr.bf16.mxu1 %v5265_v59  ;;  %v2842_v59 = vld [vmem:[#allocation25 + $0x1] ss:$4 sm:$0x7] }
 0xf65   :  { %3244 = vmatpush1.bf16.msra.mxu1 %v5263_v26  ;;  %v2866_v26 = vld [vmem:[#allocation25 + $0x2] ss:$4 sm:$0x7] }
 0xf66   :  { %3245 = vmatprep.subr.bf16.mxu1 %v5268_v27  ;;  %v2847_v27 = vrot.slane %v2842_v59, %v6571_v4 }
 0xf69   :  { %3246 = vmatpush1.bf16.msra.mxu1 %v5266_v29 }
 0xf6a   :  { %3247 = vmatprep.subr.bf16.mxu1 %v5271_v7 }
 0xf6d   :  { %3248 = vmatpush1.bf16.msra.mxu1 %v5269_v11  ;;  %v2851_v11 = vrot.slane %v2842_v59, %v6568_v5 }
 0xf6e   :  { %3249 = vmatprep.subr.bf16.mxu1 %v5274_v2 }
 0xf71   :  { %3250 = vmatpush1.bf16.msra.mxu1 %v5272_v13  ;;  %v2875_v13 = vrot.slane %v2866_v26, %v6568_v5 }
 0xf72   :  { %3251 = vmatprep.subr.bf16.mxu1 %v5277_v14  ;;  %v2871_v14 = vrot.slane %v2866_v26, %v6571_v4 }
 0xf75   :  { %3252 = vmatpush1.bf16.msra.mxu1 %v5275_v16 }
 0xf76   :  { %3253 = vmatprep.subr.bf16.mxu1 %v5280_v17 }
 0xf79   :  { %3254 = vmatpush1.bf16.msra.mxu1 %v5278_v18 }
0x100f   :  { %v2742_v22 = vpop.f32.mrb[32].mxu1  ;;  %v2785_v24 = vpop.f32.mrb[40].mxu0 }
0x1010   :  { %v6682_v25 = vadd.f32 %v2742_v22, %v2501_v20  ;;  %v2744_v28 = vpop.f32.mrb[33].mxu1  ;;  %v2787_v30 = vpop.f32.mrb[41].mxu0  ;;  %v6690_v37 = vadd.f32 %v2785_v24, %v2509_v9  ;;  %v5307_v22 = vld [vmem:[%s7016_s6 + $0x4] ss:$8 sps:$4 sm:$0xff]   ;;  %v5308_v24 = vld [vmem:[%s7016_s6 + $0x10] ss:$8 sps:$4 sm:$0xff]  }
0x1011   :  { %v6684_v31 = vadd.f32 %v2744_v28, %v2505_v21  ;;  %v2746_v32 = vpop.f32.mrb[34].mxu1  ;;  %v2788_v33 = vpop.f32.mrb[42].mxu0  ;;  %3475 = vmatprep.subr.bf16.mxu0 %v5307_v22  ;;  %v5313_v28 = vld [vmem:[%s7016_s6 + $0x24] ss:$8 sps:$4 sm:$0xff]   ;;  %v5311_v30 = vld [vmem:[%s7016_s6 + $0x20] ss:$8 sps:$4 sm:$0xff]  }
0x1012   :  { %v2803_v1 = vmul.f32 %v6682_v25, %v6682_v25  ;;  %v6688_v34 = vadd.f32 %v2746_v32, %v2501_v20  ;;  %v2748_v35 = vpop.f32.mrb[35].mxu1  ;;  %v2790_v36 = vpop.f32.mrb[43].mxu0  ;;  %v6700_v41 = vadd.f32 %v2788_v33, %v2509_v9  ;;  %v2805_v44 = vmul.f32 %v6690_v37, %v6690_v37  ;;  %v5283_v20 = vld [vmem:[%s7015_s12 + $0x104] ss:$8 sps:$4 sm:$0xff]   ;;  %v5310_v9 = vld [vmem:[%s7016_s6 + $0x14] ss:$8 sps:$4 sm:$0xff]  }
0x1013   :  { %v2804_v38 = vmul.f32 %v6684_v31, %v6684_v31  ;;  %v6694_v39 = vadd.f32 %v2748_v35, %v2505_v21  ;;  %v2792_v40 = vadd.f32 %v6684_v31, %v6682_v25  ;;  %3266 = vmatprep.subr.bf16.mxu1 %v5283_v20  ;;  %v5305_v21 = vld [vmem:[%s7016_s6] ss:$8 sps:$4 sm:$0xff]   ;;  %v5316_v32 = vld [vmem:[%s7016_s6 + $0x34] ss:$8 sps:$4 sm:$0xff]   ;;  %v5314_v33 = vld [vmem:[%s7016_s6 + $0x30] ss:$8 sps:$4 sm:$0xff]  }
0x1014   :  { %v2806_v12 = vmul.f32 %v6688_v34, %v6688_v34  ;;  %v2808_v47 = vmul.f32 %v6700_v41, %v6700_v41  ;;  %3476 = vmatpush1.bf16.msra.mxu0 %v5305_v21  ;;  %v5317_v35 = vld [vmem:[%s7016_s6 + $0x40] ss:$8 sps:$4 sm:$0xff]   ;;  %v5322_v36 = vld [vmem:[%s7016_s6 + $0x54] ss:$8 sps:$4 sm:$0xff]  }
0x1015   :  { %v2807_v10 = vmul.f32 %v6694_v39, %v6694_v39  ;;  %v2793_v23 = vadd.f32 %v2792_v40, %v6690_v37  ;;  %v2796_v8 = vadd.f32 %v6694_v39, %v6688_v34  ;;  %v2809_v42 = vadd.f32 %v2804_v38, %v2803_v1  ;;  %3477 = vmatprep.subr.bf16.mxu0 %v5310_v9  ;;  %v5319_v1 = vld [vmem:[%s7016_s6 + $0x44] ss:$8 sps:$4 sm:$0xff]   ;;  %v5320_v38 = vld [vmem:[%s7016_s6 + $0x50] ss:$8 sps:$4 sm:$0xff]  }
0x1016   :  { %v5325_v40 = vld [vmem:[%s7016_s6 + $0x64] ss:$8 sps:$4 sm:$0xff]  }
0x1017   :  { %2794 = vadd.xlane.f32.xlu0 %v2793_v23  ;;  %v2797_v43 = vadd.f32 %v2796_v8, %v6700_v41  ;;  %v2813_v45 = vadd.f32 %v2807_v10, %v2806_v12  ;;  %v2810_v46 = vadd.f32 %v2809_v42, %v2805_v44  ;;  %v5323_v12 = vld [vmem:[%s7016_s6 + $0x60] ss:$8 sps:$4 sm:$0xff]   ;;  %v5328_v10 = vld [vmem:[%s7016_s6 + $0x74] ss:$8 sps:$4 sm:$0xff]   ;;  %v5326_v23 = vld [vmem:[%s7016_s6 + $0x70] ss:$8 sps:$4 sm:$0xff]  }
0x1018   :  { %3478 = vmatpush1.bf16.msra.mxu0 %v5308_v24  ;;  %v5331_v8 = vld [vmem:[%s7016_s6 + $0x84] ss:$8 sps:$4 sm:$0xff]   ;;  %v5329_v42 = vld [vmem:[%s7016_s6 + $0x80] ss:$8 sps:$4 sm:$0xff]   ;;  %v5332_v44 = vld [vmem:[%s7016_s6 + $0x90] ss:$8 sps:$4 sm:$0xff]  }
0x1019   :  { %2798 = vadd.xlane.f32.xlu1 %v2797_v43  ;;  %v2814_v48 = vadd.f32 %v2813_v45, %v2808_v47  ;;  %3479 = vmatprep.subr.bf16.mxu0 %v5313_v28  ;;  %v5334_v43 = vld [vmem:[%s7016_s6 + $0x94] ss:$8 sps:$4 sm:$0xff]  }
0x101b   :  { %2811 = vadd.xlane.f32.xlu0 %v2810_v46 }
0x101c   :  { %3480 = vmatpush1.bf16.msra.mxu0 %v5311_v30 }
0x101d   :  { %2815 = vadd.xlane.f32.xlu1 %v2814_v48  ;;  %3481 = vmatprep.subr.bf16.mxu0 %v5316_v32 }
0x1020   :  { %3482 = vmatpush1.bf16.msra.mxu0 %v5314_v33 }
0x1021   :  { %3483 = vmatprep.subr.bf16.mxu0 %v5319_v1 }
0x1024   :  { %3484 = vmatpush1.bf16.msra.mxu0 %v5317_v35 }
0x1025   :  { %3485 = vmatprep.subr.bf16.mxu0 %v5322_v36 }
0x1028   :  { %3486 = vmatpush1.bf16.msra.mxu0 %v5320_v38 }
0x1029   :  { %3487 = vmatprep.subr.bf16.mxu0 %v5325_v40 }
0x102c   :  { %3488 = vmatpush1.bf16.msra.mxu0 %v5323_v12 }
0x102d   :  { %3489 = vmatprep.subr.bf16.mxu0 %v5328_v10 }
0x1030   :  { %3490 = vmatpush1.bf16.msra.mxu0 %v5326_v23 }
0x1031   :  { %3491 = vmatprep.subr.bf16.mxu0 %v5331_v8 }
0x1034   :  { %3492 = vmatpush1.bf16.msra.mxu0 %v5329_v42 }
0x1035   :  { %3493 = vmatprep.subr.bf16.mxu0 %v5334_v43 }
0x1038   :  { %3494 = vmatpush1.bf16.msra.mxu0 %v5332_v44 }
0x10a4   :  { %v2795_v45 = vpop.xlane.xlu0 %2794 }
0x10a5   :  { %v6757_v46 = vmul.f32 0.0026041667, %v2795_v45 }
0x10a6   :  { %v2799_v47 = vpop.xlane.xlu1 %2798 }
0x10a7   :  { %v2802_v48 = vmul.f32 0.0026041667, %v2799_v47  ;;  %v2819_v6 = vmul.f32 %v6757_v46, %v6757_v46  ;;  %v2825_v29 = vsub.f32 %v6682_v25, %v6757_v46  ;;  %v2826_v7 = vsub.f32 %v6684_v31, %v6757_v46 }
0x10a8   :  { %v2812_v15 = vpop.xlane.xlu0 %2811  ;;  %v2827_v8 = vsub.f32 %v6690_v37, %v6757_v46 }
0x10a9   :  { %v2817_v49 = vmul.f32 0.0026041667, %v2812_v15  ;;  %v2820_v52 = vmul.f32 %v2802_v48, %v2802_v48  ;;  %v2828_v16 = vsub.f32 %v6688_v34, %v2802_v48  ;;  %v2829_v17 = vsub.f32 %v6694_v39, %v2802_v48 }
0x10aa   :  { %v2816_v50 = vpop.xlane.xlu1 %2815  ;;  %v2830_v12 = vsub.f32 %v6700_v41, %v2802_v48 }
0x10ab   :  { %v2821_v51 = vsub.f32 %v2817_v49, %v2819_v6  ;;  %v2818_v53 = vmul.f32 0.0026041667, %v2816_v50 }
0x10ad   :  { %v2823_v54 = vmax.f32 %v2821_v51, 0.0  ;;  %v2822_v55 = vsub.f32 %v2818_v53, %v2820_v52  ;;  %v2855_v51 = vrot.slane %v2842_v59, %v6677_v19  ;;  %v5284_v59 = vld [vmem:[%s7015_s12 + $0x110] ss:$8 sps:$4 sm:$0xff]  }
0x10af   :  { %v2831_v56 = vadd.f32 1e-05, %v2823_v54  ;;  %v2824_v57 = vmax.f32 %v2822_v55, 0.0  ;;  %v5281_v54 = vld [vmem:[%s7015_s12 + $0x100] ss:$8 sps:$4 sm:$0xff]  }
0x10b1   :  { %5449 = vrsqrt.f32 %v2831_v56  ;;  %v2832_v58 = vadd.f32 1e-05, %v2824_v57  ;;  %v5286_v57 = vld [vmem:[%s7015_s12 + $0x114] ss:$8 sps:$4 sm:$0xff]  }
0x10b3   :  { %5451 = vrsqrt.f32 %v2832_v58  ;;  %v2879_v58 = vrot.slane %v2866_v26, %v6677_v19  ;;  %v5292_v19 = vld [vmem:[%s7015_s12 + $0x134] ss:$8 sps:$4 sm:$0xff]  }
0x10bb   :  { %v5450_v2 = vpop.eup %5449 }
0x10bc   :  { %v2836_v18 = vmul.f32 %v5450_v2, %v2826_v7  ;;  %v2835_v20 = vmul.f32 %v5450_v2, %v2825_v29  ;;  %v2837_v52 = vmul.f32 %v5450_v2, %v2827_v8  ;;  %v5289_v7 = vld [vmem:[%s7015_s12 + $0x124] ss:$8 sps:$4 sm:$0xff]   ;;  %v5287_v2 = vld [vmem:[%s7015_s12 + $0x120] ss:$8 sps:$4 sm:$0xff]  }
0x10bd   :  { %v5452_v21 = vpop.eup %5451 }
0x10be   :  { %v2839_v22 = vmul.f32 %v5452_v21, %v2829_v17  ;;  %v2860_v9 = vmul.f32 %v2851_v11, %v2836_v18  ;;  %v2838_v25 = vmul.f32 %v5452_v21, %v2828_v16  ;;  %v2859_v24 = vmul.f32 %v2847_v27, %v2835_v20  ;;  %v5295_v16 = vld [vmem:[%s7015_s12 + $0x144] ss:$8 sps:$4 sm:$0xff]   ;;  %v5293_v17 = vld [vmem:[%s7015_s12 + $0x140] ss:$8 sps:$4 sm:$0xff]   ;;  %v5298_v18 = vld [vmem:[%s7015_s12 + $0x154] ss:$8 sps:$4 sm:$0xff]  }
0x10bf   :  { %v2840_v15 = vmul.f32 %v5452_v21, %v2830_v12  ;;  %v5296_v20 = vld [vmem:[%s7015_s12 + $0x150] ss:$8 sps:$4 sm:$0xff]   ;;  %v5301_v21 = vld [vmem:[%s7015_s12 + $0x164] ss:$8 sps:$4 sm:$0xff]  }
0x10c0   :  { %v2863_v28 = vmul.f32 %v2851_v11, %v2839_v22  ;;  %v2884_v31 = vadd.f32 %v2875_v13, %v2860_v9  ;;  %v2862_v30 = vmul.f32 %v2847_v27, %v2838_v25  ;;  %v2883_v32 = vadd.f32 %v2871_v14, %v2859_v24  ;;  %v5299_v25 = vld [vmem:[%s7015_s12 + $0x160] ss:$8 sps:$4 sm:$0xff]   ;;  %v5304_v24 = vld [vmem:[%s7015_s12 + $0x174] ss:$8 sps:$4 sm:$0xff]   ;;  %v5343_v12 = vld [vmem:[%s7017_s27 + $0x4] ss:$8 sps:$4 sm:$0xff]  }
0x10c1   :  { %v2864_v55 = vmul.f32 %v2855_v51, %v2840_v15  ;;  %v2861_v27 = vmul.f32 %v2855_v51, %v2837_v52 }
0x10c2   :  { %v2887_v33 = vadd.f32 %v2875_v13, %v2863_v28  ;;  %v2896_v1 = vmul.f32 0.70710677, %v2884_v31  ;;  %v2886_v35 = vadd.f32 %v2871_v14, %v2862_v30  ;;  %v2895_v36 = vmul.f32 0.70710677, %v2883_v32  ;;  %v5290_v14 = vld [vmem:[%s7015_s12 + $0x130] ss:$8 sps:$4 sm:$0xff]  }
0x10c3   :  { %v2890_v44 = vmul.f32 0.5, %v2884_v31  ;;  %v2889_v6 = vmul.f32 0.5, %v2883_v32  ;;  %v2888_v29 = vadd.f32 %v2879_v58, %v2864_v55  ;;  %v2885_v11 = vadd.f32 %v2879_v58, %v2861_v27  ;;  %v5302_v32 = vld [vmem:[%s7015_s12 + $0x170] ss:$8 sps:$4 sm:$0xff]   ;;  %v5355_v55 = vld [vmem:[%s7017_s27 + $0x44] ss:$8 sps:$4 sm:$0xff]  }
0x10c4   :  { %v2899_v38 = vmul.f32 0.70710677, %v2887_v33  ;;  %5453 = verf.f32 %v2896_v1  ;;  %v2898_v34 = vmul.f32 0.70710677, %v2886_v35  ;;  %v2893_v45 = vmul.f32 0.5, %v2887_v33 }
0x10c5   :  { %5455 = verf.f32 %v2895_v36  ;;  %v2892_v49 = vmul.f32 0.5, %v2886_v35  ;;  %v2900_v13 = vmul.f32 0.70710677, %v2888_v29  ;;  %v2897_v26 = vmul.f32 0.70710677, %v2885_v11 }
0x10c6   :  { %5457 = verf.f32 %v2899_v38  ;;  %v2894_v31 = vmul.f32 0.5, %v2888_v29  ;;  %v2891_v33 = vmul.f32 0.5, %v2885_v11  ;;  %v5337_v38 = vld [vmem:[%s7016_s6 + $0xa4] ss:$8 sps:$4 sm:$0xff]   ;;  %v5356_v58 = vld [vmem:[%s7017_s27 + $0x50] ss:$8 sps:$4 sm:$0xff]  }
0x10c7   :  { %5459 = verf.f32 %v2898_v34  ;;  %v5335_v34 = vld [vmem:[%s7016_s6 + $0xa0] ss:$8 sps:$4 sm:$0xff]   ;;  %3495 = vmatprep.subr.bf16.mxu0 %v5337_v38  ;;  %v5361_v27 = vld [vmem:[%s7017_s27 + $0x64] ss:$8 sps:$4 sm:$0xff]   ;;  %v5364_v29 = vld [vmem:[%s7017_s27 + $0x74] ss:$8 sps:$4 sm:$0xff]  }
0x10c8   :  { %5461 = verf.f32 %v2900_v13  ;;  %3496 = vmatpush1.bf16.msra.mxu0 %v5335_v34  ;;  %v5367_v11 = vld [vmem:[%s7017_s27 + $0x84] ss:$8 sps:$4 sm:$0xff]   ;;  %v5370_v13 = vld [vmem:[%s7017_s27 + $0x94] ss:$8 sps:$4 sm:$0xff]  }
0x10c9   :  { %5463 = verf.f32 %v2897_v26  ;;  %v5371_v26 = vld [vmem:[%s7017_s27 + $0xa0] ss:$8 sps:$4 sm:$0xff]   ;;  %v5379_v38 = vld [vmem:[%s7018_s18 + $0x10] sm:$0xff]   ;;  %v5380_v34 = vld [vmem:[%s7018_s18 + $0x18] sm:$0xff]  }
0x10ce   :  { %v5454_v39 = vpop.eup %5453 }
0x10cf   :  { %v5456_v40 = vpop.eup %5455  ;;  %v2908_v10 = vadd.f32 1.0, %v5454_v39  ;;  %v5338_v39 = vld [vmem:[%s7016_s6 + $0xb0] ss:$8 sps:$4 sm:$0xff]  }
0x10d0   :  { %v5458_v23 = vpop.eup %5457  ;;  %v2907_v42 = vadd.f32 1.0, %v5456_v40  ;;  %v5340_v40 = vld [vmem:[%s7016_s6 + $0xb4] ss:$8 sps:$4 sm:$0xff]  }
0x10d1   :  { %v5460_v43 = vpop.eup %5459  ;;  %v2911_v47 = vadd.f32 1.0, %v5458_v23  ;;  %v2914_v41 = vmul.f32 %v2908_v10, %v2890_v44  ;;  %3497 = vmatprep.subr.bf16.mxu0 %v5340_v40  ;;  %v2971_v10 = vld [vmem:[#allocation23 + $0x3] ss:$8 sm:$0x3] }
0x10d2   :  { %v2910_v50 = vadd.f32 1.0, %v5460_v43  ;;  %v2913_v53 = vmul.f32 %v2907_v42, %v2889_v6  ;;  %v5462_v22 = vpop.eup %5461  ;;  %3498 = vmatpush1.bf16.msra.mxu0 %v5338_v39  ;;  %v2980_v23 = vrot.slane %v2971_v10, %v6568_v5  ;;  %v2976_v8 = vrot.slane %v2971_v10, %v6571_v4  ;;  %v3545_v39 = vld [vmem:[#allocation23 + $0x5] ss:$8 sm:$0x3] }
0x10d3   :  { %v2917_v48 = vmul.f32 %v2911_v47, %v2893_v45  ;;  %v5464_v9 = vpop.eup %5463  ;;  %v2912_v28 = vadd.f32 1.0, %v5462_v22  ;;  %3680 = vmatprep.subr.bf16.mxu0 %v5343_v12  ;;  %v3550_v40 = vrot.slane %v3545_v39, %v6571_v4  ;;  %v3554_v12 = vrot.slane %v3545_v39, %v6568_v5 }
0x10d4   :  { %v2916_v37 = vmul.f32 %v2910_v50, %v2892_v49  ;;  %v2909_v30 = vadd.f32 1.0, %v5464_v9 }
0x10d5   :  { %v2920_v46 = vpack.c.bf16 %v2917_v48, %v2914_v41  ;;  %v2918_v1 = vmul.f32 %v2912_v28, %v2894_v31 }
0x10d6   :  { %v2919_v56 = vpack.c.bf16 %v2916_v37, %v2913_v53  ;;  %v2915_v35 = vmul.f32 %v2909_v30, %v2891_v33  ;;  %v5341_v53 = vld [vmem:[%s7017_s27] ss:$8 sps:$4 sm:$0xff]   ;;  %v5346_v37 = vld [vmem:[%s7017_s27 + $0x14] ss:$8 sps:$4 sm:$0xff]  }
0x10d7   :  { %3255 = vmatprep.mubr.bf16.mxu1 %v2920_v46  ;;  %v5352_v46 = vld [vmem:[%s7017_s27 + $0x34] ss:$8 sps:$4 sm:$0xff]  }
0x10d8   :  { %3256 = vmatmul.mubr.bf16.vlgmr.msra.gmra.mrb[36].mxu1 %v2919_v56  ;;  %v2921_v36 = vpack.c.bf16 %v2918_v1, %v2915_v35  ;;  %v5353_v56 = vld [vmem:[%s7017_s27 + $0x40] ss:$8 sps:$4 sm:$0xff]  }
0x10d9   :  { %3267 = vmatpush1.bf16.msra.mxu1 %v5281_v54  ;;  %3298 = vmatprep.mubr.bf16.mxu1 %v5913_v60  ;;  %v5350_v54 = vld [vmem:[%s7017_s27 + $0x30] ss:$8 sps:$4 sm:$0xff]   ;;  %v5377_v35 = vld [vmem:[%s7018_s18] sm:$0xff]  }
0x10da   :  { %3268 = vmatprep.subr.bf16.mxu1 %v5286_v57  ;;  %v5358_v57 = vld [vmem:[%s7017_s27 + $0x54] ss:$8 sps:$4 sm:$0xff]  }
0x10dd   :  { %3269 = vmatpush1.bf16.msra.mxu1 %v5284_v59  ;;  %v5359_v59 = vld [vmem:[%s7017_s27 + $0x60] ss:$8 sps:$4 sm:$0xff]  }
0x10de   :  { %3270 = vmatprep.subr.bf16.mxu1 %v5289_v7  ;;  %v5362_v7 = vld [vmem:[%s7017_s27 + $0x70] ss:$8 sps:$4 sm:$0xff]  }
0x10e1   :  { %3271 = vmatpush1.bf16.msra.mxu1 %v5287_v2  ;;  %v5365_v2 = vld [vmem:[%s7017_s27 + $0x80] ss:$8 sps:$4 sm:$0xff]  }
0x10e2   :  { %3272 = vmatprep.subr.bf16.mxu1 %v5292_v19  ;;  %v5368_v19 = vld [vmem:[%s7017_s27 + $0x90] ss:$8 sps:$4 sm:$0xff]  }
0x10e5   :  { %3273 = vmatpush1.bf16.msra.mxu1 %v5290_v14  ;;  %v5373_v14 = vld [vmem:[%s7017_s27 + $0xa4] ss:$8 sps:$4 sm:$0xff]  }
0x10e6   :  { %3274 = vmatprep.subr.bf16.mxu1 %v5295_v16  ;;  %v5374_v16 = vld [vmem:[%s7017_s27 + $0xb0] ss:$8 sps:$4 sm:$0xff]  }
0x10e9   :  { %3275 = vmatpush1.bf16.msra.mxu1 %v5293_v17  ;;  %v5376_v17 = vld [vmem:[%s7017_s27 + $0xb4] ss:$8 sps:$4 sm:$0xff]  }
0x10ea   :  { %3276 = vmatprep.subr.bf16.mxu1 %v5298_v18  ;;  %v3340_v18 = vld [vmem:[#allocation23 + $0x4] ss:$8 sm:$0x3] }
0x10eb   :  { %v3349_v22 = vrot.slane %v3340_v18, %v6568_v5 }
0x10ed   :  { %3277 = vmatpush1.bf16.msra.mxu1 %v5296_v20  ;;  %v3345_v20 = vrot.slane %v3340_v18, %v6571_v4 }
0x10ee   :  { %3278 = vmatprep.subr.bf16.mxu1 %v5301_v21 }
0x10f1   :  { %3279 = vmatpush1.bf16.msra.mxu1 %v5299_v25 }
0x10f2   :  { %3280 = vmatprep.subr.bf16.mxu1 %v5304_v24 }
0x10f5   :  { %3281 = vmatpush1.bf16.msra.mxu1 %v5302_v32 }
0x10f6   :  { %3909 = vmatprep.subr.bf16.mxu1 %v5913_v60 }
0x10f8   :  { %3299 = vmatmul.mubr.bf16.vlgmr.msra.gmra.mrb[36].mxu1 %v2921_v36  ;;  %v5378_v36 = vld [vmem:[%s7018_s18 + $0x8] sm:$0xff]  }
0x10f9   :  { %3910 = vmatpush1.bf16.msra.mxu1 %v5377_v35 }
0x10fa   :  { %3911 = vmatprep.subr.bf16.mxu1 %v5913_v60 }
0x10fd   :  { %3912 = vmatpush1.bf16.msra.mxu1 %v5378_v36 }
0x10fe   :  { %3913 = vmatprep.subr.bf16.mxu1 %v5913_v60 }
0x1101   :  { %3914 = vmatpush1.bf16.msra.mxu1 %v5379_v38 }
0x1102   :  { %3915 = vmatprep.subr.bf16.mxu1 %v5913_v60 }
0x1105   :  { %3916 = vmatpush1.bf16.msra.mxu1 %v5380_v34 }
0x1106   :  { %3917 = vmatprep.subr.bf16.mxu1 %v5913_v60 }
0x11cb   :  { %v3300_v42 = vpop.f32.mrb[36].mxu1 }
0x11cc   :  { %v3302_v43 = vpop.f32.mrb[37].mxu1  ;;  %v5007_v47 = vadd.f32 %v3300_v42, %v2976_v8 }
0x11cd   :  { %v5008_v44 = vadd.f32 %v3302_v43, %v2980_v23  ;;  %v3304_v45 = vpop.f32.mrb[38].mxu1 }
0x11ce   :  { %v5009_v15 = vadd.f32 %v3304_v45, %v2976_v8  ;;  %v3306_v6 = vpop.f32.mrb[39].mxu1  ;;  %v6810_v48 = vadd.f32 %v5007_v47, %v6658_v63  ;;  %v5347_v63 = vld [vmem:[%s7017_s27 + $0x20] ss:$8 sps:$4 sm:$0xff]  }
0x11cf   :  { %v5010_v49 = vadd.f32 %v3306_v6, %v2980_v23  ;;  %v6804_v51 = vadd.f32 %v5008_v44, %v6654_v61  ;;  %v5344_v61 = vld [vmem:[%s7017_s27 + $0x10] ss:$8 sps:$4 sm:$0xff]  }
0x11d0   :  { %v6801_v50 = vadd.f32 %v5009_v15, %v6660_v3 }
0x11d1   :  { %v6807_v41 = vadd.f32 %v5010_v49, %v6656_v62  ;;  %v5349_v62 = vld [vmem:[%s7017_s27 + $0x24] ss:$8 sps:$4 sm:$0xff]  }
0x11d2   :  { %v3313_v3 = vpack.c.bf16 %v6801_v50, %v6810_v48 }
0x11d3   :  { %v3314_v52 = vpack.c.bf16 %v6807_v41, %v6804_v51 }
0x11d5   :  { %4613 = vmatprep.mubr.msk.bf16.mxu0 %vm626_vm2, %v3314_v52 }
0x11d6   :  { %3508 = vmatmul.mubr.bf16.vlgmr.msra.gmra.mrb[44].mxu0 %v3313_v3 }
0x11d7   :  { %3681 = vmatpush1.bf16.msra.mxu0 %v5341_v53 }
0x11d8   :  { %3682 = vmatprep.subr.bf16.mxu0 %v5346_v37 }
0x11db   :  { %3683 = vmatpush1.bf16.msra.mxu0 %v5344_v61 }
0x11dc   :  { %3684 = vmatprep.subr.bf16.mxu0 %v5349_v62 }
0x11df   :  { %3685 = vmatpush1.bf16.msra.mxu0 %v5347_v63 }
0x11e0   :  { %3686 = vmatprep.subr.bf16.mxu0 %v5352_v46 }
0x11e3   :  { %3687 = vmatpush1.bf16.msra.mxu0 %v5350_v54 }
0x11e4   :  { %3688 = vmatprep.subr.bf16.mxu0 %v5355_v55  ;;  %v5381_v55 = vld [vmem:[%s7018_s18 + $0x20] sm:$0xff]  }
0x11e5   :  { %3918 = vmatpush1.bf16.msra.mxu1 %v5381_v55  ;;  %v5389_v55 = vld [vmem:[%s7019_s22] sm:$0xff]  }
0x11e6   :  { %3919 = vmatprep.subr.bf16.mxu1 %v5913_v60 }
0x11e7   :  { %3689 = vmatpush1.bf16.msra.mxu0 %v5353_v56  ;;  %v5382_v56 = vld [vmem:[%s7018_s18 + $0x28] sm:$0xff]  }
0x11e8   :  { %3690 = vmatprep.subr.bf16.mxu0 %v5358_v57  ;;  %v5383_v57 = vld [vmem:[%s7018_s18 + $0x30] sm:$0xff]  }
0x11e9   :  { %3920 = vmatpush1.bf16.msra.mxu1 %v5382_v56  ;;  %v5390_v56 = vld [vmem:[%s7019_s22 + $0x8] sm:$0xff]  }
0x11ea   :  { %3921 = vmatprep.subr.bf16.mxu1 %v5913_v60 }
0x11eb   :  { %3691 = vmatpush1.bf16.msra.mxu0 %v5356_v58  ;;  %v5384_v58 = vld [vmem:[%s7018_s18 + $0x38] sm:$0xff]  }
0x11ec   :  { %3692 = vmatprep.subr.bf16.mxu0 %v5361_v27  ;;  %v5385_v27 = vld [vmem:[%s7018_s18 + $0x40] sm:$0xff]  }
0x11ed   :  { %3922 = vmatpush1.bf16.msra.mxu1 %v5383_v57  ;;  %v5391_v57 = vld [vmem:[%s7019_s22 + $0x10] sm:$0xff]  }
0x11ee   :  { %3923 = vmatprep.subr.bf16.mxu1 %v5913_v60 }
0x11ef   :  { %3693 = vmatpush1.bf16.msra.mxu0 %v5359_v59  ;;  %v5386_v59 = vld [vmem:[%s7018_s18 + $0x48] sm:$0xff]  }
0x11f0   :  { %3694 = vmatprep.subr.bf16.mxu0 %v5364_v29  ;;  %v5387_v29 = vld [vmem:[%s7018_s18 + $0x50] sm:$0xff]  }
0x11f1   :  { %3924 = vmatpush1.bf16.msra.mxu1 %v5384_v58  ;;  %v5392_v58 = vld [vmem:[%s7019_s22 + $0x18] sm:$0xff]  }
0x11f2   :  { %3925 = vmatprep.subr.bf16.mxu1 %v5913_v60 }
0x11f3   :  { %3695 = vmatpush1.bf16.msra.mxu0 %v5362_v7  ;;  %v5388_v7 = vld [vmem:[%s7018_s18 + $0x58] sm:$0xff]  }
0x11f4   :  { %3696 = vmatprep.subr.bf16.mxu0 %v5367_v11 }
0x11f5   :  { %3926 = vmatpush1.bf16.msra.mxu1 %v5385_v27  ;;  %v5393_v27 = vld [vmem:[%s7019_s22 + $0x20] sm:$0xff]  }
0x11f6   :  { %3927 = vmatprep.subr.bf16.mxu1 %v5913_v60 }
0x11f7   :  { %3697 = vmatpush1.bf16.msra.mxu0 %v5365_v2 }
0x11f8   :  { %3698 = vmatprep.subr.bf16.mxu0 %v5370_v13 }
0x11f9   :  { %3928 = vmatpush1.bf16.msra.mxu1 %v5386_v59  ;;  %v5394_v59 = vld [vmem:[%s7019_s22 + $0x28] sm:$0xff]  }
0x11fa   :  { %3929 = vmatprep.subr.bf16.mxu1 %v5913_v60 }
0x11fb   :  { %3699 = vmatpush1.bf16.msra.mxu0 %v5368_v19 }
0x11fc   :  { %3700 = vmatprep.subr.bf16.mxu0 %v5373_v14 }
0x11fd   :  { %3930 = vmatpush1.bf16.msra.mxu1 %v5387_v29  ;;  %v5395_v29 = vld [vmem:[%s7020_s11] sm:$0xff]  }
0x11fe   :  { %3931 = vmatprep.subr.bf16.mxu1 %v5913_v60 }
0x11ff   :  { %3701 = vmatpush1.bf16.msra.mxu0 %v5371_v26 }
0x1200   :  { %3702 = vmatprep.subr.bf16.mxu0 %v5376_v17 }
0x1201   :  { %3932 = vmatpush1.bf16.msra.mxu1 %v5388_v7 }
0x1202   :  { %4983 = vmatprep.subr.bf16.mxu1 %v5911_v0 }
0x1203   :  { %3703 = vmatpush1.bf16.msra.mxu0 %v5374_v16 }
0x1204   :  { %4967 = vmatprep.subr.bf16.mxu0 %v5911_v0 }
0x12a9   :  { %v3509_v21 = vpop.f32.mrb[44].mxu0 }
0x12aa   :  { %v3511_v9 = vpop.f32.mrb[45].mxu0  ;;  %v3510_v24 = vadd.f32 %v3509_v21, %v3345_v20 }
0x12ab   :  { %v3513_v25 = vpop.f32.mrb[46].mxu0  ;;  %v3512_v30 = vadd.f32 %v3511_v9, %v3349_v22 }
0x12ac   :  { %v3514_v28 = vadd.f32 %v3513_v25, %v3345_v20  ;;  %v3515_v31 = vpop.f32.mrb[47].mxu0 }
0x12ad   :  { %v3516_v32 = vadd.f32 %v3515_v31, %v3349_v22 }
0x12ae   :  { %v3518_v33 = vpack.c.bf16 %v3514_v28, %v3510_v24  ;;  %v3770_v28 = vld [vmem:[#allocation23 + $0x6] ss:$8 sm:$0x3] }
0x12af   :  { %v3519_v1 = vpack.c.bf16 %v3516_v32, %v3512_v30  ;;  %v3779_v32 = vrot.slane %v3770_v28, %v6568_v5 }
0x12b1   :  { %4638 = vmatprep.mubr.msk.bf16.mxu0 %vm626_vm2, %v3519_v1  ;;  %v3775_v1 = vrot.slane %v3770_v28, %v6571_v4 }
0x12b2   :  { %3713 = vmatmul.mubr.bf16.vlgmr.msra.gmra.mrb[48].mxu0 %v3518_v33  ;;  %v3787_v33 = vld [vmem:[#allocation23 + $0x7] ss:$8 sm:$0x3] }
0x12b3   :  { %4979 = vmatprep.mubr.msk.bf16.mxu0 %vm5912_vm0, %v5911_v0  ;;  %4968 = vmatpush3.bf16.msra.mxu0 %v5389_v55 }
0x12b4   :  { %4969 = vmatprep.subr.bf16.mxu0 %v5911_v0 }
0x12b7   :  { %4970 = vmatpush3.bf16.msra.mxu0 %v5390_v56 }
0x12b8   :  { %4971 = vmatprep.subr.bf16.mxu0 %v5911_v0 }
0x12bb   :  { %4972 = vmatpush3.bf16.msra.mxu0 %v5391_v57 }
0x12bc   :  { %4973 = vmatprep.subr.bf16.mxu0 %v5911_v0 }
0x12bf   :  { %4974 = vmatpush3.bf16.msra.mxu0 %v5392_v58 }
0x12c0   :  { %4975 = vmatprep.subr.bf16.mxu0 %v5911_v0 }
0x12c3   :  { %4976 = vmatpush3.bf16.msra.mxu0 %v5393_v27 }
0x12c4   :  { %4977 = vmatprep.subr.bf16.mxu0 %v5911_v0 }
0x12c7   :  { %4978 = vmatpush3.bf16.msra.mxu0 %v5394_v59 }
0x1385   :  { %v3714_v10 = vpop.f32.mrb[48].mxu0 }
0x1386   :  { %v3715_v23 = vadd.f32 %v3714_v10, %v3550_v40  ;;  %v3716_v8 = vpop.f32.mrb[49].mxu0  ;;  %v3792_v10 = vrot.slane %v3787_v33, %v6571_v4 }
0x1387   :  { %v3717_v42 = vadd.f32 %v3716_v8, %v3554_v12  ;;  %v3718_v43 = vpop.f32.mrb[50].mxu0 }
0x1388   :  { %v3719_v44 = vadd.f32 %v3718_v43, %v3550_v40  ;;  %v3720_v45 = vpop.f32.mrb[51].mxu0  ;;  %v6860_v6 = vadd.f32 %v3715_v23, %v6810_v48 }
0x1389   :  { %v6857_v47 = vadd.f32 %v3717_v42, %v6804_v51  ;;  %v3721_v15 = vadd.f32 %v3720_v45, %v3554_v12  ;;  %v3796_v12 = vrot.slane %v3787_v33, %v6568_v5  ;;  %v4639_v5 = vld [vmem:[%s6103_s25] ss:$0 sm:$0xff] }
0x138a   :  { %v6870_v3 = vadd.f32 %v3719_v44, %v6801_v50  ;;  %v3737_v62 = vmul.f32 %v6860_v6, %v6860_v6 }
0x138b   :  { %v6863_v49 = vadd.f32 %v3721_v15, %v6807_v41  ;;  %v3727_v52 = vsel %vm626_vm2, %v6857_v47, 0.0  ;;  %v3738_v53 = vmul.f32 %v6857_v47, %v6857_v47 }
0x138c   :  { %v3728_v51 = vadd.f32 %v3727_v52, %v6860_v6  ;;  %v3739_v46 = vmul.f32 %v6870_v3, %v6870_v3 }
0x138d   :  { %v3731_v37 = vsel %vm626_vm2, %v6863_v49, 0.0  ;;  %v3741_v48 = vsel %vm626_vm2, %v3738_v53, 0.0  ;;  %v3740_v41 = vmul.f32 %v6863_v49, %v6863_v49 }
0x138e   :  { %3729 = vadd.xlane.f32.xlu0 %v3728_v51  ;;  %v3732_v61 = vadd.f32 %v3731_v37, %v6870_v3  ;;  %v3742_v63 = vadd.f32 %v3741_v48, %v3737_v62 }
0x138f   :  { %v3745_v50 = vsel %vm626_vm2, %v3740_v41, 0.0 }
0x1390   :  { %3733 = vadd.xlane.f32.xlu1 %v3732_v61  ;;  %v3746_v54 = vadd.f32 %v3745_v50, %v3739_v46 }
0x1392   :  { %3743 = vadd.xlane.f32.xlu0 %v3742_v63 }
0x1394   :  { %3747 = vadd.xlane.f32.xlu1 %v3746_v54 }
0x141b   :  { %v3730_v11 = vpop.xlane.xlu0 %3729 }
0x141c   :  { %v3735_v2 = vmul.f32 0.0052083335, %v3730_v11 }
0x141d   :  { %v3734_v13 = vpop.xlane.xlu1 %3733 }
0x141e   :  { %v3736_v19 = vmul.f32 0.0052083335, %v3734_v13  ;;  %v3751_v14 = vmul.f32 %v3735_v2, %v3735_v2  ;;  %v3757_v31 = vsub.f32 %v6860_v6, %v3735_v2  ;;  %v3758_v30 = vsub.f32 %v6857_v47, %v3735_v2 }
0x141f   :  { %v3744_v26 = vpop.xlane.xlu0 %3743 }
0x1420   :  { %v3749_v16 = vmul.f32 0.0052083335, %v3744_v26  ;;  %v3752_v20 = vmul.f32 %v3736_v19, %v3736_v19  ;;  %v3759_v36 = vsub.f32 %v6870_v3, %v3736_v19  ;;  %v3760_v38 = vsub.f32 %v6863_v49, %v3736_v19 }
0x1421   :  { %v3748_v17 = vpop.xlane.xlu1 %3747 }
0x1422   :  { %v3753_v18 = vsub.f32 %v3749_v16, %v3751_v14  ;;  %v3750_v21 = vmul.f32 0.0052083335, %v3748_v17 }
0x1424   :  { %v3755_v22 = vmax.f32 %v3753_v18, 0.0  ;;  %v3754_v9 = vsub.f32 %v3750_v21, %v3752_v20 }
0x1426   :  { %v3761_v25 = vadd.f32 1e-05, %v3755_v22  ;;  %v3756_v24 = vmax.f32 %v3754_v9, 0.0 }
0x1428   :  { %5465 = vrsqrt.f32 %v3761_v25  ;;  %v3762_v60 = vadd.f32 1e-05, %v3756_v24 }
0x142a   :  { %5467 = vrsqrt.f32 %v3762_v60 }
0x1432   :  { %v5466_v35 = vpop.eup %5465 }
0x1433   :  { %v3766_v34 = vmul.f32 %v5466_v35, %v3758_v30  ;;  %v3765_v39 = vmul.f32 %v5466_v35, %v3757_v31  ;;  %v4653_v31 = vld [vmem:[%s6103_s25 + $0x1] ss:$0 sm:$0xff] }
0x1434   :  { %v5468_v40 = vpop.eup %5467 }
0x1435   :  { %v3768_v23 = vmul.f32 %v5468_v40, %v3760_v38  ;;  %v3783_v8 = vmul.f32 %v3779_v32, %v3766_v34  ;;  %v3767_v42 = vmul.f32 %v5468_v40, %v3759_v36  ;;  %v3782_v43 = vmul.f32 %v3775_v1, %v3765_v39 }
0x1437   :  { %v3785_v44 = vmul.f32 %v3779_v32, %v3768_v23  ;;  %v3784_v45 = vmul.f32 %v3775_v1, %v3767_v42  ;;  %v3800_v47 = vadd.f32 %v3796_v12, %v3783_v8  ;;  %v3799_v6 = vadd.f32 %v3792_v10, %v3782_v43  ;;  %v4654_v1 = vld [vmem:[%s6103_s25 + $0x2] ss:$0 sm:$0xff]  ;;  %s7021_s25 = sld [smem:[#allocation53_spill]] }
0x1439   :  { %v3802_v15 = vadd.f32 %v3796_v12, %v3785_v44  ;;  %v3801_v52 = vadd.f32 %v3792_v10, %v3784_v45 }
0x143b   :  { %v3804_v53 = vpack.c.bf16 %v3802_v15, %v3800_v47  ;;  %v3803_v49 = vpack.c.bf16 %v3801_v52, %v3799_v6  ;;  %v5396_v6 = vld [vmem:[%s7020_s11 + $0x8] sm:$0xff]  }
0x143c   :  { %v4655_v52 = vld [vmem:[#allocation22 + $0x8] ss:$0 sm:$0xff] }
0x143d   :  { %4652 = vmatprep.mubr.msk.bf16.mxu1 %vm626_vm2, %v3804_v53  ;;  %v5397_v59 = vld [vmem:[%s7021_s25] sm:$0xff]  }
0x143e   :  { %3942 = vmatmul.mubr.bf16.vlgmr.msra.gmra.mrb[40].mxu1 %v3803_v49 }
0x143f   :  { %4987 = vmatprep.mubr.msk.bf16.mxu1 %vm5912_vm0, %v5911_v0  ;;  %4984 = vmatpush3.bf16.msra.mxu1 %v5395_v29  ;;  %v5398_v29 = vld [vmem:[%s7021_s25 + $0x8] sm:$0xff]  }
0x1440   :  { %4985 = vmatprep.subr.bf16.mxu1 %v5911_v0 }
0x1443   :  { %4986 = vmatpush3.bf16.msra.mxu1 %v5396_v6 }
0x1444   :  { %4991 = vmatprep.subr.bf16.mxu1 %v5911_v0 }
0x1511   :  { %v3943_v4 = vpop.f32.mrb[40].mxu1 }
0x1512   :  { %v3944_v3 = vadd.f32 %v4639_v5, %v3943_v4  ;;  %v3945_v51 = vpop.f32.mrb[41].mxu1 }
0x1513   :  { %v3946_v37 = vpop.f32.mrb[42].mxu1 }
0x1514   :  { %v3947_v48 = vadd.f32 %v4639_v5, %v3946_v37  ;;  %v3948_v41 = vpop.f32.mrb[43].mxu1  ;;  %v3951_v61 = vsel %vm3950_vm3, %v3944_v3, 0.0  ;;  %v3960_v62 = vmul.f32 %v3944_v3, %v3944_v3 }
0x1515   :  { %3952 = vadd.xlane.f32.xlu0 %v3951_v61 }
0x1516   :  { %v3954_v50 = vsel %vm3950_vm3, %v3947_v48, 0.0  ;;  %v3961_v63 = vmul.f32 %v3947_v48, %v3947_v48  ;;  %v3962_v46 = vsel %vm3950_vm3, %v3960_v62, 0.0 }
0x1517   :  { %3955 = vadd.xlane.f32.xlu1 %v3954_v50 }
0x1518   :  { %v3965_v54 = vsel %vm3950_vm3, %v3961_v63, 0.0 }
0x1519   :  { %3963 = vadd.xlane.f32.xlu0 %v3962_v46 }
0x151b   :  { %3966 = vadd.xlane.f32.xlu1 %v3965_v54 }
0x15a2   :  { %v3953_v7 = vpop.xlane.xlu0 %3952 }
0x15a3   :  { %v3958_v11 = vmul.f32 0.010416667, %v3953_v7  ;;  %v5399_v7 = vld [vmem:[%s7021_s25 + $0x10] sm:$0xff]  }
0x15a4   :  { %v3956_v2 = vpop.xlane.xlu1 %3955 }
0x15a5   :  { %v3959_v13 = vmul.f32 0.010416667, %v3956_v2  ;;  %v3970_v26 = vmul.f32 %v3958_v11, %v3958_v11  ;;  %v3976_v60 = vsub.f32 %v3944_v3, %v3958_v11  ;;  %v5400_v11 = vld [vmem:[%s7021_s25 + $0x18] sm:$0xff]  }
0x15a6   :  { %v3964_v19 = vpop.xlane.xlu0 %3963 }
0x15a7   :  { %v3968_v14 = vmul.f32 0.010416667, %v3964_v19  ;;  %v3971_v17 = vmul.f32 %v3959_v13, %v3959_v13  ;;  %v3977_v30 = vsub.f32 %v3947_v48, %v3959_v13  ;;  %v4663_v48 = vld [vmem:[%s7005_s23 + $0xa] ss:$0 sm:$0xff] }
0x15a8   :  { %v3967_v16 = vpop.xlane.xlu1 %3966 }
0x15a9   :  { %v3972_v18 = vsub.f32 %v3968_v14, %v3970_v26  ;;  %v3969_v20 = vmul.f32 0.010416667, %v3967_v16 }
0x15ab   :  { %v3974_v21 = vmax.f32 %v3972_v18, 0.0  ;;  %v3973_v22 = vsub.f32 %v3969_v20, %v3971_v17 }
0x15ad   :  { %v3978_v9 = vadd.f32 1e-05, %v3974_v21  ;;  %v3975_v25 = vmax.f32 %v3973_v22, 0.0 }
0x15af   :  { %5469 = vrsqrt.f32 %v3978_v9  ;;  %v3979_v24 = vadd.f32 1e-05, %v3975_v25 }
0x15b1   :  { %5471 = vrsqrt.f32 %v3979_v24 }
0x15b9   :  { %v5470_v28 = vpop.eup %5469 }
0x15ba   :  { %v3982_v32 = vmul.f32 %v5470_v28, %v3976_v60 }
0x15bb   :  { %v5472_v33 = vpop.eup %5471 }
0x15bc   :  { %v3989_v35 = vmul.f32 %v4653_v31, %v3982_v32  ;;  %v3983_v36 = vmul.f32 %v5472_v33, %v3977_v30  ;;  %v4667_v30 = vld [vmem:[%s7005_s23 + $0xb] ss:$0 sm:$0xff] }
0x15be   :  { %v3990_v38 = vmul.f32 %v4653_v31, %v3983_v36  ;;  %v3996_v34 = vadd.f32 %v4654_v1, %v3989_v35  ;;  %v4668_v35 = vld [vmem:[%s7005_s23 + $0xc] ss:$0 sm:$0xff] }
0x15c0   :  { %v3997_v39 = vadd.f32 %v4654_v1, %v3990_v38  ;;  %v4000_v40 = vmul.f32 0.70710677, %v3996_v34  ;;  %v3998_v42 = vmul.f32 0.5, %v3996_v34 }
0x15c2   :  { %v4001_v12 = vmul.f32 0.70710677, %v3997_v39  ;;  %5473 = verf.f32 %v4000_v40  ;;  %v3999_v43 = vmul.f32 0.5, %v3997_v39 }
0x15c4   :  { %5475 = verf.f32 %v4001_v12 }
0x15cc   :  { %v5474_v10 = vpop.eup %5473 }
0x15cd   :  { %v4004_v23 = vadd.f32 1.0, %v5474_v10 }
0x15ce   :  { %v5476_v8 = vpop.eup %5475 }
0x15cf   :  { %v4005_v44 = vadd.f32 1.0, %v5476_v8  ;;  %v4006_v45 = vmul.f32 %v4004_v23, %v3998_v42 }
0x15d1   :  { %v4007_v47 = vmul.f32 %v4005_v44, %v3999_v43 }
0x15d3   :  { %v4008_v15 = vpack.c.bf16 %v4007_v47, %v4006_v45 }
0x15d5   :  { %4980 = vmatmul.mubr.msk.bf16.vlgmr.msra.gmra.mrb[52].mxu0 %vm3950_vm3, %v4008_v15 }
0x16a8   :  { %v4099_v53 = vpop.f32.mrb[52].mxu0 }
0x16a9   :  { %v4981_v49 = vpop.f32.mrb[53].mxu0  ;;  %v4100_v4 = vadd.f32 %v4655_v52, %v4099_v53 }
0x16aa   :  { %v4102_v5 = vpop.f32.mrb[54].mxu0 }
0x16ab   :  { %v4103_v3 = vadd.f32 %v4655_v52, %v4102_v5  ;;  %v4982_v51 = vpop.f32.mrb[55].mxu0  ;;  %v4669_v52 = vld [vmem:[#allocation22 + $0x9] ss:$0 sm:$0xff] }
0x16ad   :  { %v4106_v37 = vpack.c.bf16 %v4103_v3, %v4100_v4 }
0x16af   :  { %4988 = vmatmul.mubr.msk.bf16.vlgmr.msra.gmra.mrb[44].mxu1 %vm379_vm1, %v4106_v37 }
0x16b0   :  { %4999 = vmatprep.mubr.msk.bf16.mxu1 %vm5912_vm0, %v5911_v0  ;;  %4992 = vmatpush3.bf16.msra.mxu1 %v5397_v59 }
0x16b1   :  { %4993 = vmatprep.subr.bf16.mxu1 %v5911_v0 }
0x16b4   :  { %4994 = vmatpush3.bf16.msra.mxu1 %v5398_v29 }
0x16b5   :  { %4995 = vmatprep.subr.bf16.mxu1 %v5911_v0 }
0x16b8   :  { %4996 = vmatpush3.bf16.msra.mxu1 %v5399_v7 }
0x16b9   :  { %4997 = vmatprep.subr.bf16.mxu1 %v5911_v0 }
0x16bc   :  { %4998 = vmatpush3.bf16.msra.mxu1 %v5400_v11 }
0x1782   :  { %v4165_v41 = vpop.f32.mrb[44].mxu1 }
0x1783   :  { %v4166_v61 = vadd.f32 %v4663_v48, %v4165_v41  ;;  %v4989_v62 = vpop.f32.mrb[45].mxu1 }
0x1784   :  { %v4168_v50 = vpop.f32.mrb[46].mxu1 }
0x1785   :  { %v4169_v63 = vadd.f32 %v4663_v48, %v4168_v50  ;;  %v4990_v46 = vpop.f32.mrb[47].mxu1  ;;  %v4172_v54 = vsel %vm626_vm2, %v4166_v61, 0.0  ;;  %v4180_v55 = vmul.f32 %v4166_v61, %v4166_v61 }
0x1786   :  { %4173 = vadd.xlane.f32.xlu0 %v4172_v54 }
0x1787   :  { %v4175_v56 = vsel %vm626_vm2, %v4169_v63, 0.0  ;;  %v4181_v57 = vmul.f32 %v4169_v63, %v4169_v63  ;;  %v4182_v58 = vsel %vm626_vm2, %v4180_v55, 0.0 }
0x1788   :  { %4176 = vadd.xlane.f32.xlu1 %v4175_v56 }
0x1789   :  { %v4185_v27 = vsel %vm626_vm2, %v4181_v57, 0.0 }
0x178a   :  { %4183 = vadd.xlane.f32.xlu0 %v4182_v58 }
0x178c   :  { %4186 = vadd.xlane.f32.xlu1 %v4185_v27 }
0x1813   :  { %v4174_v2 = vpop.xlane.xlu0 %4173 }
0x1814   :  { %v4178_v13 = vmul.f32 0.015625, %v4174_v2 }
0x1815   :  { %v4177_v19 = vpop.xlane.xlu1 %4176 }
0x1816   :  { %v4179_v26 = vmul.f32 0.015625, %v4177_v19  ;;  %v4190_v16 = vmul.f32 %v4178_v13, %v4178_v13  ;;  %v4196_v28 = vsub.f32 %v4166_v61, %v4178_v13 }
0x1817   :  { %v4184_v14 = vpop.xlane.xlu0 %4183 }
0x1818   :  { %v4188_v17 = vmul.f32 0.015625, %v4184_v14  ;;  %v4191_v20 = vmul.f32 %v4179_v26, %v4179_v26  ;;  %v4197_v32 = vsub.f32 %v4169_v63, %v4179_v26 }
0x1819   :  { %v4187_v18 = vpop.xlane.xlu1 %4186 }
0x181a   :  { %v4192_v21 = vsub.f32 %v4188_v17, %v4190_v16  ;;  %v4189_v22 = vmul.f32 0.015625, %v4187_v18 }
0x181c   :  { %v4194_v9 = vmax.f32 %v4192_v21, 0.0  ;;  %v4193_v25 = vsub.f32 %v4189_v22, %v4191_v20 }
0x181e   :  { %v4198_v24 = vadd.f32 1e-05, %v4194_v9  ;;  %v4195_v60 = vmax.f32 %v4193_v25, 0.0 }
0x1820   :  { %5477 = vrsqrt.f32 %v4198_v24  ;;  %v4199_v0 = vadd.f32 1e-05, %v4195_v60 }
0x1822   :  { %5479 = vrsqrt.f32 %v4199_v0 }
0x182a   :  { %v5478_v31 = vpop.eup %5477 }
0x182b   :  { %v4202_v33 = vmul.f32 %v5478_v31, %v4196_v28 }
0x182c   :  { %v5480_v1 = vpop.eup %5479 }
0x182d   :  { %v4209_v36 = vmul.f32 %v4667_v30, %v4202_v33  ;;  %v4203_v38 = vmul.f32 %v5480_v1, %v4197_v32 }
0x182f   :  { %v4210_v34 = vmul.f32 %v4667_v30, %v4203_v38  ;;  %v4216_v39 = vadd.f32 %v4668_v35, %v4209_v36 }
0x1831   :  { %v4217_v40 = vadd.f32 %v4668_v35, %v4210_v34  ;;  %v4220_v12 = vmul.f32 0.70710677, %v4216_v39  ;;  %v4218_v43 = vmul.f32 0.5, %v4216_v39 }
0x1833   :  { %v4221_v10 = vmul.f32 0.70710677, %v4217_v40  ;;  %5481 = verf.f32 %v4220_v12  ;;  %v4219_v44 = vmul.f32 0.5, %v4217_v40 }
0x1835   :  { %5483 = verf.f32 %v4221_v10 }
0x183d   :  { %v5482_v23 = vpop.eup %5481 }
0x183e   :  { %v4224_v8 = vadd.f32 1.0, %v5482_v23 }
0x183f   :  { %v5484_v42 = vpop.eup %5483 }
0x1840   :  { %v4225_v45 = vadd.f32 1.0, %v5484_v42  ;;  %v4226_v47 = vmul.f32 %v4224_v8, %v4218_v43 }
0x1842   :  { %v4227_v15 = vmul.f32 %v4225_v45, %v4219_v44 }
0x1844   :  { %v4228_v6 = vpack.c.bf16 %v4227_v15, %v4226_v47 }
0x1846   :  { %5000 = vmatmul.mubr.msk.bf16.vlgmr.msra.gmra.mrb[48].mxu1 %vm626_vm2, %v4228_v6 }
0x1919   :  { %v4303_v53 = vpop.f32.mrb[48].mxu1 }
0x191a   :  { %v4304_v49 = vadd.f32 %v4669_v52, %v4303_v53  ;;  %v5001_v5 = vpop.f32.mrb[49].mxu1 }
0x191b   :  { %v4306_v4 = vpop.f32.mrb[50].mxu1 }
0x191c   :  { %4310 = vst.msk [vmem:[#allocation26] sm:$0xff] %vm379_vm1, %v4304_v49  ;;  %v4307_v3 = vadd.f32 %v4669_v52, %v4306_v4  ;;  %v5002_v51 = vpop.f32.mrb[51].mxu1 }
0x191e   :  { %4311 = vst.msk [vmem:[#allocation26 + $0x8] sm:$0xff] %vm379_vm1, %v4307_v3 }
0x191f   :  { %5826 = shalt.err (!%p5823_p12)
}
0x1920   :  { %s5827_s17 = scalar_lea.hbm %s6108_s3, 256 }
0x1921   :  { %p5828_p13 = scmp.ne.s32.totalorder %s6108_s3, %s5827_s17  ;;  %p5831_p0 = scmp.lt.u32.totalorder %s5827_s17, %s6108_s3 }
0x1923   :  { %p5833_p1 = pnand %p5831_p0, %p5828_p13 }
0x1925   :  { %5836 = shalt.err (!%p5833_p1)
}
0x1926   :  { %4323 = dma.vmem_to_hbm [thread:$0]  %s4318_s20, 256, %s6108_s3, [#allocation4], %s5900_s4, %s5900_s4, %s5901_s29  }
0x1927   :  { %5853 = dma.done.wait [#allocation4], 256  }
0x1928   :  { %5854 = vsyncadd [#allocation4], 4294967040 }
0x1929   :  { %4327 = vsyncpa [#allocation3], 1 }
0x192a   :  { %4328 = vsyncpa [#allocation6], 1 }
0x192b   :  { %4329 = vsyncpa [#allocation9], 1 }
0x192c   :  { %4330 = vsyncpa [#allocation12], 1 }
0x192d   :  { %4331 = vsyncpa [#allocation15], 1 }
0x192e   :  { %4332 = vsyncpa [#allocation18], 1 }
0x192f   :  { %4333 = vsyncpa [#allocation21], 1 }
0x1930   :  { %4334 = vsyncpa [#allocation24], 1 }
0x1931   :  { %4335 = vsyncpa [#allocation4], 1 }

</bundles_post_ra>
